<compile_context>
chip_gen: v7x
topology: tpu7x:2x2x1
jax: 0.10.0
libtpu: 0.0.40
codegen_flags: <defaults>
</compile_context>

<pallas_src>
import functools
import math

import numpy as np
import jax
import jax.numpy as jnp
from jax.experimental import pallas as pl
from jax.experimental.pallas import tpu as pltpu

NUM_CLASSES = 3
NUM_ANCHORS = 2
CLS_C = NUM_ANCHORS * NUM_CLASSES            # 6
REG_C = NUM_ANCHORS * 4                      # 8
HEAD_C = CLS_C + REG_C                       # 14 (fused cls|reg header channels)

_OFFSETS = tuple((dy, dx) for dy in (-1, 0, 1) for dx in (-1, 0, 1))
_PAD = 128                                   # lane-aligned halo pad (>= max shift |dy*W+dx|)


def _relu6(x):
    return jnp.clip(x, 0.0, 6.0)


# --------------------------------- fused kernel --------------------------------

def _ssd_fused_kernel(
        x_ref, masks_ref,
        w0_ref, b0_ref, w1_ref, b1_ref, wh1_ref, bh1_ref,            # base segment 1 + head 0
        w2_ref, b2_ref, w3_ref, b3_ref, wh2_ref, bh2_ref,            # base segment 2 + head 1
        wdw_ref, bdw_ref, wyx_ref, by_ref, wi_ref, wg_ref,           # BottleneckLSTM cell
        wh3_ref, bh3_ref,                                            # head 2
        head1_ref, head2_ref, head3_ref,                             # outputs
        halo_ref, stack_ref,                                         # VMEM scratch
        *, W, hc):
    M = x_ref.shape[1]
    masks = masks_ref[...]                                           # (9, M) tap validity

    # Zero ONLY the halo pad columns (lane-aligned, unmasked stores). The interior
    # [_PAD, _PAD+M) is fully overwritten by every conv's staging store, and rows beyond
    # the current conv's channel count are never read -> invariant preserved.
    zeros_pad = jnp.zeros((halo_ref.shape[0], _PAD), jnp.float32)
    halo_ref[:, 0:_PAD] = zeros_pad
    halo_ref[:, _PAD + M:2 * _PAD + M] = zeros_pad

    def build_stack(x):
        # Stage x into the zero-halo'd slab, then write the 9 masked shifted slices into
        # the tap-folded (9*Cin, M) operand (mask multiply folded into the stack build).
        cin = x.shape[0]
        halo_ref[0:cin, _PAD:_PAD + M] = x
        for k, (dy, dx) in enumerate(_OFFSETS):
            d = dy * W + dx
            stack_ref[k * cin:(k + 1) * cin, :] = (
                halo_ref[0:cin, _PAD + d:_PAD + d + M] * masks[k:k + 1, :])
        return cin

    def conv_from_stack(cin, w_ref, b_ref, act):
        # One MXU matmul per 3x3 conv: (Cout, 9*Cin) x (9*Cin, M), f32 accumulation.
        y = jnp.dot(w_ref[...], stack_ref[0:9 * cin, :].astype(w_ref.dtype),
                    preferred_element_type=jnp.float32) + b_ref[...]
        return _relu6(y) if act else y

    def dense3x3(x, w_ref, b_ref, act):
        return conv_from_stack(build_stack(x), w_ref, b_ref, act)

    def dw_from_stack(cin, w_ref, b_ref, act):
        # Depthwise 3x3 reusing an already-built (masked, shifted) stack: pure VPU work.
        acc = jnp.zeros((cin, M), jnp.float32)
        for k in range(9):
            acc = acc + w_ref[k] * stack_ref[k * cin:(k + 1) * cin, :]
        if b_ref is not None:
            acc = acc + b_ref[...]
        return _relu6(acc) if act else acc

    def dw3x3(x, w_ref, b_ref, act):
        # Stand-alone depthwise 3x3 (own halo staging, no stack build needed).
        c = x.shape[0]
        halo_ref[0:c, _PAD:_PAD + M] = x
        acc = jnp.zeros((c, M), jnp.float32)
        for k, (dy, dx) in enumerate(_OFFSETS):
            d = dy * W + dx
            acc = acc + w_ref[k] * (halo_ref[0:c, _PAD + d:_PAD + d + M] * masks[k:k + 1, :])
        if b_ref is not None:
            acc = acc + b_ref[...]
        return _relu6(acc) if act else acc

    # ---- base segment 1 (convs 0-1, ReLU6) + fused cls|reg header 0 ----------------
    x1 = dense3x3(x_ref[...], w0_ref, b0_ref, True)
    x1 = dense3x3(x1, w1_ref, b1_ref, True)
    # header 0 and base conv2 share input x1 -> build the stacked operand once, two dots.
    cin = build_stack(x1)
    head1_ref[...] = conv_from_stack(cin, wh1_ref, bh1_ref, False)

    # ---- base segment 2 (convs 2-3, ReLU6) + fused cls|reg header 1 ----------------
    x2 = conv_from_stack(cin, w2_ref, b2_ref, True)
    x2 = dense3x3(x2, w3_ref, b3_ref, True)
    # header 1 and the LSTM depthwise W conv share input x2 -> reuse the stack again.
    cin = build_stack(x2)
    head2_ref[...] = conv_from_stack(cin, wh2_ref, bh2_ref, False)

    # ---- BottleneckLSTM cell (h0 = c0 = 0) + fused cls|reg header 2 -----------------
    # TODO(synk): for multi-frame state carry, add h/c as aliased inputs and restore the
    # Wy_h @ h and f_t * c terms; with zero initial state they are identically zero.
    xd = dw_from_stack(cin, wdw_ref, bdw_ref, False)                 # x = W(x), dw3x3 + bias
    i = jnp.dot(wyx_ref[...], xd.astype(wyx_ref.dtype),              # Wy(cat(x, h0)) == Wy_x @ x
                preferred_element_type=jnp.float32) + by_ref[...]
    b_act = dw3x3(i, wi_ref, None, True)                             # relu6(Wi(i)), no bias
    g = jnp.dot(wg_ref[...], b_act.astype(wg_ref.dtype),             # fused [Wi_t|Wf_t|Wo_t|Wconv]
                preferred_element_type=jnp.float32)
    i_t = jax.nn.sigmoid(g[0:hc, :])
    # f_t = sigmoid(g[hc:2*hc]) multiplies c0 == 0 -> dead, skipped.
    o_t = jax.nn.sigmoid(g[2 * hc:3 * hc, :])
    c_t = i_t * _relu6(g[3 * hc:4 * hc, :])
    h_t = o_t * _relu6(c_t)
    head3_ref[...] = dense3x3(h_t, wh3_ref, bh3_ref, False)


# ------------------------------ host-side helpers -------------------------------

def _xavier(key, shape, fan_in, fan_out):
    limit = math.sqrt(6.0 / (fan_in + fan_out))
    return jax.random.uniform(key, shape, jnp.float32, -limit, limit)


def _fold3x3(w):
    # (Cout, Cin, 3, 3) -> (Cout, 9*Cin) bf16; column order = tap-major, channel-minor,
    # matching the (9*Cin, M) stacked operand built in-kernel.
    cout, cin = w.shape[0], w.shape[1]
    return jnp.transpose(w, (0, 2, 3, 1)).reshape(cout, 9 * cin).astype(jnp.bfloat16)


def _fold_dw(w):
    # (C, 1, 3, 3) PyTorch depthwise layout -> (9, C, 1) kernel layout (f32).
    c = w.shape[0]
    return jnp.transpose(w.reshape(c, 9), (1, 0))[:, :, None]


def _make_masks(n, H, W):
    # (9, M) validity masks: zero out taps that cross an image / row boundary.
    rows = []
    for dy, dx in _OFFSETS:
        mi = ((np.arange(H) + dy >= 0) & (np.arange(H) + dy < H)).astype(np.float32)
        mj = ((np.arange(W) + dx >= 0) & (np.arange(W) + dx < W)).astype(np.float32)
        rows.append(np.tile(np.outer(mi, mj).reshape(-1), n))
    return jnp.asarray(np.stack(rows, axis=0))


def _split_head(head, n, H, W):
    # head: (HEAD_C, M) -> PyTorch's permute(0,2,3,1).view(N,-1,C) semantics.
    t = jnp.transpose(head, (1, 0)).reshape(n, H * W, HEAD_C)
    conf = t[..., :CLS_C].reshape(n, -1, NUM_CLASSES)
    loc = t[..., CLS_C:].reshape(n, -1, 4)
    return conf, loc


# ------------------------------ model definition --------------------------------

def init_params(key):
    keys = iter(jax.random.split(key, 16))
    # base net: 4 conv3x3+ReLU6 layers 4->8->8->8->16 (xavier weight, zero bias).
    base_channels = [(4, 8), (8, 8), (8, 8), (8, 16)]
    base = [dict(w=_xavier(next(keys), (cout, cin, 3, 3), cin * 9, cout * 9),
                 b=jnp.zeros((cout,), jnp.float32)) for cin, cout in base_channels]
    # headers after base segment 1 (C=8), base segment 2 (C=16), LSTM output (C=hidden=8).
    headers = []
    for c in (8, 16, 8):
        headers.append(dict(
            cls_w=_xavier(next(keys), (CLS_C, c, 3, 3), c * 9, CLS_C * 9),
            cls_b=jnp.zeros((CLS_C,), jnp.float32),
            reg_w=_xavier(next(keys), (REG_C, c, 3, 3), c * 9, REG_C * 9),
            reg_b=jnp.zeros((REG_C,), jnp.float32)))
    # BottleneckLSTM cell: input=16, hidden=8 (Wc_t exists in the module but is unused).
    cin_l, hc = 16, 8
    lstm = dict(
        W_w=_xavier(next(keys), (cin_l, 1, 3, 3), 9, 9),              # depthwise 3x3 + bias
        W_b=jnp.zeros((cin_l,), jnp.float32),
        Wy_w=_xavier(next(keys), (hc, cin_l + hc), cin_l + hc, hc),   # 1x1 on cat(x, h)
        Wy_b=jnp.zeros((hc,), jnp.float32),
        Wi_w=_xavier(next(keys), (hc, 1, 3, 3), 9, 9),                # depthwise 3x3, no bias
        Wg_w=_xavier(next(keys), (4 * hc, hc), hc, hc),               # [Wi_t|Wf_t|Wo_t|Wconv] 1x1
    )
    return dict(base=base, headers=headers, lstm=lstm)


def ssd_forward(x_nchw, params):
    n, cin, H, W = x_nchw.shape
    M = n * H * W
    assert W + 1 <= _PAD
    # NCHW -> channels-first flattened (C, M); M = N*H*W sits on the 128-lane axis.
    x = jnp.transpose(x_nchw.astype(jnp.float32), (1, 0, 2, 3)).reshape(cin, M)
    masks = _make_masks(n, H, W)

    base, heads, lstm = params["base"], params["headers"], params["lstm"]
    hc = lstm["Wg_w"].shape[0] // 4                    # static (from weight shape) -> jit-safe
    cin_l = lstm["Wy_w"].shape[1] - hc

    def head_wb(h):
        w = _fold3x3(jnp.concatenate([h["cls_w"], h["reg_w"]], axis=0))   # fused cls|reg Cout
        b = jnp.concatenate([h["cls_b"], h["reg_b"]]).reshape(-1, 1)
        return w, b

    wh1, bh1 = head_wb(heads[0])
    wh2, bh2 = head_wb(heads[1])
    wh3, bh3 = head_wb(heads[2])

    inputs = (
        x, masks,
        _fold3x3(base[0]["w"]), base[0]["b"].reshape(-1, 1),
        _fold3x3(base[1]["w"]), base[1]["b"].reshape(-1, 1),
        wh1, bh1,
        _fold3x3(base[2]["w"]), base[2]["b"].reshape(-1, 1),
        _fold3x3(base[3]["w"]), base[3]["b"].reshape(-1, 1),
        wh2, bh2,
        _fold_dw(lstm["W_w"]), lstm["W_b"].reshape(-1, 1),
        lstm["Wy_w"][:, :cin_l].astype(jnp.bfloat16), lstm["Wy_b"].reshape(-1, 1),
        _fold_dw(lstm["Wi_w"]),
        lstm["Wg_w"].astype(jnp.bfloat16),
        wh3, bh3,
    )

    cmax = max([cin, hc] + [layer["w"].shape[0] for layer in base])
    spec = pl.BlockSpec(memory_space=pltpu.MemorySpace.VMEM)
    out_shape = tuple(jax.ShapeDtypeStruct((HEAD_C, M), jnp.float32) for _ in range(3))
    head1, head2, head3 = pl.pallas_call(
        functools.partial(_ssd_fused_kernel, W=W, hc=hc),
        out_shape=out_shape,
        in_specs=[spec] * len(inputs),
        out_specs=tuple(spec for _ in range(3)),
        scratch_shapes=[
            pltpu.VMEM((cmax, 2 * _PAD + M), jnp.float32),   # zero-halo'd activation slab
            pltpu.VMEM((9 * cmax, M), jnp.float32),          # tap-folded (9*Cin, M) operand
        ],
    )(*inputs)

    confidences, locations = [], []
    for head in (head1, head2, head3):
        c_, l_ = _split_head(head, n, H, W)
        confidences.append(c_)
        locations.append(l_)
    # TODO(synk): is_test branch (softmax over classes + prior-box decode via box_utils)
    # is not implemented; the training path returns raw (confidences, locations).
    return jnp.concatenate(confidences, axis=1), jnp.concatenate(locations, axis=1)


# --------------------- pure-JAX reference (matching numerics) --------------------

def ssd_reference(x_nchw, params):
    # NCHW reference emulating the kernel's bf16-operand / f32-accumulation numerics.
    hi = jax.lax.Precision.HIGHEST

    def q(a):
        return a.astype(jnp.bfloat16).astype(jnp.float32)

    def conv3x3(t, w, b):
        y = jax.lax.conv_general_dilated(q(t), q(w), (1, 1), "SAME",
                                         dimension_numbers=("NCHW", "OIHW", "NCHW"),
                                         precision=hi)
        return y + b.reshape(1, -1, 1, 1)

    def dwconv3x3(t, w, b):
        y = jax.lax.conv_general_dilated(t, w, (1, 1), "SAME",
                                         dimension_numbers=("NCHW", "OIHW", "NCHW"),
                                         feature_group_count=t.shape[1], precision=hi)
        return y if b is None else y + b.reshape(1, -1, 1, 1)

    def conv1x1(t, w, b):
        y = jax.lax.conv_general_dilated(q(t), q(w[:, :, None, None]), (1, 1), "SAME",
                                         dimension_numbers=("NCHW", "OIHW", "NCHW"),
                                         precision=hi)
        return y if b is None else y + b.reshape(1, -1, 1, 1)

    base, heads, lstm = params["base"], params["headers"], params["lstm"]
    n = x_nchw.shape[0]
    confs, locs = [], []

    def header(i, t):
        c = conv3x3(t, heads[i]["cls_w"], heads[i]["cls_b"])
        r = conv3x3(t, heads[i]["reg_w"], heads[i]["reg_b"])
        confs.append(jnp.transpose(c, (0, 2, 3, 1)).reshape(n, -1, NUM_CLASSES))
        locs.append(jnp.transpose(r, (0, 2, 3, 1)).reshape(n, -1, 4))

    t = x_nchw.astype(jnp.float32)
    t = _relu6(conv3x3(t, base[0]["w"], base[0]["b"]))
    t = _relu6(conv3x3(t, base[1]["w"], base[1]["b"]))
    header(0, t)
    t = _relu6(conv3x3(t, base[2]["w"], base[2]["b"]))
    t = _relu6(conv3x3(t, base[3]["w"], base[3]["b"]))
    header(1, t)
    # BottleneckLSTM cell with zero-initialized h/c (init_hidden).
    hc = lstm["Wg_w"].shape[0] // 4
    xd = dwconv3x3(t, lstm["W_w"], lstm["W_b"])
    h0 = jnp.zeros((n, hc) + t.shape[2:], jnp.float32)
    i = conv1x1(jnp.concatenate([xd, h0], axis=1), lstm["Wy_w"], lstm["Wy_b"])
    b_act = _relu6(dwconv3x3(i, lstm["Wi_w"], None))
    g = conv1x1(b_act, lstm["Wg_w"], None)
    i_t = jax.nn.sigmoid(g[:, 0:hc])
    f_t = jax.nn.sigmoid(g[:, hc:2 * hc])
    o_t = jax.nn.sigmoid(g[:, 2 * hc:3 * hc])
    c_t = f_t * 0.0 + i_t * _relu6(g[:, 3 * hc:4 * hc])
    h_t = o_t * _relu6(c_t)
    header(2, h_t)
    return jnp.concatenate(confs, axis=1), jnp.concatenate(locs, axis=1)


# ----------------------------------- main ----------------------------------------

if __name__ == "__main__":
    key = jax.random.PRNGKey(0)
    k_param, k_input = jax.random.split(key)
    params = init_params(k_param)
    x = jax.random.normal(k_input, (2, 4, 8, 8), jnp.float32)   # NCHW, M = N*H*W = 128

    fwd = jax.jit(ssd_forward)
    confs, locs = fwd(x, params)
    jax.block_until_ready((confs, locs))

    # 3 headers x (8*8 spatial x 2 anchors) = 384 boxes
    assert confs.shape == (2, 384, NUM_CLASSES), confs.shape
    assert locs.shape == (2, 384, 4), locs.shape
    assert bool(jnp.all(jnp.isfinite(confs))) and bool(jnp.all(jnp.isfinite(locs)))

    # tolerance check vs a pure-JAX reference with matching bf16/f32 numerics
    ref_confs, ref_locs = jax.jit(ssd_reference)(x, params)
    np.testing.assert_allclose(np.asarray(confs), np.asarray(ref_confs), rtol=3e-2, atol=3e-2)
    np.testing.assert_allclose(np.asarray(locs), np.asarray(ref_locs), rtol=3e-2, atol=3e-2)

    print("KERNEL_OK")
</pallas_src>

<mosaic_0001>
module attributes {stable_mosaic.version = 11 : i64} {
  func.func @_ssd_fused_kernel(%arg0: memref<4x128xf32, #tpu.memory_space<vmem>>, %arg1: memref<9x128xf32, #tpu.memory_space<vmem>>, %arg2: memref<8x36xbf16, #tpu.memory_space<vmem>>, %arg3: memref<8x1xf32, #tpu.memory_space<vmem>>, %arg4: memref<8x72xbf16, #tpu.memory_space<vmem>>, %arg5: memref<8x1xf32, #tpu.memory_space<vmem>>, %arg6: memref<14x72xbf16, #tpu.memory_space<vmem>>, %arg7: memref<14x1xf32, #tpu.memory_space<vmem>>, %arg8: memref<8x72xbf16, #tpu.memory_space<vmem>>, %arg9: memref<8x1xf32, #tpu.memory_space<vmem>>, %arg10: memref<16x72xbf16, #tpu.memory_space<vmem>>, %arg11: memref<16x1xf32, #tpu.memory_space<vmem>>, %arg12: memref<14x144xbf16, #tpu.memory_space<vmem>>, %arg13: memref<14x1xf32, #tpu.memory_space<vmem>>, %arg14: memref<9x16x1xf32, #tpu.memory_space<vmem>>, %arg15: memref<16x1xf32, #tpu.memory_space<vmem>>, %arg16: memref<8x16xbf16, #tpu.memory_space<vmem>>, %arg17: memref<8x1xf32, #tpu.memory_space<vmem>>, %arg18: memref<9x8x1xf32, #tpu.memory_space<vmem>>, %arg19: memref<32x8xbf16, #tpu.memory_space<vmem>>, %arg20: memref<14x72xbf16, #tpu.memory_space<vmem>>, %arg21: memref<14x1xf32, #tpu.memory_space<vmem>>, %arg22: memref<14x128xf32, #tpu.memory_space<vmem>>, %arg23: memref<14x128xf32, #tpu.memory_space<vmem>>, %arg24: memref<14x128xf32, #tpu.memory_space<vmem>>, %arg25: memref<16x384xf32, #tpu.memory_space<vmem>>, %arg26: memref<144x128xf32, #tpu.memory_space<vmem>>) attributes {dimension_semantics = [], scalar_prefetch = 0 : i64, scratch_operands = 2 : i64, tpu.core_type = #tpu.core_type<tc>} {
    %c0 = arith.constant 0 : index
    %c0_0 = arith.constant 0 : index
    %0 = vector.load %arg1[%c0, %c0_0] : memref<9x128xf32, #tpu.memory_space<vmem>>, vector<9x128xf32>
    %cst = arith.constant 0.000000e+00 : f32
    %1 = vector.broadcast %cst : f32 to vector<16x128xf32>
    %c0_1 = arith.constant 0 : index
    %c0_2 = arith.constant 0 : index
    %2 = vector.load %arg25[%c0_1, %c0_2] : memref<16x384xf32, #tpu.memory_space<vmem>>, vector<16x128xf32>
    tpu.vector_store %arg25[%c0_1, %c0_2], %1 {strides = array<i32>} : memref<16x384xf32, #tpu.memory_space<vmem>>, vector<16x128xf32>,
    %c0_3 = arith.constant 0 : index
    %c256 = arith.constant 256 : index
    %3 = vector.load %arg25[%c0_3, %c256] : memref<16x384xf32, #tpu.memory_space<vmem>>, vector<16x128xf32>
    tpu.vector_store %arg25[%c0_3, %c256], %1 {strides = array<i32>} : memref<16x384xf32, #tpu.memory_space<vmem>>, vector<16x128xf32>,
    %c0_4 = arith.constant 0 : index
    %c0_5 = arith.constant 0 : index
    %4 = vector.load %arg0[%c0_4, %c0_5] : memref<4x128xf32, #tpu.memory_space<vmem>>, vector<4x128xf32>
    %c0_6 = arith.constant 0 : index
    %c128 = arith.constant 128 : index
    %5 = vector.load %arg25[%c0_6, %c128] : memref<16x384xf32, #tpu.memory_space<vmem>>, vector<4x128xf32>
    tpu.vector_store %arg25[%c0_6, %c128], %4 {strides = array<i32>} : memref<16x384xf32, #tpu.memory_space<vmem>>, vector<4x128xf32>,
    %c0_7 = arith.constant 0 : index
    %c119 = arith.constant 119 : index
    %6 = vector.load %arg25[%c0_7, %c119] : memref<16x384xf32, #tpu.memory_space<vmem>>, vector<4x128xf32>
    %7 = vector.extract_strided_slice %0 {offsets = [0, 0], sizes = [1, 128], strides = [1, 1]} : vector<9x128xf32> to vector<1x128xf32>
    %8 = vector.broadcast %7 : vector<1x128xf32> to vector<4x128xf32>
    %9 = arith.mulf %6, %8 : vector<4x128xf32>
    %c0_8 = arith.constant 0 : index
    %c0_9 = arith.constant 0 : index
    %10 = vector.load %arg26[%c0_8, %c0_9] : memref<144x128xf32, #tpu.memory_space<vmem>>, vector<4x128xf32>
    tpu.vector_store %arg26[%c0_8, %c0_9], %9 {strides = array<i32>} : memref<144x128xf32, #tpu.memory_space<vmem>>, vector<4x128xf32>,
    %c0_10 = arith.constant 0 : index
    %c120 = arith.constant 120 : index
    %11 = vector.load %arg25[%c0_10, %c120] : memref<16x384xf32, #tpu.memory_space<vmem>>, vector<4x128xf32>
    %12 = vector.extract_strided_slice %0 {offsets = [1, 0], sizes = [1, 128], strides = [1, 1]} : vector<9x128xf32> to vector<1x128xf32>
    %13 = vector.broadcast %12 : vector<1x128xf32> to vector<4x128xf32>
    %14 = arith.mulf %11, %13 : vector<4x128xf32>
    %c4 = arith.constant 4 : index
    %c0_11 = arith.constant 0 : index
    %15 = vector.load %arg26[%c4, %c0_11] : memref<144x128xf32, #tpu.memory_space<vmem>>, vector<4x128xf32>
    tpu.vector_store %arg26[%c4, %c0_11], %14 {strides = array<i32>} : memref<144x128xf32, #tpu.memory_space<vmem>>, vector<4x128xf32>,
    %c0_12 = arith.constant 0 : index
    %c121 = arith.constant 121 : index
    %16 = vector.load %arg25[%c0_12, %c121] : memref<16x384xf32, #tpu.memory_space<vmem>>, vector<4x128xf32>
    %17 = vector.extract_strided_slice %0 {offsets = [2, 0], sizes = [1, 128], strides = [1, 1]} : vector<9x128xf32> to vector<1x128xf32>
    %18 = vector.broadcast %17 : vector<1x128xf32> to vector<4x128xf32>
    %19 = arith.mulf %16, %18 : vector<4x128xf32>
    %c8 = arith.constant 8 : index
    %c0_13 = arith.constant 0 : index
    %20 = vector.load %arg26[%c8, %c0_13] : memref<144x128xf32, #tpu.memory_space<vmem>>, vector<4x128xf32>
    tpu.vector_store %arg26[%c8, %c0_13], %19 {strides = array<i32>} : memref<144x128xf32, #tpu.memory_space<vmem>>, vector<4x128xf32>,
    %c0_14 = arith.constant 0 : index
    %c127 = arith.constant 127 : index
    %21 = vector.load %arg25[%c0_14, %c127] : memref<16x384xf32, #tpu.memory_space<vmem>>, vector<4x128xf32>
    %22 = vector.extract_strided_slice %0 {offsets = [3, 0], sizes = [1, 128], strides = [1, 1]} : vector<9x128xf32> to vector<1x128xf32>
    %23 = vector.broadcast %22 : vector<1x128xf32> to vector<4x128xf32>
    %24 = arith.mulf %21, %23 : vector<4x128xf32>
    %c12 = arith.constant 12 : index
    %c0_15 = arith.constant 0 : index
    %25 = vector.load %arg26[%c12, %c0_15] : memref<144x128xf32, #tpu.memory_space<vmem>>, vector<4x128xf32>
    tpu.vector_store %arg26[%c12, %c0_15], %24 {strides = array<i32>} : memref<144x128xf32, #tpu.memory_space<vmem>>, vector<4x128xf32>,
    %c0_16 = arith.constant 0 : index
    %c128_17 = arith.constant 128 : index
    %26 = vector.load %arg25[%c0_16, %c128_17] : memref<16x384xf32, #tpu.memory_space<vmem>>, vector<4x128xf32>
    %27 = vector.extract_strided_slice %0 {offsets = [4, 0], sizes = [1, 128], strides = [1, 1]} : vector<9x128xf32> to vector<1x128xf32>
    %28 = vector.broadcast %27 : vector<1x128xf32> to vector<4x128xf32>
    %29 = arith.mulf %26, %28 : vector<4x128xf32>
    %c16 = arith.constant 16 : index
    %c0_18 = arith.constant 0 : index
    %30 = vector.load %arg26[%c16, %c0_18] : memref<144x128xf32, #tpu.memory_space<vmem>>, vector<4x128xf32>
    tpu.vector_store %arg26[%c16, %c0_18], %29 {strides = array<i32>} : memref<144x128xf32, #tpu.memory_space<vmem>>, vector<4x128xf32>,
    %c0_19 = arith.constant 0 : index
    %c129 = arith.constant 129 : index
    %31 = vector.load %arg25[%c0_19, %c129] : memref<16x384xf32, #tpu.memory_space<vmem>>, vector<4x128xf32>
    %32 = vector.extract_strided_slice %0 {offsets = [5, 0], sizes = [1, 128], strides = [1, 1]} : vector<9x128xf32> to vector<1x128xf32>
    %33 = vector.broadcast %32 : vector<1x128xf32> to vector<4x128xf32>
    %34 = arith.mulf %31, %33 : vector<4x128xf32>
    %c20 = arith.constant 20 : index
    %c0_20 = arith.constant 0 : index
    %35 = vector.load %arg26[%c20, %c0_20] : memref<144x128xf32, #tpu.memory_space<vmem>>, vector<4x128xf32>
    tpu.vector_store %arg26[%c20, %c0_20], %34 {strides = array<i32>} : memref<144x128xf32, #tpu.memory_space<vmem>>, vector<4x128xf32>,
    %c0_21 = arith.constant 0 : index
    %c135 = arith.constant 135 : index
    %36 = vector.load %arg25[%c0_21, %c135] : memref<16x384xf32, #tpu.memory_space<vmem>>, vector<4x128xf32>
    %37 = vector.extract_strided_slice %0 {offsets = [6, 0], sizes = [1, 128], strides = [1, 1]} : vector<9x128xf32> to vector<1x128xf32>
    %38 = vector.broadcast %37 : vector<1x128xf32> to vector<4x128xf32>
    %39 = arith.mulf %36, %38 : vector<4x128xf32>
    %c24 = arith.constant 24 : index
    %c0_22 = arith.constant 0 : index
    %40 = vector.load %arg26[%c24, %c0_22] : memref<144x128xf32, #tpu.memory_space<vmem>>, vector<4x128xf32>
    tpu.vector_store %arg26[%c24, %c0_22], %39 {strides = array<i32>} : memref<144x128xf32, #tpu.memory_space<vmem>>, vector<4x128xf32>,
    %c0_23 = arith.constant 0 : index
    %c136 = arith.constant 136 : index
    %41 = vector.load %arg25[%c0_23, %c136] : memref<16x384xf32, #tpu.memory_space<vmem>>, vector<4x128xf32>
    %42 = vector.extract_strided_slice %0 {offsets = [7, 0], sizes = [1, 128], strides = [1, 1]} : vector<9x128xf32> to vector<1x128xf32>
    %43 = vector.broadcast %42 : vector<1x128xf32> to vector<4x128xf32>
    %44 = arith.mulf %41, %43 : vector<4x128xf32>
    %c28 = arith.constant 28 : index
    %c0_24 = arith.constant 0 : index
    %45 = vector.load %arg26[%c28, %c0_24] : memref<144x128xf32, #tpu.memory_space<vmem>>, vector<4x128xf32>
    tpu.vector_store %arg26[%c28, %c0_24], %44 {strides = array<i32>} : memref<144x128xf32, #tpu.memory_space<vmem>>, vector<4x128xf32>,
    %c0_25 = arith.constant 0 : index
    %c137 = arith.constant 137 : index
    %46 = vector.load %arg25[%c0_25, %c137] : memref<16x384xf32, #tpu.memory_space<vmem>>, vector<4x128xf32>
    %47 = vector.extract_strided_slice %0 {offsets = [8, 0], sizes = [1, 128], strides = [1, 1]} : vector<9x128xf32> to vector<1x128xf32>
    %48 = vector.broadcast %47 : vector<1x128xf32> to vector<4x128xf32>
    %49 = arith.mulf %46, %48 : vector<4x128xf32>
    %c32 = arith.constant 32 : index
    %c0_26 = arith.constant 0 : index
    %50 = vector.load %arg26[%c32, %c0_26] : memref<144x128xf32, #tpu.memory_space<vmem>>, vector<4x128xf32>
    tpu.vector_store %arg26[%c32, %c0_26], %49 {strides = array<i32>} : memref<144x128xf32, #tpu.memory_space<vmem>>, vector<4x128xf32>,
    %c0_27 = arith.constant 0 : index
    %c0_28 = arith.constant 0 : index
    %51 = vector.load %arg2[%c0_27, %c0_28] : memref<8x36xbf16, #tpu.memory_space<vmem>>, vector<8x36xbf16>
    %c0_29 = arith.constant 0 : index
    %c0_30 = arith.constant 0 : index
    %52 = vector.load %arg26[%c0_29, %c0_30] : memref<144x128xf32, #tpu.memory_space<vmem>>, vector<36x128xf32>
    %53 = arith.truncf %52 : vector<36x128xf32> to vector<36x128xbf16>
    %cst_31 = arith.constant dense<0.000000e+00> : vector<8x128xf32>
    %54 = tpu.matmul %51, %53, %cst_31 {dimension_numbers = #tpu.dot_dimension_numbers<[1], [0], [0], [1], [0, 0, 1, 1], [], []>} : vector<8x36xbf16>, vector<36x128xbf16>, vector<8x128xf32> -> vector<8x128xf32>
    %c0_32 = arith.constant 0 : index
    %c0_33 = arith.constant 0 : index
    %55 = vector.load %arg3[%c0_32, %c0_33] : memref<8x1xf32, #tpu.memory_space<vmem>>, vector<8x1xf32>
    %56 = vector.broadcast %55 : vector<8x1xf32> to vector<8x128xf32>
    %57 = arith.addf %54, %56 : vector<8x128xf32>
    %cst_34 = arith.constant 0.000000e+00 : f32
    %cst_35 = arith.constant 6.000000e+00 : f32
    %58 = vector.broadcast %cst_34 : f32 to vector<8x128xf32>
    %59 = arith.maximumf %58, %57 : vector<8x128xf32>
    %60 = vector.broadcast %cst_35 : f32 to vector<8x128xf32>
    %61 = arith.minimumf %60, %59 : vector<8x128xf32>
    %c0_36 = arith.constant 0 : index
    %c128_37 = arith.constant 128 : index
    %62 = vector.load %arg25[%c0_36, %c128_37] : memref<16x384xf32, #tpu.memory_space<vmem>>, vector<8x128xf32>
    tpu.vector_store %arg25[%c0_36, %c128_37], %61 {strides = array<i32>} : memref<16x384xf32, #tpu.memory_space<vmem>>, vector<8x128xf32>,
    %c0_38 = arith.constant 0 : index
    %c119_39 = arith.constant 119 : index
    %63 = vector.load %arg25[%c0_38, %c119_39] : memref<16x384xf32, #tpu.memory_space<vmem>>, vector<8x128xf32>
    %64 = vector.extract_strided_slice %0 {offsets = [0, 0], sizes = [1, 128], strides = [1, 1]} : vector<9x128xf32> to vector<1x128xf32>
    %65 = vector.broadcast %64 : vector<1x128xf32> to vector<8x128xf32>
    %66 = arith.mulf %63, %65 : vector<8x128xf32>
    %c0_40 = arith.constant 0 : index
    %c0_41 = arith.constant 0 : index
    %67 = vector.load %arg26[%c0_40, %c0_41] : memref<144x128xf32, #tpu.memory_space<vmem>>, vector<8x128xf32>
    tpu.vector_store %arg26[%c0_40, %c0_41], %66 {strides = array<i32>} : memref<144x128xf32, #tpu.memory_space<vmem>>, vector<8x128xf32>,
    %c0_42 = arith.constant 0 : index
    %c120_43 = arith.constant 120 : index
    %68 = vector.load %arg25[%c0_42, %c120_43] : memref<16x384xf32, #tpu.memory_space<vmem>>, vector<8x128xf32>
    %69 = vector.extract_strided_slice %0 {offsets = [1, 0], sizes = [1, 128], strides = [1, 1]} : vector<9x128xf32> to vector<1x128xf32>
    %70 = vector.broadcast %69 : vector<1x128xf32> to vector<8x128xf32>
    %71 = arith.mulf %68, %70 : vector<8x128xf32>
    %c8_44 = arith.constant 8 : index
    %c0_45 = arith.constant 0 : index
    %72 = vector.load %arg26[%c8_44, %c0_45] : memref<144x128xf32, #tpu.memory_space<vmem>>, vector<8x128xf32>
    tpu.vector_store %arg26[%c8_44, %c0_45], %71 {strides = array<i32>} : memref<144x128xf32, #tpu.memory_space<vmem>>, vector<8x128xf32>,
    %c0_46 = arith.constant 0 : index
    %c121_47 = arith.constant 121 : index
    %73 = vector.load %arg25[%c0_46, %c121_47] : memref<16x384xf32, #tpu.memory_space<vmem>>, vector<8x128xf32>
    %74 = vector.extract_strided_slice %0 {offsets = [2, 0], sizes = [1, 128], strides = [1, 1]} : vector<9x128xf32> to vector<1x128xf32>
    %75 = vector.broadcast %74 : vector<1x128xf32> to vector<8x128xf32>
    %76 = arith.mulf %73, %75 : vector<8x128xf32>
    %c16_48 = arith.constant 16 : index
    %c0_49 = arith.constant 0 : index
    %77 = vector.load %arg26[%c16_48, %c0_49] : memref<144x128xf32, #tpu.memory_space<vmem>>, vector<8x128xf32>
    tpu.vector_store %arg26[%c16_48, %c0_49], %76 {strides = array<i32>} : memref<144x128xf32, #tpu.memory_space<vmem>>, vector<8x128xf32>,
    %c0_50 = arith.constant 0 : index
    %c127_51 = arith.constant 127 : index
    %78 = vector.load %arg25[%c0_50, %c127_51] : memref<16x384xf32, #tpu.memory_space<vmem>>, vector<8x128xf32>
    %79 = vector.extract_strided_slice %0 {offsets = [3, 0], sizes = [1, 128], strides = [1, 1]} : vector<9x128xf32> to vector<1x128xf32>
    %80 = vector.broadcast %79 : vector<1x128xf32> to vector<8x128xf32>
    %81 = arith.mulf %78, %80 : vector<8x128xf32>
    %c24_52 = arith.constant 24 : index
    %c0_53 = arith.constant 0 : index
    %82 = vector.load %arg26[%c24_52, %c0_53] : memref<144x128xf32, #tpu.memory_space<vmem>>, vector<8x128xf32>
    tpu.vector_store %arg26[%c24_52, %c0_53], %81 {strides = array<i32>} : memref<144x128xf32, #tpu.memory_space<vmem>>, vector<8x128xf32>,
    %c0_54 = arith.constant 0 : index
    %c128_55 = arith.constant 128 : index
    %83 = vector.load %arg25[%c0_54, %c128_55] : memref<16x384xf32, #tpu.memory_space<vmem>>, vector<8x128xf32>
    %84 = vector.extract_strided_slice %0 {offsets = [4, 0], sizes = [1, 128], strides = [1, 1]} : vector<9x128xf32> to vector<1x128xf32>
    %85 = vector.broadcast %84 : vector<1x128xf32> to vector<8x128xf32>
    %86 = arith.mulf %83, %85 : vector<8x128xf32>
    %c32_56 = arith.constant 32 : index
    %c0_57 = arith.constant 0 : index
    %87 = vector.load %arg26[%c32_56, %c0_57] : memref<144x128xf32, #tpu.memory_space<vmem>>, vector<8x128xf32>
    tpu.vector_store %arg26[%c32_56, %c0_57], %86 {strides = array<i32>} : memref<144x128xf32, #tpu.memory_space<vmem>>, vector<8x128xf32>,
    %c0_58 = arith.constant 0 : index
    %c129_59 = arith.constant 129 : index
    %88 = vector.load %arg25[%c0_58, %c129_59] : memref<16x384xf32, #tpu.memory_space<vmem>>, vector<8x128xf32>
    %89 = vector.extract_strided_slice %0 {offsets = [5, 0], sizes = [1, 128], strides = [1, 1]} : vector<9x128xf32> to vector<1x128xf32>
    %90 = vector.broadcast %89 : vector<1x128xf32> to vector<8x128xf32>
    %91 = arith.mulf %88, %90 : vector<8x128xf32>
    %c40 = arith.constant 40 : index
    %c0_60 = arith.constant 0 : index
    %92 = vector.load %arg26[%c40, %c0_60] : memref<144x128xf32, #tpu.memory_space<vmem>>, vector<8x128xf32>
    tpu.vector_store %arg26[%c40, %c0_60], %91 {strides = array<i32>} : memref<144x128xf32, #tpu.memory_space<vmem>>, vector<8x128xf32>,
    %c0_61 = arith.constant 0 : index
    %c135_62 = arith.constant 135 : index
    %93 = vector.load %arg25[%c0_61, %c135_62] : memref<16x384xf32, #tpu.memory_space<vmem>>, vector<8x128xf32>
    %94 = vector.extract_strided_slice %0 {offsets = [6, 0], sizes = [1, 128], strides = [1, 1]} : vector<9x128xf32> to vector<1x128xf32>
    %95 = vector.broadcast %94 : vector<1x128xf32> to vector<8x128xf32>
    %96 = arith.mulf %93, %95 : vector<8x128xf32>
    %c48 = arith.constant 48 : index
    %c0_63 = arith.constant 0 : index
    %97 = vector.load %arg26[%c48, %c0_63] : memref<144x128xf32, #tpu.memory_space<vmem>>, vector<8x128xf32>
    tpu.vector_store %arg26[%c48, %c0_63], %96 {strides = array<i32>} : memref<144x128xf32, #tpu.memory_space<vmem>>, vector<8x128xf32>,
    %c0_64 = arith.constant 0 : index
    %c136_65 = arith.constant 136 : index
    %98 = vector.load %arg25[%c0_64, %c136_65] : memref<16x384xf32, #tpu.memory_space<vmem>>, vector<8x128xf32>
    %99 = vector.extract_strided_slice %0 {offsets = [7, 0], sizes = [1, 128], strides = [1, 1]} : vector<9x128xf32> to vector<1x128xf32>
    %100 = vector.broadcast %99 : vector<1x128xf32> to vector<8x128xf32>
    %101 = arith.mulf %98, %100 : vector<8x128xf32>
    %c56 = arith.constant 56 : index
    %c0_66 = arith.constant 0 : index
    %102 = vector.load %arg26[%c56, %c0_66] : memref<144x128xf32, #tpu.memory_space<vmem>>, vector<8x128xf32>
    tpu.vector_store %arg26[%c56, %c0_66], %101 {strides = array<i32>} : memref<144x128xf32, #tpu.memory_space<vmem>>, vector<8x128xf32>,
    %c0_67 = arith.constant 0 : index
    %c137_68 = arith.constant 137 : index
    %103 = vector.load %arg25[%c0_67, %c137_68] : memref<16x384xf32, #tpu.memory_space<vmem>>, vector<8x128xf32>
    %104 = vector.extract_strided_slice %0 {offsets = [8, 0], sizes = [1, 128], strides = [1, 1]} : vector<9x128xf32> to vector<1x128xf32>
    %105 = vector.broadcast %104 : vector<1x128xf32> to vector<8x128xf32>
    %106 = arith.mulf %103, %105 : vector<8x128xf32>
    %c64 = arith.constant 64 : index
    %c0_69 = arith.constant 0 : index
    %107 = vector.load %arg26[%c64, %c0_69] : memref<144x128xf32, #tpu.memory_space<vmem>>, vector<8x128xf32>
    tpu.vector_store %arg26[%c64, %c0_69], %106 {strides = array<i32>} : memref<144x128xf32, #tpu.memory_space<vmem>>, vector<8x128xf32>,
    %c0_70 = arith.constant 0 : index
    %c0_71 = arith.constant 0 : index
    %108 = vector.load %arg4[%c0_70, %c0_71] : memref<8x72xbf16, #tpu.memory_space<vmem>>, vector<8x72xbf16>
    %c0_72 = arith.constant 0 : index
    %c0_73 = arith.constant 0 : index
    %109 = vector.load %arg26[%c0_72, %c0_73] : memref<144x128xf32, #tpu.memory_space<vmem>>, vector<72x128xf32>
    %110 = arith.truncf %109 : vector<72x128xf32> to vector<72x128xbf16>
    %cst_74 = arith.constant dense<0.000000e+00> : vector<8x128xf32>
    %111 = tpu.matmul %108, %110, %cst_74 {dimension_numbers = #tpu.dot_dimension_numbers<[1], [0], [0], [1], [0, 0, 1, 1], [], []>} : vector<8x72xbf16>, vector<72x128xbf16>, vector<8x128xf32> -> vector<8x128xf32>
    %c0_75 = arith.constant 0 : index
    %c0_76 = arith.constant 0 : index
    %112 = vector.load %arg5[%c0_75, %c0_76] : memref<8x1xf32, #tpu.memory_space<vmem>>, vector<8x1xf32>
    %113 = vector.broadcast %112 : vector<8x1xf32> to vector<8x128xf32>
    %114 = arith.addf %111, %113 : vector<8x128xf32>
    %cst_77 = arith.constant 0.000000e+00 : f32
    %cst_78 = arith.constant 6.000000e+00 : f32
    %115 = vector.broadcast %cst_77 : f32 to vector<8x128xf32>
    %116 = arith.maximumf %115, %114 : vector<8x128xf32>
    %117 = vector.broadcast %cst_78 : f32 to vector<8x128xf32>
    %118 = arith.minimumf %117, %116 : vector<8x128xf32>
    %c0_79 = arith.constant 0 : index
    %c128_80 = arith.constant 128 : index
    %119 = vector.load %arg25[%c0_79, %c128_80] : memref<16x384xf32, #tpu.memory_space<vmem>>, vector<8x128xf32>
    tpu.vector_store %arg25[%c0_79, %c128_80], %118 {strides = array<i32>} : memref<16x384xf32, #tpu.memory_space<vmem>>, vector<8x128xf32>,
    %c0_81 = arith.constant 0 : index
    %c119_82 = arith.constant 119 : index
    %120 = vector.load %arg25[%c0_81, %c119_82] : memref<16x384xf32, #tpu.memory_space<vmem>>, vector<8x128xf32>
    %121 = vector.extract_strided_slice %0 {offsets = [0, 0], sizes = [1, 128], strides = [1, 1]} : vector<9x128xf32> to vector<1x128xf32>
    %122 = vector.broadcast %121 : vector<1x128xf32> to vector<8x128xf32>
    %123 = arith.mulf %120, %122 : vector<8x128xf32>
    %c0_83 = arith.constant 0 : index
    %c0_84 = arith.constant 0 : index
    %124 = vector.load %arg26[%c0_83, %c0_84] : memref<144x128xf32, #tpu.memory_space<vmem>>, vector<8x128xf32>
    tpu.vector_store %arg26[%c0_83, %c0_84], %123 {strides = array<i32>} : memref<144x128xf32, #tpu.memory_space<vmem>>, vector<8x128xf32>,
    %c0_85 = arith.constant 0 : index
    %c120_86 = arith.constant 120 : index
    %125 = vector.load %arg25[%c0_85, %c120_86] : memref<16x384xf32, #tpu.memory_space<vmem>>, vector<8x128xf32>
    %126 = vector.extract_strided_slice %0 {offsets = [1, 0], sizes = [1, 128], strides = [1, 1]} : vector<9x128xf32> to vector<1x128xf32>
    %127 = vector.broadcast %126 : vector<1x128xf32> to vector<8x128xf32>
    %128 = arith.mulf %125, %127 : vector<8x128xf32>
    %c8_87 = arith.constant 8 : index
    %c0_88 = arith.constant 0 : index
    %129 = vector.load %arg26[%c8_87, %c0_88] : memref<144x128xf32, #tpu.memory_space<vmem>>, vector<8x128xf32>
    tpu.vector_store %arg26[%c8_87, %c0_88], %128 {strides = array<i32>} : memref<144x128xf32, #tpu.memory_space<vmem>>, vector<8x128xf32>,
    %c0_89 = arith.constant 0 : index
    %c121_90 = arith.constant 121 : index
    %130 = vector.load %arg25[%c0_89, %c121_90] : memref<16x384xf32, #tpu.memory_space<vmem>>, vector<8x128xf32>
    %131 = vector.extract_strided_slice %0 {offsets = [2, 0], sizes = [1, 128], strides = [1, 1]} : vector<9x128xf32> to vector<1x128xf32>
    %132 = vector.broadcast %131 : vector<1x128xf32> to vector<8x128xf32>
    %133 = arith.mulf %130, %132 : vector<8x128xf32>
    %c16_91 = arith.constant 16 : index
    %c0_92 = arith.constant 0 : index
    %134 = vector.load %arg26[%c16_91, %c0_92] : memref<144x128xf32, #tpu.memory_space<vmem>>, vector<8x128xf32>
    tpu.vector_store %arg26[%c16_91, %c0_92], %133 {strides = array<i32>} : memref<144x128xf32, #tpu.memory_space<vmem>>, vector<8x128xf32>,
    %c0_93 = arith.constant 0 : index
    %c127_94 = arith.constant 127 : index
    %135 = vector.load %arg25[%c0_93, %c127_94] : memref<16x384xf32, #tpu.memory_space<vmem>>, vector<8x128xf32>
    %136 = vector.extract_strided_slice %0 {offsets = [3, 0], sizes = [1, 128], strides = [1, 1]} : vector<9x128xf32> to vector<1x128xf32>
    %137 = vector.broadcast %136 : vector<1x128xf32> to vector<8x128xf32>
    %138 = arith.mulf %135, %137 : vector<8x128xf32>
    %c24_95 = arith.constant 24 : index
    %c0_96 = arith.constant 0 : index
    %139 = vector.load %arg26[%c24_95, %c0_96] : memref<144x128xf32, #tpu.memory_space<vmem>>, vector<8x128xf32>
    tpu.vector_store %arg26[%c24_95, %c0_96], %138 {strides = array<i32>} : memref<144x128xf32, #tpu.memory_space<vmem>>, vector<8x128xf32>,
    %c0_97 = arith.constant 0 : index
    %c128_98 = arith.constant 128 : index
    %140 = vector.load %arg25[%c0_97, %c128_98] : memref<16x384xf32, #tpu.memory_space<vmem>>, vector<8x128xf32>
    %141 = vector.extract_strided_slice %0 {offsets = [4, 0], sizes = [1, 128], strides = [1, 1]} : vector<9x128xf32> to vector<1x128xf32>
    %142 = vector.broadcast %141 : vector<1x128xf32> to vector<8x128xf32>
    %143 = arith.mulf %140, %142 : vector<8x128xf32>
    %c32_99 = arith.constant 32 : index
    %c0_100 = arith.constant 0 : index
    %144 = vector.load %arg26[%c32_99, %c0_100] : memref<144x128xf32, #tpu.memory_space<vmem>>, vector<8x128xf32>
    tpu.vector_store %arg26[%c32_99, %c0_100], %143 {strides = array<i32>} : memref<144x128xf32, #tpu.memory_space<vmem>>, vector<8x128xf32>,
    %c0_101 = arith.constant 0 : index
    %c129_102 = arith.constant 129 : index
    %145 = vector.load %arg25[%c0_101, %c129_102] : memref<16x384xf32, #tpu.memory_space<vmem>>, vector<8x128xf32>
    %146 = vector.extract_strided_slice %0 {offsets = [5, 0], sizes = [1, 128], strides = [1, 1]} : vector<9x128xf32> to vector<1x128xf32>
    %147 = vector.broadcast %146 : vector<1x128xf32> to vector<8x128xf32>
    %148 = arith.mulf %145, %147 : vector<8x128xf32>
    %c40_103 = arith.constant 40 : index
    %c0_104 = arith.constant 0 : index
    %149 = vector.load %arg26[%c40_103, %c0_104] : memref<144x128xf32, #tpu.memory_space<vmem>>, vector<8x128xf32>
    tpu.vector_store %arg26[%c40_103, %c0_104], %148 {strides = array<i32>} : memref<144x128xf32, #tpu.memory_space<vmem>>, vector<8x128xf32>,
    %c0_105 = arith.constant 0 : index
    %c135_106 = arith.constant 135 : index
    %150 = vector.load %arg25[%c0_105, %c135_106] : memref<16x384xf32, #tpu.memory_space<vmem>>, vector<8x128xf32>
    %151 = vector.extract_strided_slice %0 {offsets = [6, 0], sizes = [1, 128], strides = [1, 1]} : vector<9x128xf32> to vector<1x128xf32>
    %152 = vector.broadcast %151 : vector<1x128xf32> to vector<8x128xf32>
    %153 = arith.mulf %150, %152 : vector<8x128xf32>
    %c48_107 = arith.constant 48 : index
    %c0_108 = arith.constant 0 : index
    %154 = vector.load %arg26[%c48_107, %c0_108] : memref<144x128xf32, #tpu.memory_space<vmem>>, vector<8x128xf32>
    tpu.vector_store %arg26[%c48_107, %c0_108], %153 {strides = array<i32>} : memref<144x128xf32, #tpu.memory_space<vmem>>, vector<8x128xf32>,
    %c0_109 = arith.constant 0 : index
    %c136_110 = arith.constant 136 : index
    %155 = vector.load %arg25[%c0_109, %c136_110] : memref<16x384xf32, #tpu.memory_space<vmem>>, vector<8x128xf32>
    %156 = vector.extract_strided_slice %0 {offsets = [7, 0], sizes = [1, 128], strides = [1, 1]} : vector<9x128xf32> to vector<1x128xf32>
    %157 = vector.broadcast %156 : vector<1x128xf32> to vector<8x128xf32>
    %158 = arith.mulf %155, %157 : vector<8x128xf32>
    %c56_111 = arith.constant 56 : index
    %c0_112 = arith.constant 0 : index
    %159 = vector.load %arg26[%c56_111, %c0_112] : memref<144x128xf32, #tpu.memory_space<vmem>>, vector<8x128xf32>
    tpu.vector_store %arg26[%c56_111, %c0_112], %158 {strides = array<i32>} : memref<144x128xf32, #tpu.memory_space<vmem>>, vector<8x128xf32>,
    %c0_113 = arith.constant 0 : index
    %c137_114 = arith.constant 137 : index
    %160 = vector.load %arg25[%c0_113, %c137_114] : memref<16x384xf32, #tpu.memory_space<vmem>>, vector<8x128xf32>
    %161 = vector.extract_strided_slice %0 {offsets = [8, 0], sizes = [1, 128], strides = [1, 1]} : vector<9x128xf32> to vector<1x128xf32>
    %162 = vector.broadcast %161 : vector<1x128xf32> to vector<8x128xf32>
    %163 = arith.mulf %160, %162 : vector<8x128xf32>
    %c64_115 = arith.constant 64 : index
    %c0_116 = arith.constant 0 : index
    %164 = vector.load %arg26[%c64_115, %c0_116] : memref<144x128xf32, #tpu.memory_space<vmem>>, vector<8x128xf32>
    tpu.vector_store %arg26[%c64_115, %c0_116], %163 {strides = array<i32>} : memref<144x128xf32, #tpu.memory_space<vmem>>, vector<8x128xf32>,
    %c0_117 = arith.constant 0 : index
    %c0_118 = arith.constant 0 : index
    %165 = vector.load %arg6[%c0_117, %c0_118] : memref<14x72xbf16, #tpu.memory_space<vmem>>, vector<14x72xbf16>
    %c0_119 = arith.constant 0 : index
    %c0_120 = arith.constant 0 : index
    %166 = vector.load %arg26[%c0_119, %c0_120] : memref<144x128xf32, #tpu.memory_space<vmem>>, vector<72x128xf32>
    %167 = arith.truncf %166 : vector<72x128xf32> to vector<72x128xbf16>
    %cst_121 = arith.constant dense<0.000000e+00> : vector<14x128xf32>
    %168 = tpu.matmul %165, %167, %cst_121 {dimension_numbers = #tpu.dot_dimension_numbers<[1], [0], [0], [1], [0, 0, 1, 1], [], []>} : vector<14x72xbf16>, vector<72x128xbf16>, vector<14x128xf32> -> vector<14x128xf32>
    %c0_122 = arith.constant 0 : index
    %c0_123 = arith.constant 0 : index
    %169 = vector.load %arg7[%c0_122, %c0_123] : memref<14x1xf32, #tpu.memory_space<vmem>>, vector<14x1xf32>
    %170 = vector.broadcast %169 : vector<14x1xf32> to vector<14x128xf32>
    %171 = arith.addf %168, %170 : vector<14x128xf32>
    %c0_124 = arith.constant 0 : index
    %c0_125 = arith.constant 0 : index
    %172 = vector.load %arg22[%c0_124, %c0_125] : memref<14x128xf32, #tpu.memory_space<vmem>>, vector<14x128xf32>
    tpu.vector_store %arg22[%c0_124, %c0_125], %171 {strides = array<i32>} : memref<14x128xf32, #tpu.memory_space<vmem>>, vector<14x128xf32>,
    %c0_126 = arith.constant 0 : index
    %c0_127 = arith.constant 0 : index
    %173 = vector.load %arg8[%c0_126, %c0_127] : memref<8x72xbf16, #tpu.memory_space<vmem>>, vector<8x72xbf16>
    %c0_128 = arith.constant 0 : index
    %c0_129 = arith.constant 0 : index
    %174 = vector.load %arg26[%c0_128, %c0_129] : memref<144x128xf32, #tpu.memory_space<vmem>>, vector<72x128xf32>
    %175 = arith.truncf %174 : vector<72x128xf32> to vector<72x128xbf16>
    %cst_130 = arith.constant dense<0.000000e+00> : vector<8x128xf32>
    %176 = tpu.matmul %173, %175, %cst_130 {dimension_numbers = #tpu.dot_dimension_numbers<[1], [0], [0], [1], [0, 0, 1, 1], [], []>} : vector<8x72xbf16>, vector<72x128xbf16>, vector<8x128xf32> -> vector<8x128xf32>
    %c0_131 = arith.constant 0 : index
    %c0_132 = arith.constant 0 : index
    %177 = vector.load %arg9[%c0_131, %c0_132] : memref<8x1xf32, #tpu.memory_space<vmem>>, vector<8x1xf32>
    %178 = vector.broadcast %177 : vector<8x1xf32> to vector<8x128xf32>
    %179 = arith.addf %176, %178 : vector<8x128xf32>
    %cst_133 = arith.constant 0.000000e+00 : f32
    %cst_134 = arith.constant 6.000000e+00 : f32
    %180 = vector.broadcast %cst_133 : f32 to vector<8x128xf32>
    %181 = arith.maximumf %180, %179 : vector<8x128xf32>
    %182 = vector.broadcast %cst_134 : f32 to vector<8x128xf32>
    %183 = arith.minimumf %182, %181 : vector<8x128xf32>
    %c0_135 = arith.constant 0 : index
    %c128_136 = arith.constant 128 : index
    %184 = vector.load %arg25[%c0_135, %c128_136] : memref<16x384xf32, #tpu.memory_space<vmem>>, vector<8x128xf32>
    tpu.vector_store %arg25[%c0_135, %c128_136], %183 {strides = array<i32>} : memref<16x384xf32, #tpu.memory_space<vmem>>, vector<8x128xf32>,
    %c0_137 = arith.constant 0 : index
    %c119_138 = arith.constant 119 : index
    %185 = vector.load %arg25[%c0_137, %c119_138] : memref<16x384xf32, #tpu.memory_space<vmem>>, vector<8x128xf32>
    %186 = vector.extract_strided_slice %0 {offsets = [0, 0], sizes = [1, 128], strides = [1, 1]} : vector<9x128xf32> to vector<1x128xf32>
    %187 = vector.broadcast %186 : vector<1x128xf32> to vector<8x128xf32>
    %188 = arith.mulf %185, %187 : vector<8x128xf32>
    %c0_139 = arith.constant 0 : index
    %c0_140 = arith.constant 0 : index
    %189 = vector.load %arg26[%c0_139, %c0_140] : memref<144x128xf32, #tpu.memory_space<vmem>>, vector<8x128xf32>
    tpu.vector_store %arg26[%c0_139, %c0_140], %188 {strides = array<i32>} : memref<144x128xf32, #tpu.memory_space<vmem>>, vector<8x128xf32>,
    %c0_141 = arith.constant 0 : index
    %c120_142 = arith.constant 120 : index
    %190 = vector.load %arg25[%c0_141, %c120_142] : memref<16x384xf32, #tpu.memory_space<vmem>>, vector<8x128xf32>
    %191 = vector.extract_strided_slice %0 {offsets = [1, 0], sizes = [1, 128], strides = [1, 1]} : vector<9x128xf32> to vector<1x128xf32>
    %192 = vector.broadcast %191 : vector<1x128xf32> to vector<8x128xf32>
    %193 = arith.mulf %190, %192 : vector<8x128xf32>
    %c8_143 = arith.constant 8 : index
    %c0_144 = arith.constant 0 : index
    %194 = vector.load %arg26[%c8_143, %c0_144] : memref<144x128xf32, #tpu.memory_space<vmem>>, vector<8x128xf32>
    tpu.vector_store %arg26[%c8_143, %c0_144], %193 {strides = array<i32>} : memref<144x128xf32, #tpu.memory_space<vmem>>, vector<8x128xf32>,
    %c0_145 = arith.constant 0 : index
    %c121_146 = arith.constant 121 : index
    %195 = vector.load %arg25[%c0_145, %c121_146] : memref<16x384xf32, #tpu.memory_space<vmem>>, vector<8x128xf32>
    %196 = vector.extract_strided_slice %0 {offsets = [2, 0], sizes = [1, 128], strides = [1, 1]} : vector<9x128xf32> to vector<1x128xf32>
    %197 = vector.broadcast %196 : vector<1x128xf32> to vector<8x128xf32>
    %198 = arith.mulf %195, %197 : vector<8x128xf32>
    %c16_147 = arith.constant 16 : index
    %c0_148 = arith.constant 0 : index
    %199 = vector.load %arg26[%c16_147, %c0_148] : memref<144x128xf32, #tpu.memory_space<vmem>>, vector<8x128xf32>
    tpu.vector_store %arg26[%c16_147, %c0_148], %198 {strides = array<i32>} : memref<144x128xf32, #tpu.memory_space<vmem>>, vector<8x128xf32>,
    %c0_149 = arith.constant 0 : index
    %c127_150 = arith.constant 127 : index
    %200 = vector.load %arg25[%c0_149, %c127_150] : memref<16x384xf32, #tpu.memory_space<vmem>>, vector<8x128xf32>
    %201 = vector.extract_strided_slice %0 {offsets = [3, 0], sizes = [1, 128], strides = [1, 1]} : vector<9x128xf32> to vector<1x128xf32>
    %202 = vector.broadcast %201 : vector<1x128xf32> to vector<8x128xf32>
    %203 = arith.mulf %200, %202 : vector<8x128xf32>
    %c24_151 = arith.constant 24 : index
    %c0_152 = arith.constant 0 : index
    %204 = vector.load %arg26[%c24_151, %c0_152] : memref<144x128xf32, #tpu.memory_space<vmem>>, vector<8x128xf32>
    tpu.vector_store %arg26[%c24_151, %c0_152], %203 {strides = array<i32>} : memref<144x128xf32, #tpu.memory_space<vmem>>, vector<8x128xf32>,
    %c0_153 = arith.constant 0 : index
    %c128_154 = arith.constant 128 : index
    %205 = vector.load %arg25[%c0_153, %c128_154] : memref<16x384xf32, #tpu.memory_space<vmem>>, vector<8x128xf32>
    %206 = vector.extract_strided_slice %0 {offsets = [4, 0], sizes = [1, 128], strides = [1, 1]} : vector<9x128xf32> to vector<1x128xf32>
    %207 = vector.broadcast %206 : vector<1x128xf32> to vector<8x128xf32>
    %208 = arith.mulf %205, %207 : vector<8x128xf32>
    %c32_155 = arith.constant 32 : index
    %c0_156 = arith.constant 0 : index
    %209 = vector.load %arg26[%c32_155, %c0_156] : memref<144x128xf32, #tpu.memory_space<vmem>>, vector<8x128xf32>
    tpu.vector_store %arg26[%c32_155, %c0_156], %208 {strides = array<i32>} : memref<144x128xf32, #tpu.memory_space<vmem>>, vector<8x128xf32>,
    %c0_157 = arith.constant 0 : index
    %c129_158 = arith.constant 129 : index
    %210 = vector.load %arg25[%c0_157, %c129_158] : memref<16x384xf32, #tpu.memory_space<vmem>>, vector<8x128xf32>
    %211 = vector.extract_strided_slice %0 {offsets = [5, 0], sizes = [1, 128], strides = [1, 1]} : vector<9x128xf32> to vector<1x128xf32>
    %212 = vector.broadcast %211 : vector<1x128xf32> to vector<8x128xf32>
    %213 = arith.mulf %210, %212 : vector<8x128xf32>
    %c40_159 = arith.constant 40 : index
    %c0_160 = arith.constant 0 : index
    %214 = vector.load %arg26[%c40_159, %c0_160] : memref<144x128xf32, #tpu.memory_space<vmem>>, vector<8x128xf32>
    tpu.vector_store %arg26[%c40_159, %c0_160], %213 {strides = array<i32>} : memref<144x128xf32, #tpu.memory_space<vmem>>, vector<8x128xf32>,
    %c0_161 = arith.constant 0 : index
    %c135_162 = arith.constant 135 : index
    %215 = vector.load %arg25[%c0_161, %c135_162] : memref<16x384xf32, #tpu.memory_space<vmem>>, vector<8x128xf32>
    %216 = vector.extract_strided_slice %0 {offsets = [6, 0], sizes = [1, 128], strides = [1, 1]} : vector<9x128xf32> to vector<1x128xf32>
    %217 = vector.broadcast %216 : vector<1x128xf32> to vector<8x128xf32>
    %218 = arith.mulf %215, %217 : vector<8x128xf32>
    %c48_163 = arith.constant 48 : index
    %c0_164 = arith.constant 0 : index
    %219 = vector.load %arg26[%c48_163, %c0_164] : memref<144x128xf32, #tpu.memory_space<vmem>>, vector<8x128xf32>
    tpu.vector_store %arg26[%c48_163, %c0_164], %218 {strides = array<i32>} : memref<144x128xf32, #tpu.memory_space<vmem>>, vector<8x128xf32>,
    %c0_165 = arith.constant 0 : index
    %c136_166 = arith.constant 136 : index
    %220 = vector.load %arg25[%c0_165, %c136_166] : memref<16x384xf32, #tpu.memory_space<vmem>>, vector<8x128xf32>
    %221 = vector.extract_strided_slice %0 {offsets = [7, 0], sizes = [1, 128], strides = [1, 1]} : vector<9x128xf32> to vector<1x128xf32>
    %222 = vector.broadcast %221 : vector<1x128xf32> to vector<8x128xf32>
    %223 = arith.mulf %220, %222 : vector<8x128xf32>
    %c56_167 = arith.constant 56 : index
    %c0_168 = arith.constant 0 : index
    %224 = vector.load %arg26[%c56_167, %c0_168] : memref<144x128xf32, #tpu.memory_space<vmem>>, vector<8x128xf32>
    tpu.vector_store %arg26[%c56_167, %c0_168], %223 {strides = array<i32>} : memref<144x128xf32, #tpu.memory_space<vmem>>, vector<8x128xf32>,
    %c0_169 = arith.constant 0 : index
    %c137_170 = arith.constant 137 : index
    %225 = vector.load %arg25[%c0_169, %c137_170] : memref<16x384xf32, #tpu.memory_space<vmem>>, vector<8x128xf32>
    %226 = vector.extract_strided_slice %0 {offsets = [8, 0], sizes = [1, 128], strides = [1, 1]} : vector<9x128xf32> to vector<1x128xf32>
    %227 = vector.broadcast %226 : vector<1x128xf32> to vector<8x128xf32>
    %228 = arith.mulf %225, %227 : vector<8x128xf32>
    %c64_171 = arith.constant 64 : index
    %c0_172 = arith.constant 0 : index
    %229 = vector.load %arg26[%c64_171, %c0_172] : memref<144x128xf32, #tpu.memory_space<vmem>>, vector<8x128xf32>
    tpu.vector_store %arg26[%c64_171, %c0_172], %228 {strides = array<i32>} : memref<144x128xf32, #tpu.memory_space<vmem>>, vector<8x128xf32>,
    %c0_173 = arith.constant 0 : index
    %c0_174 = arith.constant 0 : index
    %230 = vector.load %arg10[%c0_173, %c0_174] : memref<16x72xbf16, #tpu.memory_space<vmem>>, vector<16x72xbf16>
    %c0_175 = arith.constant 0 : index
    %c0_176 = arith.constant 0 : index
    %231 = vector.load %arg26[%c0_175, %c0_176] : memref<144x128xf32, #tpu.memory_space<vmem>>, vector<72x128xf32>
    %232 = arith.truncf %231 : vector<72x128xf32> to vector<72x128xbf16>
    %cst_177 = arith.constant dense<0.000000e+00> : vector<16x128xf32>
    %233 = tpu.matmul %230, %232, %cst_177 {dimension_numbers = #tpu.dot_dimension_numbers<[1], [0], [0], [1], [0, 0, 1, 1], [], []>} : vector<16x72xbf16>, vector<72x128xbf16>, vector<16x128xf32> -> vector<16x128xf32>
    %c0_178 = arith.constant 0 : index
    %c0_179 = arith.constant 0 : index
    %234 = vector.load %arg11[%c0_178, %c0_179] : memref<16x1xf32, #tpu.memory_space<vmem>>, vector<16x1xf32>
    %235 = vector.broadcast %234 : vector<16x1xf32> to vector<16x128xf32>
    %236 = arith.addf %233, %235 : vector<16x128xf32>
    %cst_180 = arith.constant 0.000000e+00 : f32
    %cst_181 = arith.constant 6.000000e+00 : f32
    %237 = vector.broadcast %cst_180 : f32 to vector<16x128xf32>
    %238 = arith.maximumf %237, %236 : vector<16x128xf32>
    %239 = vector.broadcast %cst_181 : f32 to vector<16x128xf32>
    %240 = arith.minimumf %239, %238 : vector<16x128xf32>
    %c0_182 = arith.constant 0 : index
    %c128_183 = arith.constant 128 : index
    %241 = vector.load %arg25[%c0_182, %c128_183] : memref<16x384xf32, #tpu.memory_space<vmem>>, vector<16x128xf32>
    tpu.vector_store %arg25[%c0_182, %c128_183], %240 {strides = array<i32>} : memref<16x384xf32, #tpu.memory_space<vmem>>, vector<16x128xf32>,
    %c0_184 = arith.constant 0 : index
    %c119_185 = arith.constant 119 : index
    %242 = vector.load %arg25[%c0_184, %c119_185] : memref<16x384xf32, #tpu.memory_space<vmem>>, vector<16x128xf32>
    %243 = vector.extract_strided_slice %0 {offsets = [0, 0], sizes = [1, 128], strides = [1, 1]} : vector<9x128xf32> to vector<1x128xf32>
    %244 = vector.broadcast %243 : vector<1x128xf32> to vector<16x128xf32>
    %245 = arith.mulf %242, %244 : vector<16x128xf32>
    %c0_186 = arith.constant 0 : index
    %c0_187 = arith.constant 0 : index
    %246 = vector.load %arg26[%c0_186, %c0_187] : memref<144x128xf32, #tpu.memory_space<vmem>>, vector<16x128xf32>
    tpu.vector_store %arg26[%c0_186, %c0_187], %245 {strides = array<i32>} : memref<144x128xf32, #tpu.memory_space<vmem>>, vector<16x128xf32>,
    %c0_188 = arith.constant 0 : index
    %c120_189 = arith.constant 120 : index
    %247 = vector.load %arg25[%c0_188, %c120_189] : memref<16x384xf32, #tpu.memory_space<vmem>>, vector<16x128xf32>
    %248 = vector.extract_strided_slice %0 {offsets = [1, 0], sizes = [1, 128], strides = [1, 1]} : vector<9x128xf32> to vector<1x128xf32>
    %249 = vector.broadcast %248 : vector<1x128xf32> to vector<16x128xf32>
    %250 = arith.mulf %247, %249 : vector<16x128xf32>
    %c16_190 = arith.constant 16 : index
    %c0_191 = arith.constant 0 : index
    %251 = vector.load %arg26[%c16_190, %c0_191] : memref<144x128xf32, #tpu.memory_space<vmem>>, vector<16x128xf32>
    tpu.vector_store %arg26[%c16_190, %c0_191], %250 {strides = array<i32>} : memref<144x128xf32, #tpu.memory_space<vmem>>, vector<16x128xf32>,
    %c0_192 = arith.constant 0 : index
    %c121_193 = arith.constant 121 : index
    %252 = vector.load %arg25[%c0_192, %c121_193] : memref<16x384xf32, #tpu.memory_space<vmem>>, vector<16x128xf32>
    %253 = vector.extract_strided_slice %0 {offsets = [2, 0], sizes = [1, 128], strides = [1, 1]} : vector<9x128xf32> to vector<1x128xf32>
    %254 = vector.broadcast %253 : vector<1x128xf32> to vector<16x128xf32>
    %255 = arith.mulf %252, %254 : vector<16x128xf32>
    %c32_194 = arith.constant 32 : index
    %c0_195 = arith.constant 0 : index
    %256 = vector.load %arg26[%c32_194, %c0_195] : memref<144x128xf32, #tpu.memory_space<vmem>>, vector<16x128xf32>
    tpu.vector_store %arg26[%c32_194, %c0_195], %255 {strides = array<i32>} : memref<144x128xf32, #tpu.memory_space<vmem>>, vector<16x128xf32>,
    %c0_196 = arith.constant 0 : index
    %c127_197 = arith.constant 127 : index
    %257 = vector.load %arg25[%c0_196, %c127_197] : memref<16x384xf32, #tpu.memory_space<vmem>>, vector<16x128xf32>
    %258 = vector.extract_strided_slice %0 {offsets = [3, 0], sizes = [1, 128], strides = [1, 1]} : vector<9x128xf32> to vector<1x128xf32>
    %259 = vector.broadcast %258 : vector<1x128xf32> to vector<16x128xf32>
    %260 = arith.mulf %257, %259 : vector<16x128xf32>
    %c48_198 = arith.constant 48 : index
    %c0_199 = arith.constant 0 : index
    %261 = vector.load %arg26[%c48_198, %c0_199] : memref<144x128xf32, #tpu.memory_space<vmem>>, vector<16x128xf32>
    tpu.vector_store %arg26[%c48_198, %c0_199], %260 {strides = array<i32>} : memref<144x128xf32, #tpu.memory_space<vmem>>, vector<16x128xf32>,
    %c0_200 = arith.constant 0 : index
    %c128_201 = arith.constant 128 : index
    %262 = vector.load %arg25[%c0_200, %c128_201] : memref<16x384xf32, #tpu.memory_space<vmem>>, vector<16x128xf32>
    %263 = vector.extract_strided_slice %0 {offsets = [4, 0], sizes = [1, 128], strides = [1, 1]} : vector<9x128xf32> to vector<1x128xf32>
    %264 = vector.broadcast %263 : vector<1x128xf32> to vector<16x128xf32>
    %265 = arith.mulf %262, %264 : vector<16x128xf32>
    %c64_202 = arith.constant 64 : index
    %c0_203 = arith.constant 0 : index
    %266 = vector.load %arg26[%c64_202, %c0_203] : memref<144x128xf32, #tpu.memory_space<vmem>>, vector<16x128xf32>
    tpu.vector_store %arg26[%c64_202, %c0_203], %265 {strides = array<i32>} : memref<144x128xf32, #tpu.memory_space<vmem>>, vector<16x128xf32>,
    %c0_204 = arith.constant 0 : index
    %c129_205 = arith.constant 129 : index
    %267 = vector.load %arg25[%c0_204, %c129_205] : memref<16x384xf32, #tpu.memory_space<vmem>>, vector<16x128xf32>
    %268 = vector.extract_strided_slice %0 {offsets = [5, 0], sizes = [1, 128], strides = [1, 1]} : vector<9x128xf32> to vector<1x128xf32>
    %269 = vector.broadcast %268 : vector<1x128xf32> to vector<16x128xf32>
    %270 = arith.mulf %267, %269 : vector<16x128xf32>
    %c80 = arith.constant 80 : index
    %c0_206 = arith.constant 0 : index
    %271 = vector.load %arg26[%c80, %c0_206] : memref<144x128xf32, #tpu.memory_space<vmem>>, vector<16x128xf32>
    tpu.vector_store %arg26[%c80, %c0_206], %270 {strides = array<i32>} : memref<144x128xf32, #tpu.memory_space<vmem>>, vector<16x128xf32>,
    %c0_207 = arith.constant 0 : index
    %c135_208 = arith.constant 135 : index
    %272 = vector.load %arg25[%c0_207, %c135_208] : memref<16x384xf32, #tpu.memory_space<vmem>>, vector<16x128xf32>
    %273 = vector.extract_strided_slice %0 {offsets = [6, 0], sizes = [1, 128], strides = [1, 1]} : vector<9x128xf32> to vector<1x128xf32>
    %274 = vector.broadcast %273 : vector<1x128xf32> to vector<16x128xf32>
    %275 = arith.mulf %272, %274 : vector<16x128xf32>
    %c96 = arith.constant 96 : index
    %c0_209 = arith.constant 0 : index
    %276 = vector.load %arg26[%c96, %c0_209] : memref<144x128xf32, #tpu.memory_space<vmem>>, vector<16x128xf32>
    tpu.vector_store %arg26[%c96, %c0_209], %275 {strides = array<i32>} : memref<144x128xf32, #tpu.memory_space<vmem>>, vector<16x128xf32>,
    %c0_210 = arith.constant 0 : index
    %c136_211 = arith.constant 136 : index
    %277 = vector.load %arg25[%c0_210, %c136_211] : memref<16x384xf32, #tpu.memory_space<vmem>>, vector<16x128xf32>
    %278 = vector.extract_strided_slice %0 {offsets = [7, 0], sizes = [1, 128], strides = [1, 1]} : vector<9x128xf32> to vector<1x128xf32>
    %279 = vector.broadcast %278 : vector<1x128xf32> to vector<16x128xf32>
    %280 = arith.mulf %277, %279 : vector<16x128xf32>
    %c112 = arith.constant 112 : index
    %c0_212 = arith.constant 0 : index
    %281 = vector.load %arg26[%c112, %c0_212] : memref<144x128xf32, #tpu.memory_space<vmem>>, vector<16x128xf32>
    tpu.vector_store %arg26[%c112, %c0_212], %280 {strides = array<i32>} : memref<144x128xf32, #tpu.memory_space<vmem>>, vector<16x128xf32>,
    %c0_213 = arith.constant 0 : index
    %c137_214 = arith.constant 137 : index
    %282 = vector.load %arg25[%c0_213, %c137_214] : memref<16x384xf32, #tpu.memory_space<vmem>>, vector<16x128xf32>
    %283 = vector.extract_strided_slice %0 {offsets = [8, 0], sizes = [1, 128], strides = [1, 1]} : vector<9x128xf32> to vector<1x128xf32>
    %284 = vector.broadcast %283 : vector<1x128xf32> to vector<16x128xf32>
    %285 = arith.mulf %282, %284 : vector<16x128xf32>
    %c128_215 = arith.constant 128 : index
    %c0_216 = arith.constant 0 : index
    %286 = vector.load %arg26[%c128_215, %c0_216] : memref<144x128xf32, #tpu.memory_space<vmem>>, vector<16x128xf32>
    tpu.vector_store %arg26[%c128_215, %c0_216], %285 {strides = array<i32>} : memref<144x128xf32, #tpu.memory_space<vmem>>, vector<16x128xf32>,
    %c0_217 = arith.constant 0 : index
    %c0_218 = arith.constant 0 : index
    %287 = vector.load %arg12[%c0_217, %c0_218] : memref<14x144xbf16, #tpu.memory_space<vmem>>, vector<14x144xbf16>
    %c0_219 = arith.constant 0 : index
    %c0_220 = arith.constant 0 : index
    %288 = vector.load %arg26[%c0_219, %c0_220] : memref<144x128xf32, #tpu.memory_space<vmem>>, vector<144x128xf32>
    %289 = arith.truncf %288 : vector<144x128xf32> to vector<144x128xbf16>
    %cst_221 = arith.constant dense<0.000000e+00> : vector<14x128xf32>
    %290 = tpu.matmul %287, %289, %cst_221 {dimension_numbers = #tpu.dot_dimension_numbers<[1], [0], [0], [1], [0, 0, 1, 1], [], []>} : vector<14x144xbf16>, vector<144x128xbf16>, vector<14x128xf32> -> vector<14x128xf32>
    %c0_222 = arith.constant 0 : index
    %c0_223 = arith.constant 0 : index
    %291 = vector.load %arg13[%c0_222, %c0_223] : memref<14x1xf32, #tpu.memory_space<vmem>>, vector<14x1xf32>
    %292 = vector.broadcast %291 : vector<14x1xf32> to vector<14x128xf32>
    %293 = arith.addf %290, %292 : vector<14x128xf32>
    %c0_224 = arith.constant 0 : index
    %c0_225 = arith.constant 0 : index
    %294 = vector.load %arg23[%c0_224, %c0_225] : memref<14x128xf32, #tpu.memory_space<vmem>>, vector<14x128xf32>
    tpu.vector_store %arg23[%c0_224, %c0_225], %293 {strides = array<i32>} : memref<14x128xf32, #tpu.memory_space<vmem>>, vector<14x128xf32>,
    %cst_226 = arith.constant 0.000000e+00 : f32
    %295 = vector.broadcast %cst_226 : f32 to vector<16x128xf32>
    %c0_227 = arith.constant 0 : index
    %c0_228 = arith.constant 0 : index
    %c0_229 = arith.constant 0 : index
    %296 = vector.load %arg14[%c0_227, %c0_228, %c0_229] : memref<9x16x1xf32, #tpu.memory_space<vmem>>, vector<1x16x1xf32>
    %297 = vector.shape_cast %296 : vector<1x16x1xf32> to vector<16x1xf32>
    %c0_230 = arith.constant 0 : index
    %c0_231 = arith.constant 0 : index
    %298 = vector.load %arg26[%c0_230, %c0_231] : memref<144x128xf32, #tpu.memory_space<vmem>>, vector<16x128xf32>
    %299 = vector.broadcast %297 : vector<16x1xf32> to vector<16x128xf32>
    %300 = arith.mulf %299, %298 : vector<16x128xf32>
    %301 = arith.addf %295, %300 : vector<16x128xf32>
    %c1 = arith.constant 1 : index
    %c0_232 = arith.constant 0 : index
    %c0_233 = arith.constant 0 : index
    %302 = vector.load %arg14[%c1, %c0_232, %c0_233] : memref<9x16x1xf32, #tpu.memory_space<vmem>>, vector<1x16x1xf32>
    %303 = vector.shape_cast %302 : vector<1x16x1xf32> to vector<16x1xf32>
    %c16_234 = arith.constant 16 : index
    %c0_235 = arith.constant 0 : index
    %304 = vector.load %arg26[%c16_234, %c0_235] : memref<144x128xf32, #tpu.memory_space<vmem>>, vector<16x128xf32>
    %305 = vector.broadcast %303 : vector<16x1xf32> to vector<16x128xf32>
    %306 = arith.mulf %305, %304 : vector<16x128xf32>
    %307 = arith.addf %301, %306 : vector<16x128xf32>
    %c2 = arith.constant 2 : index
    %c0_236 = arith.constant 0 : index
    %c0_237 = arith.constant 0 : index
    %308 = vector.load %arg14[%c2, %c0_236, %c0_237] : memref<9x16x1xf32, #tpu.memory_space<vmem>>, vector<1x16x1xf32>
    %309 = vector.shape_cast %308 : vector<1x16x1xf32> to vector<16x1xf32>
    %c32_238 = arith.constant 32 : index
    %c0_239 = arith.constant 0 : index
    %310 = vector.load %arg26[%c32_238, %c0_239] : memref<144x128xf32, #tpu.memory_space<vmem>>, vector<16x128xf32>
    %311 = vector.broadcast %309 : vector<16x1xf32> to vector<16x128xf32>
    %312 = arith.mulf %311, %310 : vector<16x128xf32>
    %313 = arith.addf %307, %312 : vector<16x128xf32>
    %c3 = arith.constant 3 : index
    %c0_240 = arith.constant 0 : index
    %c0_241 = arith.constant 0 : index
    %314 = vector.load %arg14[%c3, %c0_240, %c0_241] : memref<9x16x1xf32, #tpu.memory_space<vmem>>, vector<1x16x1xf32>
    %315 = vector.shape_cast %314 : vector<1x16x1xf32> to vector<16x1xf32>
    %c48_242 = arith.constant 48 : index
    %c0_243 = arith.constant 0 : index
    %316 = vector.load %arg26[%c48_242, %c0_243] : memref<144x128xf32, #tpu.memory_space<vmem>>, vector<16x128xf32>
    %317 = vector.broadcast %315 : vector<16x1xf32> to vector<16x128xf32>
    %318 = arith.mulf %317, %316 : vector<16x128xf32>
    %319 = arith.addf %313, %318 : vector<16x128xf32>
    %c4_244 = arith.constant 4 : index
    %c0_245 = arith.constant 0 : index
    %c0_246 = arith.constant 0 : index
    %320 = vector.load %arg14[%c4_244, %c0_245, %c0_246] : memref<9x16x1xf32, #tpu.memory_space<vmem>>, vector<1x16x1xf32>
    %321 = vector.shape_cast %320 : vector<1x16x1xf32> to vector<16x1xf32>
    %c64_247 = arith.constant 64 : index
    %c0_248 = arith.constant 0 : index
    %322 = vector.load %arg26[%c64_247, %c0_248] : memref<144x128xf32, #tpu.memory_space<vmem>>, vector<16x128xf32>
    %323 = vector.broadcast %321 : vector<16x1xf32> to vector<16x128xf32>
    %324 = arith.mulf %323, %322 : vector<16x128xf32>
    %325 = arith.addf %319, %324 : vector<16x128xf32>
    %c5 = arith.constant 5 : index
    %c0_249 = arith.constant 0 : index
    %c0_250 = arith.constant 0 : index
    %326 = vector.load %arg14[%c5, %c0_249, %c0_250] : memref<9x16x1xf32, #tpu.memory_space<vmem>>, vector<1x16x1xf32>
    %327 = vector.shape_cast %326 : vector<1x16x1xf32> to vector<16x1xf32>
    %c80_251 = arith.constant 80 : index
    %c0_252 = arith.constant 0 : index
    %328 = vector.load %arg26[%c80_251, %c0_252] : memref<144x128xf32, #tpu.memory_space<vmem>>, vector<16x128xf32>
    %329 = vector.broadcast %327 : vector<16x1xf32> to vector<16x128xf32>
    %330 = arith.mulf %329, %328 : vector<16x128xf32>
    %331 = arith.addf %325, %330 : vector<16x128xf32>
    %c6 = arith.constant 6 : index
    %c0_253 = arith.constant 0 : index
    %c0_254 = arith.constant 0 : index
    %332 = vector.load %arg14[%c6, %c0_253, %c0_254] : memref<9x16x1xf32, #tpu.memory_space<vmem>>, vector<1x16x1xf32>
    %333 = vector.shape_cast %332 : vector<1x16x1xf32> to vector<16x1xf32>
    %c96_255 = arith.constant 96 : index
    %c0_256 = arith.constant 0 : index
    %334 = vector.load %arg26[%c96_255, %c0_256] : memref<144x128xf32, #tpu.memory_space<vmem>>, vector<16x128xf32>
    %335 = vector.broadcast %333 : vector<16x1xf32> to vector<16x128xf32>
    %336 = arith.mulf %335, %334 : vector<16x128xf32>
    %337 = arith.addf %331, %336 : vector<16x128xf32>
    %c7 = arith.constant 7 : index
    %c0_257 = arith.constant 0 : index
    %c0_258 = arith.constant 0 : index
    %338 = vector.load %arg14[%c7, %c0_257, %c0_258] : memref<9x16x1xf32, #tpu.memory_space<vmem>>, vector<1x16x1xf32>
    %339 = vector.shape_cast %338 : vector<1x16x1xf32> to vector<16x1xf32>
    %c112_259 = arith.constant 112 : index
    %c0_260 = arith.constant 0 : index
    %340 = vector.load %arg26[%c112_259, %c0_260] : memref<144x128xf32, #tpu.memory_space<vmem>>, vector<16x128xf32>
    %341 = vector.broadcast %339 : vector<16x1xf32> to vector<16x128xf32>
    %342 = arith.mulf %341, %340 : vector<16x128xf32>
    %343 = arith.addf %337, %342 : vector<16x128xf32>
    %c8_261 = arith.constant 8 : index
    %c0_262 = arith.constant 0 : index
    %c0_263 = arith.constant 0 : index
    %344 = vector.load %arg14[%c8_261, %c0_262, %c0_263] : memref<9x16x1xf32, #tpu.memory_space<vmem>>, vector<1x16x1xf32>
    %345 = vector.shape_cast %344 : vector<1x16x1xf32> to vector<16x1xf32>
    %c128_264 = arith.constant 128 : index
    %c0_265 = arith.constant 0 : index
    %346 = vector.load %arg26[%c128_264, %c0_265] : memref<144x128xf32, #tpu.memory_space<vmem>>, vector<16x128xf32>
    %347 = vector.broadcast %345 : vector<16x1xf32> to vector<16x128xf32>
    %348 = arith.mulf %347, %346 : vector<16x128xf32>
    %349 = arith.addf %343, %348 : vector<16x128xf32>
    %c0_266 = arith.constant 0 : index
    %c0_267 = arith.constant 0 : index
    %350 = vector.load %arg15[%c0_266, %c0_267] : memref<16x1xf32, #tpu.memory_space<vmem>>, vector<16x1xf32>
    %351 = vector.broadcast %350 : vector<16x1xf32> to vector<16x128xf32>
    %352 = arith.addf %349, %351 : vector<16x128xf32>
    %c0_268 = arith.constant 0 : index
    %c0_269 = arith.constant 0 : index
    %353 = vector.load %arg16[%c0_268, %c0_269] : memref<8x16xbf16, #tpu.memory_space<vmem>>, vector<8x16xbf16>
    %354 = arith.truncf %352 : vector<16x128xf32> to vector<16x128xbf16>
    %cst_270 = arith.constant dense<0.000000e+00> : vector<8x128xf32>
    %355 = tpu.matmul %353, %354, %cst_270 {dimension_numbers = #tpu.dot_dimension_numbers<[1], [0], [0], [1], [0, 0, 1, 1], [], []>} : vector<8x16xbf16>, vector<16x128xbf16>, vector<8x128xf32> -> vector<8x128xf32>
    %c0_271 = arith.constant 0 : index
    %c0_272 = arith.constant 0 : index
    %356 = vector.load %arg17[%c0_271, %c0_272] : memref<8x1xf32, #tpu.memory_space<vmem>>, vector<8x1xf32>
    %357 = vector.broadcast %356 : vector<8x1xf32> to vector<8x128xf32>
    %358 = arith.addf %355, %357 : vector<8x128xf32>
    %c0_273 = arith.constant 0 : index
    %c128_274 = arith.constant 128 : index
    %359 = vector.load %arg25[%c0_273, %c128_274] : memref<16x384xf32, #tpu.memory_space<vmem>>, vector<8x128xf32>
    tpu.vector_store %arg25[%c0_273, %c128_274], %358 {strides = array<i32>} : memref<16x384xf32, #tpu.memory_space<vmem>>, vector<8x128xf32>,
    %cst_275 = arith.constant 0.000000e+00 : f32
    %360 = vector.broadcast %cst_275 : f32 to vector<8x128xf32>
    %c0_276 = arith.constant 0 : index
    %c0_277 = arith.constant 0 : index
    %c0_278 = arith.constant 0 : index
    %361 = vector.load %arg18[%c0_276, %c0_277, %c0_278] : memref<9x8x1xf32, #tpu.memory_space<vmem>>, vector<1x8x1xf32>
    %362 = vector.shape_cast %361 : vector<1x8x1xf32> to vector<8x1xf32>
    %c0_279 = arith.constant 0 : index
    %c119_280 = arith.constant 119 : index
    %363 = vector.load %arg25[%c0_279, %c119_280] : memref<16x384xf32, #tpu.memory_space<vmem>>, vector<8x128xf32>
    %364 = vector.extract_strided_slice %0 {offsets = [0, 0], sizes = [1, 128], strides = [1, 1]} : vector<9x128xf32> to vector<1x128xf32>
    %365 = vector.broadcast %364 : vector<1x128xf32> to vector<8x128xf32>
    %366 = arith.mulf %363, %365 : vector<8x128xf32>
    %367 = vector.broadcast %362 : vector<8x1xf32> to vector<8x128xf32>
    %368 = arith.mulf %367, %366 : vector<8x128xf32>
    %369 = arith.addf %360, %368 : vector<8x128xf32>
    %c1_281 = arith.constant 1 : index
    %c0_282 = arith.constant 0 : index
    %c0_283 = arith.constant 0 : index
    %370 = vector.load %arg18[%c1_281, %c0_282, %c0_283] : memref<9x8x1xf32, #tpu.memory_space<vmem>>, vector<1x8x1xf32>
    %371 = vector.shape_cast %370 : vector<1x8x1xf32> to vector<8x1xf32>
    %c0_284 = arith.constant 0 : index
    %c120_285 = arith.constant 120 : index
    %372 = vector.load %arg25[%c0_284, %c120_285] : memref<16x384xf32, #tpu.memory_space<vmem>>, vector<8x128xf32>
    %373 = vector.extract_strided_slice %0 {offsets = [1, 0], sizes = [1, 128], strides = [1, 1]} : vector<9x128xf32> to vector<1x128xf32>
    %374 = vector.broadcast %373 : vector<1x128xf32> to vector<8x128xf32>
    %375 = arith.mulf %372, %374 : vector<8x128xf32>
    %376 = vector.broadcast %371 : vector<8x1xf32> to vector<8x128xf32>
    %377 = arith.mulf %376, %375 : vector<8x128xf32>
    %378 = arith.addf %369, %377 : vector<8x128xf32>
    %c2_286 = arith.constant 2 : index
    %c0_287 = arith.constant 0 : index
    %c0_288 = arith.constant 0 : index
    %379 = vector.load %arg18[%c2_286, %c0_287, %c0_288] : memref<9x8x1xf32, #tpu.memory_space<vmem>>, vector<1x8x1xf32>
    %380 = vector.shape_cast %379 : vector<1x8x1xf32> to vector<8x1xf32>
    %c0_289 = arith.constant 0 : index
    %c121_290 = arith.constant 121 : index
    %381 = vector.load %arg25[%c0_289, %c121_290] : memref<16x384xf32, #tpu.memory_space<vmem>>, vector<8x128xf32>
    %382 = vector.extract_strided_slice %0 {offsets = [2, 0], sizes = [1, 128], strides = [1, 1]} : vector<9x128xf32> to vector<1x128xf32>
    %383 = vector.broadcast %382 : vector<1x128xf32> to vector<8x128xf32>
    %384 = arith.mulf %381, %383 : vector<8x128xf32>
    %385 = vector.broadcast %380 : vector<8x1xf32> to vector<8x128xf32>
    %386 = arith.mulf %385, %384 : vector<8x128xf32>
    %387 = arith.addf %378, %386 : vector<8x128xf32>
    %c3_291 = arith.constant 3 : index
    %c0_292 = arith.constant 0 : index
    %c0_293 = arith.constant 0 : index
    %388 = vector.load %arg18[%c3_291, %c0_292, %c0_293] : memref<9x8x1xf32, #tpu.memory_space<vmem>>, vector<1x8x1xf32>
    %389 = vector.shape_cast %388 : vector<1x8x1xf32> to vector<8x1xf32>
    %c0_294 = arith.constant 0 : index
    %c127_295 = arith.constant 127 : index
    %390 = vector.load %arg25[%c0_294, %c127_295] : memref<16x384xf32, #tpu.memory_space<vmem>>, vector<8x128xf32>
    %391 = vector.extract_strided_slice %0 {offsets = [3, 0], sizes = [1, 128], strides = [1, 1]} : vector<9x128xf32> to vector<1x128xf32>
    %392 = vector.broadcast %391 : vector<1x128xf32> to vector<8x128xf32>
    %393 = arith.mulf %390, %392 : vector<8x128xf32>
    %394 = vector.broadcast %389 : vector<8x1xf32> to vector<8x128xf32>
    %395 = arith.mulf %394, %393 : vector<8x128xf32>
    %396 = arith.addf %387, %395 : vector<8x128xf32>
    %c4_296 = arith.constant 4 : index
    %c0_297 = arith.constant 0 : index
    %c0_298 = arith.constant 0 : index
    %397 = vector.load %arg18[%c4_296, %c0_297, %c0_298] : memref<9x8x1xf32, #tpu.memory_space<vmem>>, vector<1x8x1xf32>
    %398 = vector.shape_cast %397 : vector<1x8x1xf32> to vector<8x1xf32>
    %c0_299 = arith.constant 0 : index
    %c128_300 = arith.constant 128 : index
    %399 = vector.load %arg25[%c0_299, %c128_300] : memref<16x384xf32, #tpu.memory_space<vmem>>, vector<8x128xf32>
    %400 = vector.extract_strided_slice %0 {offsets = [4, 0], sizes = [1, 128], strides = [1, 1]} : vector<9x128xf32> to vector<1x128xf32>
    %401 = vector.broadcast %400 : vector<1x128xf32> to vector<8x128xf32>
    %402 = arith.mulf %399, %401 : vector<8x128xf32>
    %403 = vector.broadcast %398 : vector<8x1xf32> to vector<8x128xf32>
    %404 = arith.mulf %403, %402 : vector<8x128xf32>
    %405 = arith.addf %396, %404 : vector<8x128xf32>
    %c5_301 = arith.constant 5 : index
    %c0_302 = arith.constant 0 : index
    %c0_303 = arith.constant 0 : index
    %406 = vector.load %arg18[%c5_301, %c0_302, %c0_303] : memref<9x8x1xf32, #tpu.memory_space<vmem>>, vector<1x8x1xf32>
    %407 = vector.shape_cast %406 : vector<1x8x1xf32> to vector<8x1xf32>
    %c0_304 = arith.constant 0 : index
    %c129_305 = arith.constant 129 : index
    %408 = vector.load %arg25[%c0_304, %c129_305] : memref<16x384xf32, #tpu.memory_space<vmem>>, vector<8x128xf32>
    %409 = vector.extract_strided_slice %0 {offsets = [5, 0], sizes = [1, 128], strides = [1, 1]} : vector<9x128xf32> to vector<1x128xf32>
    %410 = vector.broadcast %409 : vector<1x128xf32> to vector<8x128xf32>
    %411 = arith.mulf %408, %410 : vector<8x128xf32>
    %412 = vector.broadcast %407 : vector<8x1xf32> to vector<8x128xf32>
    %413 = arith.mulf %412, %411 : vector<8x128xf32>
    %414 = arith.addf %405, %413 : vector<8x128xf32>
    %c6_306 = arith.constant 6 : index
    %c0_307 = arith.constant 0 : index
    %c0_308 = arith.constant 0 : index
    %415 = vector.load %arg18[%c6_306, %c0_307, %c0_308] : memref<9x8x1xf32, #tpu.memory_space<vmem>>, vector<1x8x1xf32>
    %416 = vector.shape_cast %415 : vector<1x8x1xf32> to vector<8x1xf32>
    %c0_309 = arith.constant 0 : index
    %c135_310 = arith.constant 135 : index
    %417 = vector.load %arg25[%c0_309, %c135_310] : memref<16x384xf32, #tpu.memory_space<vmem>>, vector<8x128xf32>
    %418 = vector.extract_strided_slice %0 {offsets = [6, 0], sizes = [1, 128], strides = [1, 1]} : vector<9x128xf32> to vector<1x128xf32>
    %419 = vector.broadcast %418 : vector<1x128xf32> to vector<8x128xf32>
    %420 = arith.mulf %417, %419 : vector<8x128xf32>
    %421 = vector.broadcast %416 : vector<8x1xf32> to vector<8x128xf32>
    %422 = arith.mulf %421, %420 : vector<8x128xf32>
    %423 = arith.addf %414, %422 : vector<8x128xf32>
    %c7_311 = arith.constant 7 : index
    %c0_312 = arith.constant 0 : index
    %c0_313 = arith.constant 0 : index
    %424 = vector.load %arg18[%c7_311, %c0_312, %c0_313] : memref<9x8x1xf32, #tpu.memory_space<vmem>>, vector<1x8x1xf32>
    %425 = vector.shape_cast %424 : vector<1x8x1xf32> to vector<8x1xf32>
    %c0_314 = arith.constant 0 : index
    %c136_315 = arith.constant 136 : index
    %426 = vector.load %arg25[%c0_314, %c136_315] : memref<16x384xf32, #tpu.memory_space<vmem>>, vector<8x128xf32>
    %427 = vector.extract_strided_slice %0 {offsets = [7, 0], sizes = [1, 128], strides = [1, 1]} : vector<9x128xf32> to vector<1x128xf32>
    %428 = vector.broadcast %427 : vector<1x128xf32> to vector<8x128xf32>
    %429 = arith.mulf %426, %428 : vector<8x128xf32>
    %430 = vector.broadcast %425 : vector<8x1xf32> to vector<8x128xf32>
    %431 = arith.mulf %430, %429 : vector<8x128xf32>
    %432 = arith.addf %423, %431 : vector<8x128xf32>
    %c8_316 = arith.constant 8 : index
    %c0_317 = arith.constant 0 : index
    %c0_318 = arith.constant 0 : index
    %433 = vector.load %arg18[%c8_316, %c0_317, %c0_318] : memref<9x8x1xf32, #tpu.memory_space<vmem>>, vector<1x8x1xf32>
    %434 = vector.shape_cast %433 : vector<1x8x1xf32> to vector<8x1xf32>
    %c0_319 = arith.constant 0 : index
    %c137_320 = arith.constant 137 : index
    %435 = vector.load %arg25[%c0_319, %c137_320] : memref<16x384xf32, #tpu.memory_space<vmem>>, vector<8x128xf32>
    %436 = vector.extract_strided_slice %0 {offsets = [8, 0], sizes = [1, 128], strides = [1, 1]} : vector<9x128xf32> to vector<1x128xf32>
    %437 = vector.broadcast %436 : vector<1x128xf32> to vector<8x128xf32>
    %438 = arith.mulf %435, %437 : vector<8x128xf32>
    %439 = vector.broadcast %434 : vector<8x1xf32> to vector<8x128xf32>
    %440 = arith.mulf %439, %438 : vector<8x128xf32>
    %441 = arith.addf %432, %440 : vector<8x128xf32>
    %cst_321 = arith.constant 0.000000e+00 : f32
    %cst_322 = arith.constant 6.000000e+00 : f32
    %442 = vector.broadcast %cst_321 : f32 to vector<8x128xf32>
    %443 = arith.maximumf %442, %441 : vector<8x128xf32>
    %444 = vector.broadcast %cst_322 : f32 to vector<8x128xf32>
    %445 = arith.minimumf %444, %443 : vector<8x128xf32>
    %c0_323 = arith.constant 0 : index
    %c0_324 = arith.constant 0 : index
    %446 = vector.load %arg19[%c0_323, %c0_324] : memref<32x8xbf16, #tpu.memory_space<vmem>>, vector<32x8xbf16>
    %447 = arith.truncf %445 : vector<8x128xf32> to vector<8x128xbf16>
    %cst_325 = arith.constant dense<0.000000e+00> : vector<32x128xf32>
    %448 = tpu.matmul %446, %447, %cst_325 {dimension_numbers = #tpu.dot_dimension_numbers<[1], [0], [0], [1], [0, 0, 1, 1], [], []>} : vector<32x8xbf16>, vector<8x128xbf16>, vector<32x128xf32> -> vector<32x128xf32>
    %449 = vector.extract_strided_slice %448 {offsets = [0, 0], sizes = [8, 128], strides = [1, 1]} : vector<32x128xf32> to vector<8x128xf32>
    %450 = arith.negf %449 : vector<8x128xf32>
    %451 = math.exp %450 : vector<8x128xf32>
    %cst_326 = arith.constant 1.000000e+00 : f32
    %452 = vector.broadcast %cst_326 : f32 to vector<8x128xf32>
    %453 = arith.addf %452, %451 : vector<8x128xf32>
    %454 = arith.divf %452, %453 : vector<8x128xf32>
    %455 = vector.extract_strided_slice %448 {offsets = [16, 0], sizes = [8, 128], strides = [1, 1]} : vector<32x128xf32> to vector<8x128xf32>
    %456 = arith.negf %455 : vector<8x128xf32>
    %457 = math.exp %456 : vector<8x128xf32>
    %cst_327 = arith.constant 1.000000e+00 : f32
    %458 = vector.broadcast %cst_327 : f32 to vector<8x128xf32>
    %459 = arith.addf %458, %457 : vector<8x128xf32>
    %460 = arith.divf %458, %459 : vector<8x128xf32>
    %461 = vector.extract_strided_slice %448 {offsets = [24, 0], sizes = [8, 128], strides = [1, 1]} : vector<32x128xf32> to vector<8x128xf32>
    %cst_328 = arith.constant 0.000000e+00 : f32
    %cst_329 = arith.constant 6.000000e+00 : f32
    %462 = vector.broadcast %cst_328 : f32 to vector<8x128xf32>
    %463 = arith.maximumf %462, %461 : vector<8x128xf32>
    %464 = vector.broadcast %cst_329 : f32 to vector<8x128xf32>
    %465 = arith.minimumf %464, %463 : vector<8x128xf32>
    %466 = arith.mulf %454, %465 : vector<8x128xf32>
    %cst_330 = arith.constant 0.000000e+00 : f32
    %cst_331 = arith.constant 6.000000e+00 : f32
    %467 = vector.broadcast %cst_330 : f32 to vector<8x128xf32>
    %468 = arith.maximumf %467, %466 : vector<8x128xf32>
    %469 = vector.broadcast %cst_331 : f32 to vector<8x128xf32>
    %470 = arith.minimumf %469, %468 : vector<8x128xf32>
    %471 = arith.mulf %460, %470 : vector<8x128xf32>
    %c0_332 = arith.constant 0 : index
    %c128_333 = arith.constant 128 : index
    %472 = vector.load %arg25[%c0_332, %c128_333] : memref<16x384xf32, #tpu.memory_space<vmem>>, vector<8x128xf32>
    tpu.vector_store %arg25[%c0_332, %c128_333], %471 {strides = array<i32>} : memref<16x384xf32, #tpu.memory_space<vmem>>, vector<8x128xf32>,
    %c0_334 = arith.constant 0 : index
    %c119_335 = arith.constant 119 : index
    %473 = vector.load %arg25[%c0_334, %c119_335] : memref<16x384xf32, #tpu.memory_space<vmem>>, vector<8x128xf32>
    %474 = vector.extract_strided_slice %0 {offsets = [0, 0], sizes = [1, 128], strides = [1, 1]} : vector<9x128xf32> to vector<1x128xf32>
    %475 = vector.broadcast %474 : vector<1x128xf32> to vector<8x128xf32>
    %476 = arith.mulf %473, %475 : vector<8x128xf32>
    %c0_336 = arith.constant 0 : index
    %c0_337 = arith.constant 0 : index
    %477 = vector.load %arg26[%c0_336, %c0_337] : memref<144x128xf32, #tpu.memory_space<vmem>>, vector<8x128xf32>
    tpu.vector_store %arg26[%c0_336, %c0_337], %476 {strides = array<i32>} : memref<144x128xf32, #tpu.memory_space<vmem>>, vector<8x128xf32>,
    %c0_338 = arith.constant 0 : index
    %c120_339 = arith.constant 120 : index
    %478 = vector.load %arg25[%c0_338, %c120_339] : memref<16x384xf32, #tpu.memory_space<vmem>>, vector<8x128xf32>
    %479 = vector.extract_strided_slice %0 {offsets = [1, 0], sizes = [1, 128], strides = [1, 1]} : vector<9x128xf32> to vector<1x128xf32>
    %480 = vector.broadcast %479 : vector<1x128xf32> to vector<8x128xf32>
    %481 = arith.mulf %478, %480 : vector<8x128xf32>
    %c8_340 = arith.constant 8 : index
    %c0_341 = arith.constant 0 : index
    %482 = vector.load %arg26[%c8_340, %c0_341] : memref<144x128xf32, #tpu.memory_space<vmem>>, vector<8x128xf32>
    tpu.vector_store %arg26[%c8_340, %c0_341], %481 {strides = array<i32>} : memref<144x128xf32, #tpu.memory_space<vmem>>, vector<8x128xf32>,
    %c0_342 = arith.constant 0 : index
    %c121_343 = arith.constant 121 : index
    %483 = vector.load %arg25[%c0_342, %c121_343] : memref<16x384xf32, #tpu.memory_space<vmem>>, vector<8x128xf32>
    %484 = vector.extract_strided_slice %0 {offsets = [2, 0], sizes = [1, 128], strides = [1, 1]} : vector<9x128xf32> to vector<1x128xf32>
    %485 = vector.broadcast %484 : vector<1x128xf32> to vector<8x128xf32>
    %486 = arith.mulf %483, %485 : vector<8x128xf32>
    %c16_344 = arith.constant 16 : index
    %c0_345 = arith.constant 0 : index
    %487 = vector.load %arg26[%c16_344, %c0_345] : memref<144x128xf32, #tpu.memory_space<vmem>>, vector<8x128xf32>
    tpu.vector_store %arg26[%c16_344, %c0_345], %486 {strides = array<i32>} : memref<144x128xf32, #tpu.memory_space<vmem>>, vector<8x128xf32>,
    %c0_346 = arith.constant 0 : index
    %c127_347 = arith.constant 127 : index
    %488 = vector.load %arg25[%c0_346, %c127_347] : memref<16x384xf32, #tpu.memory_space<vmem>>, vector<8x128xf32>
    %489 = vector.extract_strided_slice %0 {offsets = [3, 0], sizes = [1, 128], strides = [1, 1]} : vector<9x128xf32> to vector<1x128xf32>
    %490 = vector.broadcast %489 : vector<1x128xf32> to vector<8x128xf32>
    %491 = arith.mulf %488, %490 : vector<8x128xf32>
    %c24_348 = arith.constant 24 : index
    %c0_349 = arith.constant 0 : index
    %492 = vector.load %arg26[%c24_348, %c0_349] : memref<144x128xf32, #tpu.memory_space<vmem>>, vector<8x128xf32>
    tpu.vector_store %arg26[%c24_348, %c0_349], %491 {strides = array<i32>} : memref<144x128xf32, #tpu.memory_space<vmem>>, vector<8x128xf32>,
    %c0_350 = arith.constant 0 : index
    %c128_351 = arith.constant 128 : index
    %493 = vector.load %arg25[%c0_350, %c128_351] : memref<16x384xf32, #tpu.memory_space<vmem>>, vector<8x128xf32>
    %494 = vector.extract_strided_slice %0 {offsets = [4, 0], sizes = [1, 128], strides = [1, 1]} : vector<9x128xf32> to vector<1x128xf32>
    %495 = vector.broadcast %494 : vector<1x128xf32> to vector<8x128xf32>
    %496 = arith.mulf %493, %495 : vector<8x128xf32>
    %c32_352 = arith.constant 32 : index
    %c0_353 = arith.constant 0 : index
    %497 = vector.load %arg26[%c32_352, %c0_353] : memref<144x128xf32, #tpu.memory_space<vmem>>, vector<8x128xf32>
    tpu.vector_store %arg26[%c32_352, %c0_353], %496 {strides = array<i32>} : memref<144x128xf32, #tpu.memory_space<vmem>>, vector<8x128xf32>,
    %c0_354 = arith.constant 0 : index
    %c129_355 = arith.constant 129 : index
    %498 = vector.load %arg25[%c0_354, %c129_355] : memref<16x384xf32, #tpu.memory_space<vmem>>, vector<8x128xf32>
    %499 = vector.extract_strided_slice %0 {offsets = [5, 0], sizes = [1, 128], strides = [1, 1]} : vector<9x128xf32> to vector<1x128xf32>
    %500 = vector.broadcast %499 : vector<1x128xf32> to vector<8x128xf32>
    %501 = arith.mulf %498, %500 : vector<8x128xf32>
    %c40_356 = arith.constant 40 : index
    %c0_357 = arith.constant 0 : index
    %502 = vector.load %arg26[%c40_356, %c0_357] : memref<144x128xf32, #tpu.memory_space<vmem>>, vector<8x128xf32>
    tpu.vector_store %arg26[%c40_356, %c0_357], %501 {strides = array<i32>} : memref<144x128xf32, #tpu.memory_space<vmem>>, vector<8x128xf32>,
    %c0_358 = arith.constant 0 : index
    %c135_359 = arith.constant 135 : index
    %503 = vector.load %arg25[%c0_358, %c135_359] : memref<16x384xf32, #tpu.memory_space<vmem>>, vector<8x128xf32>
    %504 = vector.extract_strided_slice %0 {offsets = [6, 0], sizes = [1, 128], strides = [1, 1]} : vector<9x128xf32> to vector<1x128xf32>
    %505 = vector.broadcast %504 : vector<1x128xf32> to vector<8x128xf32>
    %506 = arith.mulf %503, %505 : vector<8x128xf32>
    %c48_360 = arith.constant 48 : index
    %c0_361 = arith.constant 0 : index
    %507 = vector.load %arg26[%c48_360, %c0_361] : memref<144x128xf32, #tpu.memory_space<vmem>>, vector<8x128xf32>
    tpu.vector_store %arg26[%c48_360, %c0_361], %506 {strides = array<i32>} : memref<144x128xf32, #tpu.memory_space<vmem>>, vector<8x128xf32>,
    %c0_362 = arith.constant 0 : index
    %c136_363 = arith.constant 136 : index
    %508 = vector.load %arg25[%c0_362, %c136_363] : memref<16x384xf32, #tpu.memory_space<vmem>>, vector<8x128xf32>
    %509 = vector.extract_strided_slice %0 {offsets = [7, 0], sizes = [1, 128], strides = [1, 1]} : vector<9x128xf32> to vector<1x128xf32>
    %510 = vector.broadcast %509 : vector<1x128xf32> to vector<8x128xf32>
    %511 = arith.mulf %508, %510 : vector<8x128xf32>
    %c56_364 = arith.constant 56 : index
    %c0_365 = arith.constant 0 : index
    %512 = vector.load %arg26[%c56_364, %c0_365] : memref<144x128xf32, #tpu.memory_space<vmem>>, vector<8x128xf32>
    tpu.vector_store %arg26[%c56_364, %c0_365], %511 {strides = array<i32>} : memref<144x128xf32, #tpu.memory_space<vmem>>, vector<8x128xf32>,
    %c0_366 = arith.constant 0 : index
    %c137_367 = arith.constant 137 : index
    %513 = vector.load %arg25[%c0_366, %c137_367] : memref<16x384xf32, #tpu.memory_space<vmem>>, vector<8x128xf32>
    %514 = vector.extract_strided_slice %0 {offsets = [8, 0], sizes = [1, 128], strides = [1, 1]} : vector<9x128xf32> to vector<1x128xf32>
    %515 = vector.broadcast %514 : vector<1x128xf32> to vector<8x128xf32>
    %516 = arith.mulf %513, %515 : vector<8x128xf32>
    %c64_368 = arith.constant 64 : index
    %c0_369 = arith.constant 0 : index
    %517 = vector.load %arg26[%c64_368, %c0_369] : memref<144x128xf32, #tpu.memory_space<vmem>>, vector<8x128xf32>
    tpu.vector_store %arg26[%c64_368, %c0_369], %516 {strides = array<i32>} : memref<144x128xf32, #tpu.memory_space<vmem>>, vector<8x128xf32>,
    %c0_370 = arith.constant 0 : index
    %c0_371 = arith.constant 0 : index
    %518 = vector.load %arg20[%c0_370, %c0_371] : memref<14x72xbf16, #tpu.memory_space<vmem>>, vector<14x72xbf16>
    %c0_372 = arith.constant 0 : index
    %c0_373 = arith.constant 0 : index
    %519 = vector.load %arg26[%c0_372, %c0_373] : memref<144x128xf32, #tpu.memory_space<vmem>>, vector<72x128xf32>
    %520 = arith.truncf %519 : vector<72x128xf32> to vector<72x128xbf16>
    %cst_374 = arith.constant dense<0.000000e+00> : vector<14x128xf32>
    %521 = tpu.matmul %518, %520, %cst_374 {dimension_numbers = #tpu.dot_dimension_numbers<[1], [0], [0], [1], [0, 0, 1, 1], [], []>} : vector<14x72xbf16>, vector<72x128xbf16>, vector<14x128xf32> -> vector<14x128xf32>
    %c0_375 = arith.constant 0 : index
    %c0_376 = arith.constant 0 : index
    %522 = vector.load %arg21[%c0_375, %c0_376] : memref<14x1xf32, #tpu.memory_space<vmem>>, vector<14x1xf32>
    %523 = vector.broadcast %522 : vector<14x1xf32> to vector<14x128xf32>
    %524 = arith.addf %521, %523 : vector<14x128xf32>
    %c0_377 = arith.constant 0 : index
    %c0_378 = arith.constant 0 : index
    %525 = vector.load %arg24[%c0_377, %c0_378] : memref<14x128xf32, #tpu.memory_space<vmem>>, vector<14x128xf32>
    tpu.vector_store %arg24[%c0_377, %c0_378], %524 {strides = array<i32>} : memref<14x128xf32, #tpu.memory_space<vmem>>, vector<14x128xf32>,
    return
  }
}

</mosaic_0001>

<bundles_post_ra>
// kernel: ssd_forward.1
= control target key start
LH: loop header
LB: loop body
LE: loop exit
PB: predicated region body
PF: predicated region fallthrough
CT: control target
= control target key end

     0   :  { %v85_v0 = vlaneseq  ;;  %v2216_v1 = vmov 0.0   ;;  %s3143_s29 = smov 119   ;;  %s2220_s30 = smov 127   ;;  %v2225_v22 = vmov 0   ;;  %vm2226_vm0 = vmmov 0   ;;  %s3115_s1 = inlined_call_operand.vmem [shape: f32[9,128], index: 1, kind: input, shape index: {}]   ;;  %s3116_s0 = inlined_call_operand.vmem [shape: f32[4,128], index: 0, kind: input, shape index: {}]   ;;  %s3117_s3 = inlined_call_operand.vmem [shape: f32[8,1], index: 3, kind: input, shape index: {}]   ;;  %s3118_s2 = inlined_call_operand.vmem [shape: bf16[8,36], index: 2, kind: input, shape index: {}]   ;;  %s3119_s5 = inlined_call_operand.vmem [shape: f32[8,1], index: 5, kind: input, shape index: {}]   ;;  %s3120_s4 = inlined_call_operand.vmem [shape: bf16[8,72], index: 4, kind: input, shape index: {}]   ;;  %s3121_s9 = inlined_call_operand.vmem [shape: f32[8,1], index: 9, kind: input, shape index: {}]   ;;  %s3122_s8 = inlined_call_operand.vmem [shape: bf16[8,72], index: 8, kind: input, shape index: {}]   ;;  %s3123_s6 = inlined_call_operand.vmem [shape: bf16[14,72], index: 6, kind: input, shape index: {}]   ;;  %s3124_s11 = inlined_call_operand.vmem [shape: f32[16,1], index: 11, kind: input, shape index: {}]   ;;  %s3125_s10 = inlined_call_operand.vmem [shape: bf16[16,72], index: 10, kind: input, shape index: {}]   ;;  %s3126_s14 = inlined_call_operand.vmem [shape: f32[9,16,1], index: 14, kind: input, shape index: {}]   ;;  %s3127_s15 = inlined_call_operand.vmem [shape: f32[16,1], index: 15, kind: input, shape index: {}]   ;;  %s3128_s17 = inlined_call_operand.vmem [shape: f32[8,1], index: 17, kind: input, shape index: {}]   ;;  %s3129_s18 = inlined_call_operand.vmem [shape: f32[9,8,1], index: 18, kind: input, shape index: {}]   ;;  %s3130_s12 = inlined_call_operand.vmem [shape: bf16[14,144], index: 12, kind: input, shape index: {}]   ;;  %s3131_s16 = inlined_call_operand.vmem [shape: bf16[8,16], index: 16, kind: input, shape index: {}]   ;;  %s3132_s19 = inlined_call_operand.vmem [shape: bf16[32,8], index: 19, kind: input, shape index: {}]   ;;  %s3133_s7 = inlined_call_operand.vmem [shape: f32[14,1], index: 7, kind: input, shape index: {}]   ;;  %s3134_s13 = inlined_call_operand.vmem [shape: f32[14,1], index: 13, kind: input, shape index: {}]   ;;  %s3135_s21 = inlined_call_operand.vmem [shape: f32[14,1], index: 21, kind: input, shape index: {}]   ;;  %s3136_s20 = inlined_call_operand.vmem [shape: bf16[14,72], index: 20, kind: input, shape index: {}]   ;;  %s3137_s22 = inlined_call_operand.vmem [shape: f32[14,128], index: 22, kind: output, shape index: {0}]   ;;  %s3138_s23 = inlined_call_operand.vmem [shape: f32[14,128], index: 23, kind: output, shape index: {1}]   ;;  %s3139_s24 = inlined_call_operand.vmem [shape: f32[14,128], index: 24, kind: output, shape index: {2}]  }
   0x1   :  { %3147 = sst [smem:[#allocation4_spill]] %s3115_s1  ;;  %77 = vst [vmem:[#allocation2] sm:$0xff] %v2216_v1  ;;  %79 = vst [vmem:[#allocation2 + $0x10] sm:$0xff] %v2216_v1  ;;  %2088 = vmatprep.subr.bf16.mxu0 %v2216_v1  ;;  %2098 = vmatprep.subr.bf16.mxu1 %v2216_v1  ;;  %s3145_s1 = smov 121   ;;  %vm101_vm1 = vcmask 72704   ;;  %vm123_vm2 = vcmask 64512  }
   0x2   :  { %3148 = sst [smem:[#allocation5_spill]] %s3116_s0  ;;  %v86_v2 = vshrl.u32 %v85_v0, 7  ;;  %s2222_s25 = smov 7   ;;  %2197 = vset.pattern.permute.xlu0 %v2225_v22  ;;  %2198 = vset.pattern.permute.xlu1 %v2225_v22  ;;  %vm145_vm3 = vcmask 56320   ;;  %vm167_vm4 = vcmask 7168   ;;  %vm196_vm5 = vcmask 1039360  }
   0x3   :  { %3149 = sst [smem:[#allocation6_spill]] %s3117_s3  ;;  %s3156_s27 = sld [smem:[#allocation5_spill]]  ;;  %2094 = vmatprep.mubr.msk.bf16.mxu0 %vm2226_vm0, %v2216_v1  ;;  %2108 = vmatprep.mubr.msk.bf16.mxu1 %vm2226_vm0, %v2216_v1  ;;  %vm218_vm6 = vcmask 990208   ;;  %vm240_vm7 = vcmask 982016   ;;  %vm262_vm8 = vcmask 973824   ;;  %vm285_vm9 = vcmask 1041408  }
   0x4   :  { %3150 = sst [smem:[#allocation7_spill]] %s3118_s2  ;;  %s3157_s3 = sld [smem:[#allocation4_spill]]  ;;  %v87_v5 = vsub.s32 0, %v86_v2  ;;  %v174_v6 = vsub.s32 4, %v86_v2  ;;  %v109_v7 = vsub.s32 1, %v86_v2  ;;  %v131_v8 = vsub.s32 2, %v86_v2 }
   0x5   :  { %3151 = sst [smem:[#allocation8_spill]] %s3119_s5  ;;  %v153_v9 = vsub.s32 3, %v86_v2  ;;  %v182_v15 = vsub.s32 5, %v86_v2  ;;  %v204_v16 = vsub.s32 6, %v86_v2  ;;  %v226_v19 = vsub.s32 7, %v86_v2  ;;  %s3141_s2 = smov 1  }
   0x6   :  { %3152 = sst [smem:[#allocation9_spill]] %s3120_s4  ;;  %s2223_s0 = smov 8   ;;  %vm281_vm10 = vcmask 293888   ;;  %vm464_vm11 = vcmask 1043456   ;;  %vm460_vm12 = vcmask 588800   ;;  %vm1227_vm13 = vcmask 130048  }
   0x7   :  { %3153 = sst [smem:[#allocation10_spill]] %s3121_s9  ;;  %s2224_s4 = smov 9   ;;  %vm1563_vm14 = vcmask 1031168   ;;  %vm1625_vm15 = vcmask 965632  }
   0x8   :  { %3154 = sst [smem:[#allocation11_spill]] %s3122_s8  ;;  %s2219_s8 = smov 120   ;;  %v83_v23 = vld [vmem:[#allocation2] sm:$0xf]  ;;  %v179_v47 = vld [vmem:[#allocation2 + $0x10] sm:$0xf] }
   0x9   :  { %3155 = sst [smem:[#allocation12_spill]] %s3123_s6  ;;  %v81_v3 = vld [vmem:[%s3156_s27] sm:$0xf]  ;;  %v201_v52 = vld [vmem:[#allocation2 + $0x10] sm:$0xf]  ;;  %s3158_s28 = sld [smem:[#allocation6_spill]] }
   0xa   :  { %v75_v4 = vld [vmem:[%s3157_s3] sm:$0xff]  ;;  %82 = vst [vmem:[#allocation2 + $0x8] sm:$0xf] %v81_v3  ;;  %v2005_v21 = vld [vmem:[%s3157_s3 + $0x8] ss:$0 sm:$0xff]  ;;  %s3159_s6 = sld [smem:[#allocation7_spill]] }
   0xb   :  { %v88_v10 = vrot.slane %v75_v4, %v87_v5  ;;  %v2367_v11 = vrot.slane %v75_v4, %v174_v6  ;;  %v132_v12 = vrot.slane %v75_v4, %v131_v8  ;;  %v110_v13 = vrot.slane %v75_v4, %v109_v7  ;;  %v105_v28 = vld [vmem:[#allocation2] sm:$0xf]  ;;  %v223_v57 = vld [vmem:[#allocation2 + $0x10] sm:$0xf]  ;;  %s3160_s27 = sld [smem:[#allocation8_spill]]  ;;  %s3161_s3 = sld [smem:[#allocation9_spill]] }
   0xc   :  { %v154_v14 = vrot.slane %v75_v4, %v153_v9  ;;  %v183_v17 = vrot.slane %v75_v4, %v182_v15  ;;  %v205_v18 = vrot.slane %v75_v4, %v204_v16  ;;  %v227_v20 = vrot.slane %v75_v4, %v226_v19  ;;  %v127_v32 = vld [vmem:[#allocation2] sm:$0xf]  ;;  %v245_v62 = vld [vmem:[#allocation2 + $0x10] sm:$0xf]  ;;  %s3162_s26 = sld [smem:[#allocation10_spill]]  ;;  %s3163_s9 = sld [smem:[#allocation11_spill]] }
   0xd   :  { %90 = vrot.lane.b32.xlu0 %v88_v10, %s3143_s29  ;;  %134 = vrot.lane.b32.xlu1 %v132_v12, %s3145_s1  ;;  %v149_v41 = vld [vmem:[#allocation2] sm:$0xf]  ;;  %s3164_s5 = sld [smem:[#allocation12_spill]] }
   0xf   :  { %v275_v2 = vld [vmem:[%s3158_s28] sm:$0xff] }
  0x11   :  { %112 = vrot.lane.b32.xlu0 %v110_v13, %s2219_s8  ;;  %156 = vrot.lane.b32.xlu1 %v154_v14, %s2220_s30  ;;  %v84_v24 = vld [vmem:[#allocation2 + $0x8] sm:$0xf] }
  0x12   :  { %v106_v29 = vld [vmem:[#allocation2 + $0x8] sm:$0xf] }
  0x13   :  { %v128_v33 = vld [vmem:[#allocation2 + $0x8] sm:$0xf] }
  0x14   :  { %v171_v36 = vld [vmem:[#allocation2 + $0x8] sm:$0xf] }
  0x15   :  { %185 = vrot.lane.b32.xlu0 %v183_v17, %s3141_s2  ;;  %207 = vrot.lane.b32.xlu1 %v205_v18, %s2222_s25  ;;  %v176_v37 = vmul.f32 %v2367_v11, %v171_v36  ;;  %v150_v42 = vld [vmem:[#allocation2 + $0x8] sm:$0xf] }
  0x16   :  { %v178_v46 = vld [vmem:[#allocation2 + $0x8] sm:$0xf] }
  0x17   :  { %177 = vst [vmem:[#allocation3 + $0x10] sm:$0xf] %v176_v37  ;;  %v200_v51 = vld [vmem:[#allocation2 + $0x8] sm:$0xf] }
  0x18   :  { %v222_v56 = vld [vmem:[#allocation2 + $0x8] sm:$0xf] }
  0x19   :  { %229 = vrot.lane.b32.xlu0 %v227_v20, %s2223_s0  ;;  %251 = vrot.lane.b32.xlu1 %v2005_v21, %s2224_s4  ;;  %v244_v61 = vld [vmem:[#allocation2 + $0x8] sm:$0xf] }
  0x7f   :  { %v2382_v25 = vpop.permute.xlu0 %90  ;;  %v2386_v30 = vpop.permute.xlu1 %134 }
  0x80   :  { %v93_v26 = vmul.f32 %v2382_v25, %v83_v23  ;;  %v94_v27 = vmul.f32 %v2382_v25, %v84_v24  ;;  %v137_v38 = vmul.f32 %v2386_v30, %v127_v32  ;;  %v138_v39 = vmul.f32 %v2386_v30, %v128_v33 }
  0x81   :  { %v2439_v3 = vmul.f32 0.0, %v2382_v25  ;;  %v2454_v6 = vmul.f32 0.0, %v2386_v30 }
  0x82   :  { %97 = vrot.lane.b32.xlu0 %v93_v26, %s2224_s4  ;;  %99 = vrot.lane.b32.xlu1 %v94_v27, %s2224_s4 }
  0x83   :  { %v2390_v31 = vpop.permute.xlu0 %112  ;;  %v2399_v40 = vpop.permute.xlu1 %156 }
  0x84   :  { %v115_v34 = vmul.f32 %v2390_v31, %v105_v28  ;;  %v116_v35 = vmul.f32 %v2390_v31, %v106_v29  ;;  %v159_v43 = vmul.f32 %v2399_v40, %v149_v41  ;;  %v160_v44 = vmul.f32 %v2399_v40, %v150_v42 }
  0x85   :  { %v2444_v4 = vmul.f32 0.0, %v2390_v31  ;;  %v2459_v7 = vmul.f32 0.0, %v2399_v40 }
  0x86   :  { %119 = vrot.lane.b32.xlu0 %v115_v34, %s2223_s0  ;;  %121 = vrot.lane.b32.xlu1 %v116_v35, %s2223_s0 }
  0x87   :  { %v2405_v45 = vpop.permute.xlu0 %185  ;;  %v2411_v50 = vpop.permute.xlu1 %207 }
  0x88   :  { %v188_v48 = vmul.f32 %v2405_v45, %v178_v46  ;;  %v189_v49 = vmul.f32 %v2405_v45, %v179_v47  ;;  %v210_v53 = vmul.f32 %v2411_v50, %v200_v51  ;;  %v211_v54 = vmul.f32 %v2411_v50, %v201_v52 }
  0x89   :  { %v2447_v5 = vmul.f32 0.0, %v2405_v45 }
  0x8a   :  { %141 = vrot.lane.b32.xlu0 %v137_v38, %s2222_s25  ;;  %143 = vrot.lane.b32.xlu1 %v138_v39, %s2222_s25 }
  0x8b   :  { %v2417_v55 = vpop.permute.xlu0 %229  ;;  %v2423_v60 = vpop.permute.xlu1 %251 }
  0x8c   :  { %v232_v58 = vmul.f32 %v2417_v55, %v222_v56  ;;  %v233_v59 = vmul.f32 %v2417_v55, %v223_v57  ;;  %v254_v63 = vmul.f32 %v2423_v60, %v244_v61  ;;  %v255_v0 = vmul.f32 %v2423_v60, %v245_v62 }
  0x8e   :  { %163 = vrot.lane.b32.xlu0 %v159_v43, %s3141_s2  ;;  %165 = vrot.lane.b32.xlu1 %v160_v44, %s3141_s2 }
  0x92   :  { %192 = vrot.lane.b32.xlu0 %v188_v48, %s2220_s30  ;;  %194 = vrot.lane.b32.xlu1 %v189_v49, %s2220_s30  ;;  %v266_v48 = vld [vmem:[%s3159_s6] sm:$0xf] }
  0x96   :  { %214 = vrot.lane.b32.xlu0 %v210_v53, %s3145_s1  ;;  %216 = vrot.lane.b32.xlu1 %v211_v54, %s3145_s1 }
  0x9a   :  { %236 = vrot.lane.b32.xlu0 %v232_v58, %s2219_s8  ;;  %238 = vrot.lane.b32.xlu1 %v233_v59, %s2219_s8 }
  0x9e   :  { %258 = vrot.lane.b32.xlu0 %v254_v63, %s3143_s29  ;;  %260 = vrot.lane.b32.xlu1 %v255_v0, %s3143_s29 }
  0xa2   :  { %278 = vperm.xlu0 %2197, %v275_v2   ;;  %338 = vrot.lane.b32.xlu1 %v2439_v3, %s2224_s4 }
  0xa6   :  { %351 = vrot.lane.b32.xlu0 %v2444_v4, %s2223_s0  ;;  %395 = vrot.lane.b32.xlu1 %v2447_v5, %s2220_s30 }
  0xaa   :  { %364 = vrot.lane.b32.xlu0 %v2454_v6, %s2222_s25 }
  0xae   :  { %377 = vrot.lane.b32.xlu0 %v2459_v7, %s3141_s2 }
  0xf4   :  { %v98_v8 = vpop.permute.xlu0 %97  ;;  %v100_v9 = vpop.permute.xlu1 %99 }
  0xf5   :  { %v102_v10 = vsel %vm101_vm1, %v98_v8, %v100_v9 }
  0xf6   :  { %104 = vst [vmem:[#allocation3] sm:$0xf] %v102_v10  ;;  %v454_v10 = vld [vmem:[%s3160_s27] sm:$0xff]  ;;  %s2231_s27 = smov 110  }
  0xf8   :  { %v120_v12 = vpop.permute.xlu0 %119  ;;  %v122_v13 = vpop.permute.xlu1 %121 }
  0xf9   :  { %v124_v14 = vsel %vm123_vm2, %v120_v12, %v122_v13  ;;  %v2499_v12 = vmul.f32 0.0, %v2411_v50  ;;  %v2504_v13 = vmul.f32 0.0, %v2417_v55 }
  0xfa   :  { %126 = vst [vmem:[#allocation3 + $0x4] sm:$0xf] %v124_v14  ;;  %v2511_v14 = vmul.f32 0.0, %v2423_v60 }
  0xfc   :  { %v142_v15 = vpop.permute.xlu0 %141  ;;  %v144_v16 = vpop.permute.xlu1 %143 }
  0xfd   :  { %v146_v17 = vsel %vm145_vm3, %v142_v15, %v144_v16 }
  0xfe   :  { %148 = vst [vmem:[#allocation3 + $0x8] sm:$0xf] %v146_v17 }
 0x100   :  { %v164_v18 = vpop.permute.xlu0 %163  ;;  %v166_v19 = vpop.permute.xlu1 %165 }
 0x101   :  { %v168_v20 = vsel %vm167_vm4, %v164_v18, %v166_v19  ;;  %v267_v29 = vld [vmem:[#allocation3] sm:$0xff] }
 0x102   :  { %170 = vst [vmem:[#allocation3 + $0xc] sm:$0xf] %v168_v20 }
 0x104   :  { %v193_v21 = vpop.permute.xlu0 %192  ;;  %v195_v23 = vpop.permute.xlu1 %194 }
 0x105   :  { %v197_v24 = vsel %vm196_vm5, %v193_v21, %v195_v23 }
 0x106   :  { %199 = vst [vmem:[#allocation3 + $0x14] sm:$0xf] %v197_v24 }
 0x108   :  { %v215_v26 = vpop.permute.xlu0 %214  ;;  %v217_v27 = vpop.permute.xlu1 %216 }
 0x109   :  { %v219_v28 = vsel %vm218_vm6, %v215_v26, %v217_v27  ;;  %v268_v32 = vld [vmem:[#allocation3 + $0x8] sm:$0xff] }
 0x10a   :  { %221 = vst [vmem:[#allocation3 + $0x18] sm:$0xf] %v219_v28  ;;  %v272_v33 = vpack.c.bf16 %v268_v32, %v267_v29 }
 0x10c   :  { %v237_v34 = vpop.permute.xlu0 %236  ;;  %2089 = vmatpush3.bf16.msra.mxu0 %v272_v33  ;;  %v239_v35 = vpop.permute.xlu1 %238 }
 0x10d   :  { %v241_v36 = vsel %vm240_vm7, %v237_v34, %v239_v35  ;;  %2090 = vmatprep.subr.bf16.mxu0 %v2216_v1  ;;  %v269_v41 = vld [vmem:[#allocation3 + $0x10] sm:$0xff] }
 0x10e   :  { %243 = vst [vmem:[#allocation3 + $0x1c] sm:$0xf] %v241_v36 }
 0x110   :  { %v259_v37 = vpop.permute.xlu0 %258  ;;  %v261_v38 = vpop.permute.xlu1 %260 }
 0x111   :  { %v263_v39 = vsel %vm262_vm8, %v259_v37, %v261_v38 }
 0x112   :  { %265 = vst [vmem:[#allocation3 + $0x20] sm:$0xf] %v263_v39 }
 0x114   :  { %v339_v15 = vpop.permute.xlu1 %338 }
 0x115   :  { %v270_v42 = vld [vmem:[#allocation3 + $0x18] sm:$0xff] }
 0x116   :  { %v273_v43 = vpack.c.bf16 %v270_v42, %v269_v41 }
 0x118   :  { %2091 = vmatpush3.bf16.msra.mxu0 %v273_v43  ;;  %v396_v17 = vpop.permute.xlu1 %395 }
 0x119   :  { %2092 = vmatprep.subr.bf16.mxu0 %v2216_v1  ;;  %v271_v44 = vld [vmem:[#allocation3 + $0x20] sm:$0xf] }
 0x11a   :  { %v274_v46 = vpack.c.bf16 %v271_v44, %v271_v44 }
 0x11c   :  { %v287_v47 = vsel %vm285_vm9, %v274_v46, 0  ;;  %vm1648_vm9 = vcmask 916480  }
 0x11d   :  { %2093 = vmatpush3.bf16.msra.mxu0 %v287_v47 }
 0x11e   :  { %2112 = vmatprep.subr.bf16.mxu0 %v2216_v1 }
 0x120   :  { %2095 = vmatmul.mubr.msk.bf16.vlgmr.msra.gmra.mrb[0].mxu0 %vm281_vm10, %v266_v48  ;;  %vm1671_vm10 = vcmask 908288  }
 0x121   :  { %2122 = vmatprep.mubr.msk.bf16.mxu0 %vm2226_vm0, %v2216_v1  ;;  %v279_v49 = vpop.permute.xlu0 %278 }
 0x125   :  { %v352_v16 = vpop.permute.xlu0 %351 }
 0x129   :  { %v365_v18 = vpop.permute.xlu0 %364 }
 0x12d   :  { %v378_v20 = vpop.permute.xlu0 %377 }
 0x1f3   :  { %v323_v51 = vpop.f32.mrb[0].mxu0 }
 0x1f4   :  { %v324_v52 = vadd.f32 %v323_v51, %v279_v49  ;;  %v2096_v53 = vpop.f32.mrb[1].mxu0 }
 0x1f5   :  { %v326_v54 = vpop.f32.mrb[2].mxu0  ;;  %v439_v53 = vld [vmem:[%s3161_s3] sm:$0xf] }
 0x1f6   :  { %v329_v56 = vmax.f32 %v324_v52, 0.0  ;;  %v2097_v57 = vpop.f32.mrb[3].mxu0 }
 0x1f8   :  { %v330_v58 = vmin.f32 %v329_v56, 6.0 }
 0x1fa   :  { %v389_v59 = vmul.f32 %v330_v58, %v2405_v45  ;;  %v335_v61 = vmul.f32 %v330_v58, %v2382_v25  ;;  %v402_v62 = vmul.f32 %v330_v58, %v2411_v50  ;;  %v348_v63 = vmul.f32 %v330_v58, %v2390_v31 }
 0x1fb   :  { %v415_v0 = vmul.f32 %v330_v58, %v2417_v55  ;;  %v361_v2 = vmul.f32 %v330_v58, %v2386_v30  ;;  %v428_v8 = vmul.f32 %v330_v58, %v2423_v60  ;;  %v374_v9 = vmul.f32 %v330_v58, %v2399_v40 }
 0x1fc   :  { %393 = vrot.lane.b32.xlu0 %v389_v59, %s2220_s30  ;;  %340 = vrot.lane.b32.xlu1 %v335_v61, %s2224_s4  ;;  %v385_v38 = vmul.f32 %v330_v58, %v2367_v11 }
 0x200   :  { %406 = vrot.lane.b32.xlu0 %v402_v62, %s3145_s1  ;;  %353 = vrot.lane.b32.xlu1 %v348_v63, %s2223_s0 }
 0x204   :  { %419 = vrot.lane.b32.xlu0 %v415_v0, %s2219_s8  ;;  %366 = vrot.lane.b32.xlu1 %v361_v2, %s2222_s25 }
 0x208   :  { %432 = vrot.lane.b32.xlu0 %v428_v8, %s3143_s29  ;;  %379 = vrot.lane.b32.xlu1 %v374_v9, %s3141_s2 }
 0x20c   :  { %457 = vperm.xlu0 %2197, %v454_v10   ;;  %408 = vrot.lane.b32.xlu1 %v2499_v12, %s3145_s1 }
 0x210   :  { %574 = vrot.lane.b32.xlu0 %v2447_v5, %s2220_s30  ;;  %421 = vrot.lane.b32.xlu1 %v2504_v13, %s2219_s8 }
 0x214   :  { %434 = vrot.lane.b32.xlu1 %v2511_v14, %s3143_s29 }
 0x218   :  { %517 = vrot.lane.b32.xlu1 %v2439_v3, %s2224_s4 }
 0x21c   :  { %530 = vrot.lane.b32.xlu1 %v2444_v4, %s2223_s0 }
 0x220   :  { %543 = vrot.lane.b32.xlu1 %v2454_v6, %s2222_s25 }
 0x224   :  { %556 = vrot.lane.b32.xlu1 %v2459_v7, %s3141_s2 }
 0x26e   :  { %v341_v19 = vpop.permute.xlu1 %340  ;;  %v394_v26 = vpop.permute.xlu0 %393 }
 0x26f   :  { %v342_v23 = vsel %vm101_vm1, %v339_v15, %v341_v19  ;;  %v397_v36 = vsel %vm196_vm5, %v394_v26, %v396_v17 }
 0x270   :  { %v451_v41 = vpack.c.bf16 %v397_v36, %v385_v38 }
 0x272   :  { %v354_v21 = vpop.permute.xlu1 %353  ;;  %v407_v29 = vpop.permute.xlu0 %406 }
 0x273   :  { %v355_v24 = vsel %vm123_vm2, %v352_v16, %v354_v21 }
 0x274   :  { %v449_v27 = vpack.c.bf16 %v355_v24, %v342_v23 }
 0x276   :  { %v367_v28 = vpop.permute.xlu1 %366  ;;  %2099 = vmatpush3.bf16.msra.mxu1 %v449_v27  ;;  %v420_v39 = vpop.permute.xlu0 %419 }
 0x277   :  { %2100 = vmatprep.subr.bf16.mxu1 %v2216_v1  ;;  %v368_v33 = vsel %vm145_vm3, %v365_v18, %v367_v28  ;;  %v715_v18 = vld [vmem:[%s3162_s26] sm:$0xff]  ;;  %s3166_s26 = smov 1  }
 0x27a   :  { %v380_v32 = vpop.permute.xlu1 %379  ;;  %v433_v47 = vpop.permute.xlu0 %432 }
 0x27b   :  { %v381_v34 = vsel %vm167_vm4, %v378_v20, %v380_v32 }
 0x27c   :  { %v450_v35 = vpack.c.bf16 %v381_v34, %v368_v33 }
 0x27e   :  { %v409_v37 = vpop.permute.xlu1 %408  ;;  %2101 = vmatpush3.bf16.msra.mxu1 %v450_v35 }
 0x27f   :  { %2102 = vmatprep.subr.bf16.mxu1 %v2216_v1  ;;  %v410_v43 = vsel %vm218_vm6, %v407_v29, %v409_v37 }
 0x282   :  { %v422_v42 = vpop.permute.xlu1 %421  ;;  %2103 = vmatpush3.bf16.msra.mxu1 %v451_v41 }
 0x283   :  { %v423_v44 = vsel %vm240_vm7, %v420_v39, %v422_v42  ;;  %2104 = vmatprep.subr.bf16.mxu1 %v2216_v1 }
 0x284   :  { %v452_v46 = vpack.c.bf16 %v423_v44, %v410_v43 }
 0x286   :  { %v435_v48 = vpop.permute.xlu1 %434  ;;  %2105 = vmatpush3.bf16.msra.mxu1 %v452_v46 }
 0x287   :  { %v436_v49 = vsel %vm262_vm8, %v433_v47, %v435_v48  ;;  %2106 = vmatprep.subr.bf16.mxu1 %v2216_v1 }
 0x288   :  { %v453_v51 = vpack.c.bf16 %v436_v49, %v436_v49 }
 0x28a   :  { %v466_v52 = vsel %vm464_vm11, %v453_v51, 0  ;;  %v518_v19 = vpop.permute.xlu1 %517 }
 0x28b   :  { %2107 = vmatpush3.bf16.msra.mxu1 %v466_v52  ;;  %v458_v54 = vpop.permute.xlu0 %457 }
 0x28c   :  { %2126 = vmatprep.subr.bf16.mxu1 %v2216_v1 }
 0x28e   :  { %2109 = vmatmul.mubr.msk.bf16.vlgmr.msra.gmra.mrb[0].mxu1 %vm460_vm12, %v439_v53  ;;  %v531_v20 = vpop.permute.xlu1 %530 }
 0x28f   :  { %2136 = vmatprep.mubr.msk.bf16.mxu1 %vm2226_vm0, %v2216_v1  ;;  %v575_v21 = vpop.permute.xlu0 %574 }
 0x292   :  { %v544_v23 = vpop.permute.xlu1 %543 }
 0x296   :  { %v557_v26 = vpop.permute.xlu1 %556 }
 0x361   :  { %v502_v56 = vpop.f32.mrb[0].mxu1 }
 0x362   :  { %v503_v57 = vadd.f32 %v502_v56, %v458_v54  ;;  %v2110_v58 = vpop.f32.mrb[1].mxu1 }
 0x363   :  { %v505_v59 = vpop.f32.mrb[2].mxu1  ;;  %v700_v58 = vld [vmem:[%s3163_s9] sm:$0xf] }
 0x364   :  { %v508_v61 = vmax.f32 %v503_v57, 0.0  ;;  %v2111_v62 = vpop.f32.mrb[3].mxu1 }
 0x366   :  { %v509_v63 = vmin.f32 %v508_v61, 6.0 }
 0x368   :  { %v568_v0 = vmul.f32 %v509_v63, %v2405_v45  ;;  %v514_v2 = vmul.f32 %v509_v63, %v2382_v25  ;;  %v581_v8 = vmul.f32 %v509_v63, %v2411_v50  ;;  %v527_v9 = vmul.f32 %v509_v63, %v2390_v31 }
 0x369   :  { %v594_v10 = vmul.f32 %v509_v63, %v2417_v55  ;;  %v540_v15 = vmul.f32 %v509_v63, %v2386_v30  ;;  %v607_v16 = vmul.f32 %v509_v63, %v2423_v60  ;;  %v553_v17 = vmul.f32 %v509_v63, %v2399_v40 }
 0x36a   :  { %572 = vrot.lane.b32.xlu1 %v568_v0, %s2220_s30  ;;  %519 = vrot.lane.b32.xlu0 %v514_v2, %s2224_s4  ;;  %v564_v43 = vmul.f32 %v509_v63, %v2367_v11 }
 0x36e   :  { %585 = vrot.lane.b32.xlu1 %v581_v8, %s3145_s1  ;;  %532 = vrot.lane.b32.xlu0 %v527_v9, %s2223_s0  ;;  %v2199_v9 = vld [vmem:[%s3164_s5] sm:$0x7f]  }
 0x372   :  { %598 = vrot.lane.b32.xlu1 %v594_v10, %s2219_s8  ;;  %545 = vrot.lane.b32.xlu0 %v540_v15, %s2222_s25 }
 0x376   :  { %611 = vrot.lane.b32.xlu1 %v607_v16, %s3143_s29  ;;  %558 = vrot.lane.b32.xlu0 %v553_v17, %s3141_s2 }
 0x37a   :  { %718 = vperm.xlu1 %2198, %v715_v18   ;;  %587 = vrot.lane.b32.xlu0 %v2499_v12, %s3145_s1 }
 0x37e   :  { %833 = vrot.lane.b32.xlu1 %v2447_v5, %s2220_s30  ;;  %600 = vrot.lane.b32.xlu0 %v2504_v13, %s2219_s8 }
 0x382   :  { %613 = vrot.lane.b32.xlu0 %v2511_v14, %s3143_s29 }
 0x386   :  { %776 = vrot.lane.b32.xlu0 %v2439_v3, %s2224_s4 }
 0x38a   :  { %789 = vrot.lane.b32.xlu0 %v2444_v4, %s2223_s0 }
 0x38e   :  { %802 = vrot.lane.b32.xlu0 %v2454_v6, %s2222_s25 }
 0x392   :  { %815 = vrot.lane.b32.xlu0 %v2459_v7, %s3141_s2 }
 0x3dc   :  { %v520_v24 = vpop.permute.xlu0 %519  ;;  %v573_v32 = vpop.permute.xlu1 %572 }
 0x3dd   :  { %v521_v28 = vsel %vm101_vm1, %v518_v19, %v520_v24  ;;  %v576_v41 = vsel %vm196_vm5, %v573_v32, %v575_v21  ;;  %v893_v24 = vld [vmem:[%s3124_s11] sm:$0xff]  ;;  %v2024_v32 = vld [vmem:[%s3126_s14 + $0x50] sm:$0xff] }
 0x3de   :  { %v631_v46 = vpack.c.bf16 %v576_v41, %v564_v43 }
 0x3e0   :  { %v533_v27 = vpop.permute.xlu0 %532  ;;  %v586_v35 = vpop.permute.xlu1 %585 }
 0x3e1   :  { %v534_v29 = vsel %vm123_vm2, %v531_v20, %v533_v27  ;;  %v2019_v27 = vld [vmem:[%s3126_s14 + $0x28] sm:$0xff] }
 0x3e2   :  { %v629_v33 = vpack.c.bf16 %v534_v29, %v521_v28  ;;  %v2021_v28 = vld [vmem:[%s3126_s14 + $0x38] sm:$0xff]  ;;  %v2022_v29 = vld [vmem:[%s3126_s14 + $0x40] sm:$0xff] }
 0x3e4   :  { %v546_v34 = vpop.permute.xlu0 %545  ;;  %2113 = vmatpush3.bf16.msra.mxu0 %v629_v33  ;;  %2127 = vmatpush3.bf16.msra.mxu1 %v629_v33  ;;  %v599_v44 = vpop.permute.xlu1 %598  ;;  %v2023_v33 = vld [vmem:[%s3126_s14 + $0x48] sm:$0xff] }
 0x3e5   :  { %2114 = vmatprep.subr.bf16.mxu0 %v2216_v1  ;;  %2128 = vmatprep.subr.bf16.mxu1 %v2216_v1  ;;  %v547_v37 = vsel %vm145_vm3, %v544_v23, %v546_v34 }
 0x3e8   :  { %v559_v36 = vpop.permute.xlu0 %558  ;;  %v612_v52 = vpop.permute.xlu1 %611 }
 0x3e9   :  { %v560_v38 = vsel %vm167_vm4, %v557_v26, %v559_v36  ;;  %v894_v26 = vld [vmem:[%s3124_s11 + $0x8] sm:$0xff] }
 0x3ea   :  { %v630_v39 = vpack.c.bf16 %v560_v38, %v547_v37 }
 0x3ec   :  { %v588_v42 = vpop.permute.xlu0 %587  ;;  %2115 = vmatpush3.bf16.msra.mxu0 %v630_v39  ;;  %2129 = vmatpush3.bf16.msra.mxu1 %v630_v39 }
 0x3ed   :  { %2116 = vmatprep.subr.bf16.mxu0 %v2216_v1  ;;  %2130 = vmatprep.subr.bf16.mxu1 %v2216_v1  ;;  %v589_v48 = vsel %vm218_vm6, %v586_v35, %v588_v42 }
 0x3f0   :  { %v601_v47 = vpop.permute.xlu0 %600  ;;  %2117 = vmatpush3.bf16.msra.mxu0 %v631_v46  ;;  %2131 = vmatpush3.bf16.msra.mxu1 %v631_v46 }
 0x3f1   :  { %v602_v49 = vsel %vm240_vm7, %v599_v44, %v601_v47  ;;  %2118 = vmatprep.subr.bf16.mxu0 %v2216_v1  ;;  %2132 = vmatprep.subr.bf16.mxu1 %v2216_v1 }
 0x3f2   :  { %v632_v51 = vpack.c.bf16 %v602_v49, %v589_v48 }
 0x3f4   :  { %v614_v53 = vpop.permute.xlu0 %613  ;;  %2119 = vmatpush3.bf16.msra.mxu0 %v632_v51  ;;  %2133 = vmatpush3.bf16.msra.mxu1 %v632_v51 }
 0x3f5   :  { %v615_v54 = vsel %vm262_vm8, %v612_v52, %v614_v53  ;;  %2120 = vmatprep.subr.bf16.mxu0 %v2216_v1  ;;  %2134 = vmatprep.subr.bf16.mxu1 %v2216_v1 }
 0x3f6   :  { %v633_v56 = vpack.c.bf16 %v615_v54, %v615_v54 }
 0x3f8   :  { %v655_v57 = vsel %vm464_vm11, %v633_v56, 0  ;;  %v777_v34 = vpop.permute.xlu0 %776 }
 0x3f9   :  { %2121 = vmatpush3.bf16.msra.mxu0 %v655_v57  ;;  %2135 = vmatpush3.bf16.msra.mxu1 %v655_v57  ;;  %v719_v59 = vpop.permute.xlu1 %718 }
 0x3fa   :  { %2140 = vmatprep.subr.bf16.mxu0 %v2216_v1  ;;  %1231 = vmatprep.subr.bf16.mxu1 %v2225_v22 }
 0x3fc   :  { %2137 = vmatmul.mubr.msk.bf16.vlgmr.msra.gmra.mrb[4].mxu1 %vm460_vm12, %v700_v58  ;;  %2123 = vmatmul.mubr.msk.bf16.vlgmr.msra.gmra.mrb[4].mxu0 %vm460_vm12, %v2199_v9  ;;  %v790_v35 = vpop.permute.xlu0 %789 }
 0x3fd   :  { %2150 = vmatprep.mubr.msk.bf16.mxu0 %vm2226_vm0, %v2216_v1  ;;  %v834_v36 = vpop.permute.xlu1 %833 }
 0x400   :  { %v803_v37 = vpop.permute.xlu0 %802 }
 0x404   :  { %v816_v39 = vpop.permute.xlu0 %815 }
 0x4cf   :  { %v761_v61 = vpop.f32.mrb[4].mxu1 }
 0x4d0   :  { %v762_v62 = vadd.f32 %v761_v61, %v719_v59  ;;  %v2138_v63 = vpop.f32.mrb[5].mxu1 }
 0x4d1   :  { %v764_v0 = vpop.f32.mrb[6].mxu1 }
 0x4d2   :  { %v767_v2 = vmax.f32 %v762_v62, 0.0  ;;  %v2139_v8 = vpop.f32.mrb[7].mxu1 }
 0x4d4   :  { %v2606_v10 = vmin.f32 %v767_v2, 6.0 }
 0x4d6   :  { %v827_v15 = vmul.f32 %v2606_v10, %v2405_v45  ;;  %v773_v16 = vmul.f32 %v2606_v10, %v2382_v25  ;;  %v840_v17 = vmul.f32 %v2606_v10, %v2411_v50  ;;  %v786_v18 = vmul.f32 %v2606_v10, %v2390_v31 }
 0x4d7   :  { %v853_v19 = vmul.f32 %v2606_v10, %v2417_v55  ;;  %v799_v20 = vmul.f32 %v2606_v10, %v2386_v30  ;;  %v866_v21 = vmul.f32 %v2606_v10, %v2423_v60  ;;  %v812_v23 = vmul.f32 %v2606_v10, %v2399_v40 }
 0x4d8   :  { %831 = vrot.lane.b32.xlu0 %v827_v15, %s2220_s30  ;;  %778 = vrot.lane.b32.xlu1 %v773_v16, %s2224_s4  ;;  %v823_v56 = vmul.f32 %v2606_v10, %v2367_v11  ;;  %v2200_v15 = vld [vmem:[%s3125_s10] sm:$0xff]   ;;  %v2727_v16 = vpop.f32.mrb[4].mxu0  ;;  %s3165_s10 = smov 119  }
 0x4dc   :  { %844 = vrot.lane.b32.xlu0 %v840_v17, %s3145_s1  ;;  %791 = vrot.lane.b32.xlu1 %v786_v18, %s2223_s0  ;;  %v2124_v17 = vpop.f32.mrb[5].mxu0 }
 0x4dd   :  { %v2729_v18 = vpop.f32.mrb[6].mxu0  ;;  %v2812_v17 = vld [vmem:[#allocation2] sm:$0xff] }
 0x4e0   :  { %857 = vrot.lane.b32.xlu0 %v853_v19, %s2219_s8  ;;  %804 = vrot.lane.b32.xlu1 %v799_v20, %s2222_s25  ;;  %v2125_v19 = vpop.f32.mrb[7].mxu0 }
 0x4e1   :  { %v2816_v19 = vmul.f32 %v2812_v17, %v2423_v60 }
 0x4e4   :  { %870 = vrot.lane.b32.xlu0 %v866_v21, %s3143_s29  ;;  %817 = vrot.lane.b32.xlu1 %v812_v23, %s3141_s2 }
 0x4e8   :  { %897 = vperm.xlu0 %2197, %v893_v24   ;;  %846 = vrot.lane.b32.xlu1 %v2499_v12, %s3145_s1 }
 0x4ec   :  { %975 = vrot.lane.b32.xlu0 %v2439_v3, %s2224_s4  ;;  %859 = vrot.lane.b32.xlu1 %v2504_v13, %s2219_s8 }
 0x4f0   :  { %979 = vrot.lane.b32.xlu0 %v2439_v3, %s2224_s4  ;;  %872 = vrot.lane.b32.xlu1 %v2511_v14, %s3143_s29  ;;  %v1275_v3 = vld [vmem:[%s3126_s14 + $0x8] sm:$0xff]  ;;  %s2227_s29 = smov 126  }
 0x4f4   :  { %1001 = vrot.lane.b32.xlu0 %v2444_v4, %s2223_s0  ;;  %902 = vperm.xlu1 %2198, %v894_v26  }
 0x4f8   :  { %1005 = vrot.lane.b32.xlu0 %v2444_v4, %s2223_s0  ;;  %1087 = vrot.lane.b32.xlu1 %v2447_v5, %s2220_s30  ;;  %v2017_v4 = vld [vmem:[%s3126_s14 + $0x18] sm:$0xff] }
 0x4fc   :  { %1027 = vrot.lane.b32.xlu0 %v2454_v6, %s2222_s25  ;;  %1091 = vrot.lane.b32.xlu1 %v2447_v5, %s2220_s30  ;;  %v1274_v5 = vld [vmem:[%s3126_s14] sm:$0xff] }
 0x500   :  { %1031 = vrot.lane.b32.xlu0 %v2454_v6, %s2222_s25  ;;  %1285 = vperm.xlu1 %2198, %v1275_v3   ;;  %v2016_v6 = vld [vmem:[%s3126_s14 + $0x10] sm:$0xff] }
 0x504   :  { %1053 = vrot.lane.b32.xlu0 %v2459_v7, %s3141_s2  ;;  %1304 = vperm.xlu1 %2198, %v2017_v4  }
 0x508   :  { %1057 = vrot.lane.b32.xlu0 %v2459_v7, %s3141_s2  ;;  %1113 = vrot.lane.b32.xlu1 %v2499_v12, %s3145_s1  ;;  %v2018_v7 = vld [vmem:[%s3126_s14 + $0x20] sm:$0xff]  ;;  %s2230_s2 = smov 111  }
 0x50c   :  { %1280 = vperm.xlu0 %2197, %v1274_v5   ;;  %1117 = vrot.lane.b32.xlu1 %v2499_v12, %s3145_s1  ;;  %v2020_v12 = vld [vmem:[%s3126_s14 + $0x30] sm:$0xff] }
 0x510   :  { %1299 = vperm.xlu0 %2197, %v2016_v6   ;;  %1323 = vperm.xlu1 %2198, %v2019_v27  }
 0x514   :  { %1318 = vperm.xlu0 %2197, %v2018_v7   ;;  %1342 = vperm.xlu1 %2198, %v2021_v28  }
 0x518   :  { %1337 = vperm.xlu0 %2197, %v2020_v12   ;;  %1139 = vrot.lane.b32.xlu1 %v2504_v13, %s2219_s8 }
 0x51c   :  { %1356 = vperm.xlu0 %2197, %v2022_v29   ;;  %1143 = vrot.lane.b32.xlu1 %v2504_v13, %s2219_s8 }
 0x520   :  { %1375 = vperm.xlu0 %2197, %v2024_v32   ;;  %1361 = vperm.xlu1 %2198, %v2023_v33  }
 0x54a   :  { %v779_v38 = vpop.permute.xlu1 %778  ;;  %v832_v43 = vpop.permute.xlu0 %831 }
 0x54b   :  { %v780_v42 = vsel %vm101_vm1, %v777_v34, %v779_v38  ;;  %v835_v53 = vsel %vm196_vm5, %v832_v43, %v834_v36 }
 0x54c   :  { %v890_v58 = vpack.c.bf16 %v835_v53, %v823_v56 }
 0x54e   :  { %v792_v41 = vpop.permute.xlu1 %791  ;;  %v845_v47 = vpop.permute.xlu0 %844 }
 0x54f   :  { %v793_v13 = vsel %vm123_vm2, %v790_v35, %v792_v41 }
 0x550   :  { %v888_v44 = vpack.c.bf16 %v793_v13, %v780_v42 }
 0x552   :  { %v805_v46 = vpop.permute.xlu1 %804  ;;  %2141 = vmatpush3.bf16.msra.mxu0 %v888_v44  ;;  %v858_v57 = vpop.permute.xlu0 %857 }
 0x553   :  { %2142 = vmatprep.subr.bf16.mxu0 %v2216_v1  ;;  %v806_v49 = vsel %vm145_vm3, %v803_v37, %v805_v46 }
 0x556   :  { %v818_v48 = vpop.permute.xlu1 %817  ;;  %v871_v0 = vpop.permute.xlu0 %870 }
 0x557   :  { %v819_v51 = vsel %vm167_vm4, %v816_v39, %v818_v48 }
 0x558   :  { %v889_v52 = vpack.c.bf16 %v819_v51, %v806_v49 }
 0x55a   :  { %v847_v54 = vpop.permute.xlu1 %846  ;;  %2143 = vmatpush3.bf16.msra.mxu0 %v889_v52 }
 0x55b   :  { %2144 = vmatprep.subr.bf16.mxu0 %v2216_v1  ;;  %v848_v61 = vsel %vm218_vm6, %v845_v47, %v847_v54 }
 0x55e   :  { %v860_v59 = vpop.permute.xlu1 %859  ;;  %2145 = vmatpush3.bf16.msra.mxu0 %v890_v58 }
 0x55f   :  { %v861_v62 = vsel %vm240_vm7, %v858_v57, %v860_v59  ;;  %2146 = vmatprep.subr.bf16.mxu0 %v2216_v1  ;;  %v2026_v57 = vld [vmem:[%s3126_s14 + $0x60] sm:$0xff]  ;;  %v2028_v59 = vld [vmem:[%s3126_s14 + $0x70] sm:$0xff] }
 0x560   :  { %v891_v63 = vpack.c.bf16 %v861_v62, %v848_v61 }
 0x562   :  { %v873_v2 = vpop.permute.xlu1 %872  ;;  %2147 = vmatpush3.bf16.msra.mxu0 %v891_v63 }
 0x563   :  { %v874_v8 = vsel %vm262_vm8, %v871_v0, %v873_v2  ;;  %2148 = vmatprep.subr.bf16.mxu0 %v2216_v1 }
 0x564   :  { %v892_v9 = vpack.c.bf16 %v874_v8, %v874_v8  ;;  %v2025_v8 = vld [vmem:[%s3126_s14 + $0x58] sm:$0xff] }
 0x566   :  { %v914_v10 = vsel %vm464_vm11, %v892_v9, 0 }
 0x567   :  { %2149 = vmatpush3.bf16.msra.mxu0 %v914_v10  ;;  %v898_v20 = vpop.permute.xlu0 %897 }
 0x56a   :  { %2151 = vmatmul.mubr.msk.bf16.vlgmr.msra.gmra.mrb[8].mxu0 %vm460_vm12, %v2200_v15  ;;  %v2030_v15 = vld [vmem:[%s3126_s14 + $0x80] sm:$0xff] }
 0x56b   :  { %v2731_v21 = vpop.permute.xlu0 %975 }
 0x56f   :  { %v2733_v1 = vpop.permute.xlu0 %979 }
 0x573   :  { %v2735_v23 = vpop.permute.xlu0 %1001  ;;  %v903_v32 = vpop.permute.xlu1 %902 }
 0x577   :  { %v2737_v24 = vpop.permute.xlu0 %1005 }
 0x57b   :  { %v2739_v26 = vpop.permute.xlu0 %1027 }
 0x57f   :  { %v2741_v3 = vpop.permute.xlu0 %1031 }
 0x583   :  { %v2743_v4 = vpop.permute.xlu0 %1053 }
 0x587   :  { %v2745_v5 = vpop.permute.xlu0 %1057 }
 0x58b   :  { %v2747_v6 = vpop.permute.xlu0 %1280 }
 0x58f   :  { %v2749_v27 = vpop.permute.xlu0 %1299 }
 0x593   :  { %v2751_v7 = vpop.permute.xlu0 %1318 }
 0x597   :  { %v2753_v39 = vpop.permute.xlu0 %1337 }
 0x59b   :  { %v1357_v48 = vpop.permute.xlu0 %1356 }
 0x63d   :  { %v950_v28 = vpop.f32.mrb[8].mxu0 }
 0x63e   :  { %v951_v12 = vadd.f32 %v950_v28, %v898_v20  ;;  %v2152_v29 = vpop.f32.mrb[9].mxu0  ;;  %v1444_v20 = vld [vmem:[%s3127_s15] sm:$0xff] }
 0x63f   :  { %v953_v33 = vpop.f32.mrb[10].mxu0  ;;  %v1460_v28 = vld [vmem:[%s3128_s17] sm:$0xff]  ;;  %v2034_v29 = vld [vmem:[%s3129_s18 + $0x10] sm:$0xff] }
 0x640   :  { %v957_v34 = vmax.f32 %v951_v12, 0.0  ;;  %v954_v35 = vadd.f32 %v953_v33, %v903_v32  ;;  %v2153_v36 = vpop.f32.mrb[11].mxu0  ;;  %v2029_v12 = vld [vmem:[%s3126_s14 + $0x78] sm:$0xff]  ;;  %v2031_v32 = vld [vmem:[%s3126_s14 + $0x88] sm:$0xff]  ;;  %v1088_v33 = vpop.permute.xlu1 %1087 }
 0x641   :  { %v2201_v36 = vld [vmem:[%s3130_s12 + $0x4] ss:$8 sps:$4 sm:$0x7f]  }
 0x642   :  { %v959_v37 = vmin.f32 %v957_v34, 6.0  ;;  %v958_v38 = vmax.f32 %v954_v35, 0.0  ;;  %v2036_v34 = vld [vmem:[%s3129_s18 + $0x20] sm:$0xff]  ;;  %v1445_v35 = vld [vmem:[%s3127_s15 + $0x8] sm:$0xff]  ;;  %2015 = vmatprep.mubr.msk.bf16.mxu1 %vm1227_vm13, %v2201_v36  ;;  %s2229_s15 = smov 112  }
 0x644   :  { %v960_v41 = vmin.f32 %v958_v38, 6.0  ;;  %v1077_v42 = vmul.f32 %v959_v37, %v2405_v45  ;;  %v968_v13 = vmul.f32 %v959_v37, %v2382_v25  ;;  %v1103_v44 = vmul.f32 %v959_v37, %v2411_v50  ;;  %v2038_v38 = vld [vmem:[%s3129_s18 + $0x30] sm:$0xff] }
 0x645   :  { %v994_v46 = vmul.f32 %v959_v37, %v2390_v31  ;;  %v2765_v47 = vmul.f32 %v959_v37, %v2367_v11  ;;  %v1129_v52 = vmul.f32 %v959_v37, %v2417_v55  ;;  %v1020_v53 = vmul.f32 %v959_v37, %v2386_v30 }
 0x646   :  { %v2758_v43 = vmul.f32 %v960_v41, %v2367_v11  ;;  %1085 = vrot.lane.b32.xlu0 %v1077_v42, %s2220_s30  ;;  %977 = vrot.lane.b32.xlu1 %v968_v13, %s2224_s4  ;;  %v1155_v54 = vmul.f32 %v959_v37, %v2423_v60  ;;  %v1046_v56 = vmul.f32 %v959_v37, %v2399_v40  ;;  %v2848_v37 = vpop.permute.xlu1 %1091  ;;  %v2040_v42 = vld [vmem:[%s3129_s18 + $0x40] sm:$0xff]  ;;  %v2035_v13 = vld [vmem:[%s3129_s18 + $0x18] sm:$0xff] }
 0x647   :  { %v2770_v49 = vmul.f32 %v1357_v48, %v2765_v47  ;;  %v970_v58 = vmul.f32 %v960_v41, %v2382_v25  ;;  %v996_v61 = vmul.f32 %v960_v41, %v2390_v31  ;;  %v1079_v62 = vmul.f32 %v960_v41, %v2405_v45 }
 0x648   :  { %v1201_v51 = vpack.c.bf16 %v2758_v43, %v2765_v47  ;;  %v1022_v63 = vmul.f32 %v960_v41, %v2386_v30  ;;  %v1105_v0 = vmul.f32 %v960_v41, %v2411_v50  ;;  %v1048_v2 = vmul.f32 %v960_v41, %v2399_v40 }
 0x649   :  { %v1131_v9 = vmul.f32 %v960_v41, %v2417_v55  ;;  %v1157_v10 = vmul.f32 %v960_v41, %v2423_v60  ;;  %v2033_v41 = vld [vmem:[%s3129_s18 + $0x8] sm:$0xff] }
 0x64a   :  { %1111 = vrot.lane.b32.xlu0 %v1103_v44, %s3145_s1  ;;  %1003 = vrot.lane.b32.xlu1 %v994_v46, %s2223_s0  ;;  %v1286_v44 = vpop.permute.xlu1 %1285  ;;  %v2037_v46 = vld [vmem:[%s3129_s18 + $0x28] sm:$0xff] }
 0x64e   :  { %1137 = vrot.lane.b32.xlu0 %v1129_v52, %s2219_s8  ;;  %1029 = vrot.lane.b32.xlu1 %v1020_v53, %s2222_s25  ;;  %v1305_v48 = vpop.permute.xlu1 %1304  ;;  %v2039_v52 = vld [vmem:[%s3129_s18 + $0x38] sm:$0xff]  ;;  %v1510_v53 = vld [vmem:[%s3129_s18] sm:$0xff] }
 0x652   :  { %1163 = vrot.lane.b32.xlu0 %v1155_v54, %s3165_s10  ;;  %1055 = vrot.lane.b32.xlu1 %v1046_v56, %s3166_s26  ;;  %v1114_v54 = vpop.permute.xlu1 %1113 }
 0x656   :  { %1394 = vperm.xlu0 %2197, %v2026_v57   ;;  %981 = vrot.lane.b32.xlu1 %v970_v58, %s2224_s4  ;;  %v2871_v56 = vpop.permute.xlu1 %1117 }
 0x65a   :  { %1413 = vperm.xlu0 %2197, %v2028_v59   ;;  %1007 = vrot.lane.b32.xlu1 %v996_v61, %s2223_s0  ;;  %v1324_v57 = vpop.permute.xlu1 %1323 }
 0x65e   :  { %1089 = vrot.lane.b32.xlu0 %v1079_v62, %s2220_s30  ;;  %1033 = vrot.lane.b32.xlu1 %v1022_v63, %s2222_s25  ;;  %v1343_v58 = vpop.permute.xlu1 %1342  ;;  %v2875_v62 = vpop.permute.xlu0 %1375 }
 0x662   :  { %1115 = vrot.lane.b32.xlu0 %v1105_v0, %s3145_s1  ;;  %1059 = vrot.lane.b32.xlu1 %v1048_v2, %s3166_s26  ;;  %v1140_v59 = vpop.permute.xlu1 %1139 }
 0x666   :  { %1141 = vrot.lane.b32.xlu0 %v1131_v9, %s2219_s8  ;;  %1380 = vperm.xlu1 %2198, %v2025_v8   ;;  %v2873_v61 = vpop.permute.xlu1 %1143 }
 0x66a   :  { %1167 = vrot.lane.b32.xlu0 %v1157_v10, %s3165_s10  ;;  %1165 = vrot.lane.b32.xlu1 %v2511_v14, %s3165_s10  ;;  %v2027_v14 = vld [vmem:[%s3126_s14 + $0x68] sm:$0xff]  ;;  %v1362_v63 = vpop.permute.xlu1 %1361 }
 0x66e   :  { %1432 = vperm.xlu0 %2197, %v2030_v15   ;;  %1169 = vrot.lane.b32.xlu1 %v2816_v19, %s3165_s10 }
 0x672   :  { %1448 = vperm.xlu0 %2197, %v1444_v20   ;;  %1399 = vperm.xlu1 %2198, %v2027_v14  }
 0x676   :  { %1463 = vperm.xlu0 %2197, %v1460_v28   ;;  %1418 = vperm.xlu1 %2198, %v2029_v12  }
 0x67a   :  { %1552 = vperm.xlu0 %2197, %v2034_v29   ;;  %1437 = vperm.xlu1 %2198, %v2031_v32  }
 0x67e   :  { %1596 = vperm.xlu0 %2197, %v2036_v34   ;;  %1453 = vperm.xlu1 %2198, %v1445_v35  }
 0x682   :  { %1637 = vperm.xlu0 %2197, %v2038_v38   ;;  %1530 = vperm.xlu1 %2198, %v2033_v41  }
 0x686   :  { %1683 = vperm.xlu0 %2197, %v2040_v42   ;;  %1575 = vperm.xlu1 %2198, %v2035_v13  }
 0x68a   :  { %1614 = vperm.xlu1 %2198, %v2037_v46  }
 0x68e   :  { %1660 = vperm.xlu1 %2198, %v2039_v52  }
 0x692   :  { %1517 = vperm.xlu1 %2198, %v1510_v53  }
 0x6b8   :  { %v1086_v0 = vpop.permute.xlu0 %1085  ;;  %v978_v2 = vpop.permute.xlu1 %977 }
 0x6b9   :  { %v2878_v8 = vsel %vm196_vm5, %v1086_v0, %v1088_v33  ;;  %v983_v14 = vsel %vm101_vm1, %v2731_v21, %v978_v2 }
 0x6ba   :  { %v1288_v34 = vmul.f32 %v2747_v6, %v983_v14 }
 0x6bc   :  { %v1112_v9 = vpop.permute.xlu0 %1111  ;;  %v1004_v10 = vpop.permute.xlu1 %1003 }
 0x6bd   :  { %v2881_v15 = vsel %vm218_vm6, %v1112_v9, %v1114_v54  ;;  %v1009_v20 = vsel %vm123_vm2, %v2735_v23, %v1004_v10 }
 0x6be   :  { %v1307_v29 = vmul.f32 %v2749_v27, %v1009_v20 }
 0x6c0   :  { %v1138_v28 = vpop.permute.xlu0 %1137  ;;  %v1030_v12 = vpop.permute.xlu1 %1029  ;;  %v1309_v38 = vadd.f32 %v1307_v29, %v1288_v34 }
 0x6c1   :  { %v2889_v32 = vsel %vm240_vm7, %v1138_v28, %v1140_v59  ;;  %v1035_v33 = vsel %vm145_vm3, %v2739_v26, %v1030_v12 }
 0x6c2   :  { %v1326_v35 = vmul.f32 %v2751_v7, %v1035_v33 }
 0x6c4   :  { %v1056_v36 = vpop.permute.xlu1 %1055  ;;  %v1328_v21 = vadd.f32 %v1326_v35, %v1309_v38  ;;  %v1164_v53 = vpop.permute.xlu0 %1163 }
 0x6c5   :  { %v1061_v23 = vsel %vm167_vm4, %v2743_v4, %v1056_v36 }
 0x6c6   :  { %v1345_v41 = vmul.f32 %v2753_v39, %v1061_v23 }
 0x6c8   :  { %v982_v42 = vpop.permute.xlu1 %981  ;;  %v1347_v27 = vadd.f32 %v1345_v41, %v1328_v21 }
 0x6c9   :  { %v984_v13 = vsel %vm101_vm1, %v2733_v1, %v982_v42  ;;  %v1383_v42 = vmul.f32 %v2875_v62, %v2878_v8 }
 0x6ca   :  { %v1197_v46 = vpack.c.bf16 %v984_v13, %v983_v14  ;;  %v2901_v26 = vadd.f32 %v2770_v49, %v1347_v27  ;;  %v1289_v49 = vmul.f32 %v1286_v44, %v984_v13 }
 0x6cc   :  { %v1008_v6 = vpop.permute.xlu1 %1007  ;;  %1232 = vmatpush1.bf16.msra.mxu1 %v1197_v46  ;;  %v1385_v46 = vadd.f32 %v1383_v42, %v2901_v26 }
 0x6cd   :  { %v1010_v7 = vsel %vm123_vm2, %v2737_v24, %v1008_v6  ;;  %1233 = vmatprep.subr.bf16.mxu1 %v2225_v22 }
 0x6ce   :  { %v1198_v4 = vpack.c.bf16 %v1010_v7, %v1009_v20  ;;  %v1308_v39 = vmul.f32 %v1305_v48, %v1010_v7 }
 0x6d0   :  { %v1034_v52 = vpop.permute.xlu1 %1033  ;;  %1234 = vmatpush1.bf16.msra.mxu1 %v1198_v4  ;;  %v1310_v2 = vadd.f32 %v1308_v39, %v1289_v49 }
 0x6d1   :  { %v1036_v54 = vsel %vm145_vm3, %v2741_v3, %v1034_v52  ;;  %1235 = vmatprep.subr.bf16.mxu1 %v2225_v22  ;;  %v1365_v3 = vmul.f32 %v1362_v63, %v2758_v43 }
 0x6d2   :  { %v1199_v1 = vpack.c.bf16 %v1036_v54, %v1035_v33  ;;  %v1327_v59 = vmul.f32 %v1324_v57, %v1036_v54 }
 0x6d4   :  { %v1060_v0 = vpop.permute.xlu1 %1059  ;;  %1236 = vmatpush1.bf16.msra.mxu1 %v1199_v1  ;;  %v1329_v48 = vadd.f32 %v1327_v59, %v1310_v2 }
 0x6d5   :  { %v1062_v24 = vsel %vm167_vm4, %v2745_v5, %v1060_v0  ;;  %v1395_v9 = vpop.permute.xlu0 %1394  ;;  %1237 = vmatprep.subr.bf16.mxu1 %v2225_v22 }
 0x6d6   :  { %v1200_v10 = vpack.c.bf16 %v1062_v24, %v1061_v23  ;;  %v1346_v20 = vmul.f32 %v1343_v58, %v1062_v24  ;;  %v1402_v27 = vmul.f32 %v1395_v9, %v2881_v15  ;;  %v2945_v9 = vmul.f32 %v2812_v17, %v2390_v31 }
 0x6d8   :  { %1238 = vmatpush1.bf16.msra.mxu1 %v1200_v10  ;;  %v1348_v14 = vadd.f32 %v1346_v20, %v1329_v48  ;;  %v1404_v52 = vadd.f32 %v1402_v27, %v1385_v46  ;;  %v1458_v20 = vld [vmem:[%s3131_s16] sm:$0xf]  ;;  %s2228_s16 = smov 118   ;;  %v2986_v46 = vmul.f32 %v2812_v17, %v2417_v55 }
 0x6d9   :  { %v1414_v28 = vpop.permute.xlu0 %1413  ;;  %1239 = vmatprep.subr.bf16.mxu1 %v2225_v22 }
 0x6da   :  { %v1367_v44 = vadd.f32 %v1365_v3, %v1348_v14  ;;  %v1421_v6 = vmul.f32 %v1414_v28, %v2889_v32  ;;  %v2953_v3 = vmul.f32 %v2812_v17, %v2386_v30 }
 0x6dc   :  { %1240 = vmatpush1.bf16.msra.mxu1 %v1201_v51 }
 0x6dd   :  { %v1090_v57 = vpop.permute.xlu0 %1089  ;;  %1241 = vmatprep.subr.bf16.mxu1 %v2225_v22 }
 0x6de   :  { %v1094_v5 = vsel %vm196_vm5, %v1090_v57, %v2848_v37  ;;  %v2960_v57 = vmul.f32 %v2812_v17, %v2399_v40 }
 0x6df   :  { %v1202_v58 = vpack.c.bf16 %v1094_v5, %v2878_v8  ;;  %v1423_v8 = vadd.f32 %v1421_v6, %v1404_v52 }
 0x6e1   :  { %v1116_v12 = vpop.permute.xlu0 %1115  ;;  %1242 = vmatpush1.bf16.msra.mxu1 %v1202_v58 }
 0x6e2   :  { %v1120_v63 = vsel %vm218_vm6, %v1116_v12, %v2871_v56  ;;  %1243 = vmatprep.subr.bf16.mxu1 %v2225_v22 }
 0x6e3   :  { %v1203_v29 = vpack.c.bf16 %v1120_v63, %v2881_v15 }
 0x6e5   :  { %v1142_v33 = vpop.permute.xlu0 %1141  ;;  %v1381_v43 = vpop.permute.xlu1 %1380  ;;  %1244 = vmatpush1.bf16.msra.mxu1 %v1203_v29 }
 0x6e6   :  { %v1146_v47 = vsel %vm240_vm7, %v1142_v33, %v2873_v61  ;;  %1245 = vmatprep.subr.bf16.mxu1 %v2225_v22  ;;  %v1384_v36 = vmul.f32 %v1381_v43, %v1094_v5  ;;  %v2203_v61 = vld [vmem:[%s3130_s12] ss:$8 sps:$4 sm:$0x7f]   ;;  %v2972_v43 = vmul.f32 %v2812_v17, %v2411_v50 }
 0x6e7   :  { %v1204_v51 = vpack.c.bf16 %v1146_v47, %v2889_v32 }
 0x6e8   :  { %v1386_v13 = vadd.f32 %v1384_v36, %v1367_v44 }
 0x6e9   :  { %v1166_v37 = vpop.permute.xlu1 %1165  ;;  %1246 = vmatpush1.bf16.msra.mxu1 %v1204_v51  ;;  %v1168_v56 = vpop.permute.xlu0 %1167 }
 0x6ea   :  { %v1171_v34 = vsel %vm262_vm8, %v1164_v53, %v1166_v37  ;;  %1247 = vmatprep.subr.bf16.mxu1 %v2225_v22 }
 0x6ed   :  { %v1170_v35 = vpop.permute.xlu1 %1169  ;;  %v1433_v21 = vpop.permute.xlu0 %1432 }
 0x6ee   :  { %v1172_v38 = vsel %vm262_vm8, %v1168_v56, %v1170_v35  ;;  %v1440_v39 = vmul.f32 %v1433_v21, %v1171_v34 }
 0x6ef   :  { %v1205_v23 = vpack.c.bf16 %v1172_v38, %v1171_v34 }
 0x6f0   :  { %v1442_v54 = vadd.f32 %v1440_v39, %v1423_v8 }
 0x6f1   :  { %v1400_v41 = vpop.permute.xlu1 %1399  ;;  %1248 = vmatpush1.bf16.msra.mxu1 %v1205_v23  ;;  %v1449_v62 = vpop.permute.xlu0 %1448 }
 0x6f2   :  { %v1403_v22 = vmul.f32 %v1400_v41, %v1120_v63  ;;  %2154 = vmatprep.subr.bf16.mxu1 %v2812_v17  ;;  %v1456_v2 = vadd.f32 %v1449_v62, %v1442_v54  ;;  %v2966_v63 = vmul.f32 %v2812_v17, %v2405_v45 }
 0x6f4   :  { %v1405_v7 = vadd.f32 %v1403_v22, %v1386_v13  ;;  %1264 = vmatmul.mubr.bf16.vlgmr.msra.gmra.mrb[8].mxu1 %v2203_v61 }
 0x6f5   :  { %v1419_v4 = vpop.permute.xlu1 %1418  ;;  %2156 = vmatprep.mubr.msk.bf16.mxu1 %vm2226_vm0, %v2812_v17  ;;  %v1464_v0 = vpop.permute.xlu0 %1463 }
 0x6f6   :  { %v1422_v53 = vmul.f32 %v1419_v4, %v1146_v47 }
 0x6f8   :  { %v1424_v1 = vadd.f32 %v1422_v53, %v1405_v7 }
 0x6f9   :  { %v1438_v15 = vpop.permute.xlu1 %1437  ;;  %v1553_v14 = vpop.permute.xlu0 %1552 }
 0x6fa   :  { %v1441_v49 = vmul.f32 %v1438_v15, %v1172_v38  ;;  %v1555_v44 = vmul.f32 %v1553_v14, %v2953_v3 }
 0x6fc   :  { %v1443_v59 = vadd.f32 %v1441_v49, %v1424_v1 }
 0x6fd   :  { %v1454_v26 = vpop.permute.xlu1 %1453  ;;  %v1597_v5 = vpop.permute.xlu0 %1596 }
 0x6fe   :  { %v1457_v32 = vadd.f32 %v1454_v26, %v1443_v59 }
 0x700   :  { %v1459_v24 = vpack.c.bf16 %v1457_v32, %v1456_v2 }
 0x701   :  { %v1531_v10 = vpop.permute.xlu1 %1530  ;;  %v1638_v33 = vpop.permute.xlu0 %1637 }
 0x702   :  { %v1533_v48 = vmul.f32 %v1531_v10, %v2945_v9  ;;  %2155 = vmatpush3.bf16.msra.mxu1 %v1459_v24  ;;  %v1641_v47 = vmul.f32 %v1638_v33, %v2972_v43 }
 0x704   :  { %1537 = vrot.lane.b32.xlu0 %v1533_v48, %s2220_s30  ;;  %v1513_v48 = vmul.f32 %v2812_v17, %v2382_v25 }
 0x705   :  { %2157 = vmatmul.mubr.msk.bf16.vlgmr.msra.gmra.mrb[12].mxu1 %vm1227_vm13, %v1458_v20  ;;  %v1576_v28 = vpop.permute.xlu1 %1575  ;;  %v1684_v52 = vpop.permute.xlu0 %1683  ;;  %vm1694_vm13 = vcmask 900096  }
 0x706   :  { %v1578_v58 = vmul.f32 %v1576_v28, %v2960_v57  ;;  %v1687_v39 = vmul.f32 %v1684_v52, %v2816_v19 }
 0x708   :  { %1559 = vrot.lane.b32.xlu0 %v1555_v44, %s2227_s29 }
 0x709   :  { %v1615_v12 = vpop.permute.xlu1 %1614 }
 0x70a   :  { %v1618_v29 = vmul.f32 %v1615_v12, %v2966_v63 }
 0x70c   :  { %1582 = vrot.lane.b32.xlu0 %v1578_v58, %s2219_s8 }
 0x70d   :  { %v1661_v22 = vpop.permute.xlu1 %1660 }
 0x70e   :  { %v1664_v6 = vmul.f32 %v1661_v22, %v2986_v46 }
 0x710   :  { %1623 = vrot.lane.b32.xlu0 %v1618_v29, %s2228_s16 }
 0x711   :  { %v1518_v32 = vpop.permute.xlu1 %1517 }
 0x712   :  { %v1520_v44 = vmul.f32 %v1518_v32, %v1513_v48 }
 0x714   :  { %1646 = vrot.lane.b32.xlu0 %v1641_v47, %s2229_s15 }
 0x776   :  { %v1538_v26 = vpop.permute.xlu0 %1537 }
 0x77a   :  { %v1560_v2 = vpop.permute.xlu0 %1559 }
 0x77e   :  { %v1583_v24 = vpop.permute.xlu0 %1582 }
 0x782   :  { %v1624_v20 = vpop.permute.xlu0 %1623 }
 0x7c7   :  { %v2977_v51 = vpop.f32.mrb[8].mxu1 }
 0x7c8   :  { %v1267_v37 = vpop.f32.mrb[9].mxu1 }
 0x7c9   :  { %v2979_v34 = vpop.f32.mrb[10].mxu1 }
 0x7ca   :  { %v1270_v56 = vpop.f32.mrb[11].mxu1 }
 0x7d8   :  { %v1503_v35 = vpop.f32.mrb[12].mxu1 }
 0x7d9   :  { %v1504_v36 = vadd.f32 %v1503_v35, %v1464_v0  ;;  %v2158_v38 = vpop.f32.mrb[13].mxu1 }
 0x7da   :  { %v1506_v23 = vpop.f32.mrb[14].mxu1 }
 0x7db   :  { %v2159_v61 = vpop.f32.mrb[15].mxu1  ;;  %v1527_v21 = vmul.f32 %v1504_v36, %v2390_v31  ;;  %v1593_v41 = vmul.f32 %v1504_v36, %v2367_v11  ;;  %v1549_v13 = vmul.f32 %v1504_v36, %v2386_v30  ;;  %v1572_v4 = vmul.f32 %v1504_v36, %v2399_v40 }
 0x7dc   :  { %v1610_v62 = vmul.f32 %v1504_v36, %v2405_v45  ;;  %v1633_v15 = vmul.f32 %v1504_v36, %v2411_v50  ;;  %v1656_v1 = vmul.f32 %v1504_v36, %v2417_v55  ;;  %v1679_v59 = vmul.f32 %v1504_v36, %v2423_v60 }
 0x7dd   :  { %v1534_v42 = vmul.f32 %v1531_v10, %v1527_v21  ;;  %v1599_v27 = vmul.f32 %v1597_v5, %v1593_v41  ;;  %v1556_v7 = vmul.f32 %v1553_v14, %v1549_v13  ;;  %v1579_v53 = vmul.f32 %v1576_v28, %v1572_v4 }
 0x7de   :  { %v1617_v8 = vmul.f32 %v1615_v12, %v1610_v62  ;;  %v1640_v54 = vmul.f32 %v1638_v33, %v1633_v15  ;;  %v1663_v49 = vmul.f32 %v1661_v22, %v1656_v1  ;;  %v1686_v0 = vmul.f32 %v1684_v52, %v1679_v59  ;;  %v1647_v33 = vpop.permute.xlu0 %1646 }
 0x7df   :  { %1539 = vrot.lane.b32.xlu1 %v1534_v42, %s2220_s30  ;;  %1601 = vrot.lane.b32.xlu0 %v1599_v27, %s3165_s10  ;;  %v1514_v14 = vmul.f32 %v1504_v36, %v2382_v25 }
 0x7e1   :  { %v1521_v12 = vmul.f32 %v1518_v32, %v1514_v14 }
 0x7e3   :  { %1561 = vrot.lane.b32.xlu1 %v1556_v7, %s2227_s29  ;;  %1669 = vrot.lane.b32.xlu0 %v1664_v6, %s2230_s2 }
 0x7e7   :  { %1584 = vrot.lane.b32.xlu1 %v1579_v53, %s2219_s8  ;;  %1692 = vrot.lane.b32.xlu0 %v1687_v39, %s2231_s27 }
 0x7eb   :  { %1621 = vrot.lane.b32.xlu1 %v1617_v8, %s2228_s16 }
 0x7ef   :  { %1644 = vrot.lane.b32.xlu1 %v1640_v54, %s2229_s15 }
 0x7f3   :  { %1667 = vrot.lane.b32.xlu1 %v1663_v49, %s2230_s2 }
 0x7f7   :  { %1690 = vrot.lane.b32.xlu1 %v1686_v0, %s2231_s27  ;;  %v2204_v0 = vld [vmem:[%s3132_s19] sm:$0xff]  }
 0x7f8   :  { %2162 = vmatprep.mubr.msk.bf16.mxu0 %vm123_vm2, %v2204_v0 }
 0x851   :  { %v1540_v10 = vpop.permute.xlu1 %1539  ;;  %v1602_v61 = vpop.permute.xlu0 %1601 }
 0x852   :  { %v1541_v28 = vsel %vm196_vm5, %v1538_v26, %v1540_v10  ;;  %v1545_v47 = vadd.f32 %v1540_v10, %v1521_v12 }
 0x853   :  { %v1544_v29 = vadd.f32 %v1541_v28, %v1520_v44 }
 0x855   :  { %v1562_v5 = vpop.permute.xlu1 %1561  ;;  %v1670_v6 = vpop.permute.xlu0 %1669 }
 0x856   :  { %v1564_v58 = vsel %vm1563_vm14, %v1560_v2, %v1562_v5  ;;  %v1568_v38 = vadd.f32 %v1562_v5, %v1545_v47 }
 0x857   :  { %v1567_v37 = vadd.f32 %v1564_v58, %v1544_v29 }
 0x859   :  { %v1585_v56 = vpop.permute.xlu1 %1584  ;;  %v1693_v15 = vpop.permute.xlu0 %1692 }
 0x85a   :  { %v1586_v35 = vsel %vm240_vm7, %v1583_v24, %v1585_v56  ;;  %v1590_v21 = vadd.f32 %v1585_v56, %v1568_v38 }
 0x85b   :  { %v1589_v23 = vadd.f32 %v1586_v35, %v1567_v37 }
 0x85c   :  { %v1605_v42 = vadd.f32 %v1602_v61, %v1590_v21 }
 0x85d   :  { %v1622_v41 = vpop.permute.xlu1 %1621  ;;  %v1604_v36 = vadd.f32 %v1602_v61, %v1589_v23 }
 0x85e   :  { %v1626_v13 = vsel %vm1625_vm15, %v1622_v41, %v1624_v20 }
 0x85f   :  { %v1629_v22 = vadd.f32 %v1622_v41, %v1604_v36  ;;  %v1630_v4 = vadd.f32 %v1626_v13, %v1605_v42 }
 0x861   :  { %v1645_v27 = vpop.permute.xlu1 %1644 }
 0x862   :  { %v1649_v7 = vsel %vm1648_vm9, %v1645_v27, %v1647_v33  ;;  %v1652_v39 = vadd.f32 %v1645_v27, %v1629_v22 }
 0x863   :  { %v1653_v62 = vadd.f32 %v1649_v7, %v1630_v4 }
 0x865   :  { %v1668_v52 = vpop.permute.xlu1 %1667 }
 0x866   :  { %v1672_v53 = vsel %vm1671_vm10, %v1668_v52, %v1670_v6  ;;  %v1675_v8 = vadd.f32 %v1668_v52, %v1652_v39 }
 0x867   :  { %v1676_v54 = vadd.f32 %v1672_v53, %v1653_v62 }
 0x869   :  { %v1691_v1 = vpop.permute.xlu1 %1690 }
 0x86a   :  { %v1695_v49 = vsel %vm1694_vm13, %v1691_v1, %v1693_v15  ;;  %v1698_v59 = vadd.f32 %v1691_v1, %v1675_v8 }
 0x86b   :  { %v1699_v26 = vadd.f32 %v1695_v49, %v1676_v54 }
 0x86c   :  { %v1700_v2 = vmax.f32 %v1698_v59, 0.0 }
 0x86d   :  { %v1701_v32 = vmax.f32 %v1699_v26, 0.0 }
 0x86e   :  { %v1702_v24 = vmin.f32 %v1700_v2, 6.0 }
 0x86f   :  { %v1703_v10 = vmin.f32 %v1701_v32, 6.0 }
 0x870   :  { %v1708_v20 = vpack.c.bf16 %v1702_v24, %v1702_v24 }
 0x871   :  { %v1709_v14 = vpack.c.bf16 %v1703_v10, %v1703_v10 }
 0x872   :  { %1722 = vrot.lane.b32.xlu1 %v1708_v20, %s2224_s4 }
 0x873   :  { %1724 = vrot.lane.b32.xlu0 %v1709_v14, %s2224_s4 }
 0x876   :  { %1810 = vrot.lane.b32.xlu1 %v1513_v48, %s2224_s4 }
 0x877   :  { %1867 = vrot.lane.b32.xlu0 %v2966_v63, %s2220_s30  ;;  %v2205_v63 = vld [vmem:[%s3132_s19 + $0x8] sm:$0xff]   ;;  %s3167_s19 = smov 121  }
 0x87a   :  { %1823 = vrot.lane.b32.xlu1 %v2945_v9, %s2223_s0 }
 0x87e   :  { %1836 = vrot.lane.b32.xlu1 %v2953_v3, %s2222_s25 }
 0x882   :  { %1849 = vrot.lane.b32.xlu1 %v2960_v57, %s3166_s26 }
 0x8e4   :  { %v1723_v28 = vpop.permute.xlu1 %1722 }
 0x8e5   :  { %v1725_v44 = vpop.permute.xlu0 %1724 }
 0x8e6   :  { %v1727_v5 = vsel %vm101_vm1, %v1723_v28, %v1725_v44 }
 0x8e7   :  { %v1735_v58 = vsel %vm464_vm11, %v1727_v5, 0  ;;  %2180 = vmatprep.subr.msk.bf16.mxu0 %vm464_vm11, %v1727_v5 }
 0x8e8   :  { %2161 = vmatpush3.bf16.msra.mxu0 %v1735_v58 }
 0x8e9   :  { %2166 = vmatprep.subr.bf16.mxu0 %v2812_v17  ;;  %v1868_v39 = vpop.permute.xlu0 %1867 }
 0x8eb   :  { %2163 = vmatmul.mubr.msk.bf16.vlgmr.msra.gmra.mrb[12].mxu0 %vm123_vm2, %v2205_v63 }
 0x8ec   :  { %2176 = vmatprep.mubr.msk.bf16.mxu0 %vm2226_vm0, %v2812_v17 }
 0x9be   :  { %v2164_v9 = vpop.f32.mrb[12].mxu0 }
 0x9bf   :  { %v1771_v3 = vpop.f32.mrb[13].mxu0  ;;  %v2046_v57 = vmul.f32 -1.442695, %v2164_v9 }
 0x9c0   :  { %v2045_v48 = vmul.f32 -1.442695, %v1771_v3  ;;  %v2165_v12 = vpop.f32.mrb[14].mxu0 }
 0x9c1   :  { %v1774_v29 = vpop.f32.mrb[15].mxu0  ;;  %v1797_v35 = vmax.f32 %v2165_v12, 0.0  ;;  %v2206_v12 = vld [vmem:[%s3136_s20] sm:$0x7f]  }
 0x9c2   :  { %2207 = vpow2.f32 %v2045_v48 }
 0x9c3   :  { %2209 = vpow2.f32 %v2046_v57  ;;  %v1798_v38 = vmin.f32 %v1797_v35, 6.0 }
 0x9cc   :  { %v2208_v33 = vpop.eup %2207 }
 0x9cd   :  { %v1788_v47 = vadd.f32 1.0, %v2208_v33  ;;  %v2210_v37 = vpop.eup %2209 }
 0x9ce   :  { %v1794_v56 = vadd.f32 1.0, %v2210_v37 }
 0x9cf   :  { %2211 = vrcp.f32 %v1788_v47 }
 0x9d0   :  { %2213 = vrcp.f32 %v1794_v56 }
 0x9d9   :  { %v2212_v23 = vpop.eup %2211 }
 0x9da   :  { %v1799_v61 = vmul.f32 %v2212_v23, %v1798_v38  ;;  %v2214_v36 = vpop.eup %2213 }
 0x9dc   :  { %v1800_v21 = vmax.f32 %v1799_v61, 0.0 }
 0x9de   :  { %v1801_v41 = vmin.f32 %v1800_v21, 6.0 }
 0x9e0   :  { %v1802_v42 = vmul.f32 %v2214_v36, %v1801_v41 }
 0x9e2   :  { %1803 = vst [vmem:[#allocation2 + $0x8] sm:$0xff] %v1802_v42  ;;  %v3032_v27 = vmul.f32 %v1802_v42, %v2367_v11  ;;  %v1861_v13 = vmul.f32 %v1802_v42, %v2405_v45  ;;  %v1807_v22 = vmul.f32 %v1802_v42, %v2382_v25  ;;  %v1874_v6 = vmul.f32 %v1802_v42, %v2411_v50  ;;  %v635_v50 = vld [vmem:[%s3133_s7 + $0x8] sm:$0x3f] }
 0x9e3   :  { %v1820_v7 = vmul.f32 %v1802_v42, %v2390_v31  ;;  %v1887_v11 = vmul.f32 %v1802_v42, %v2417_v55  ;;  %v1833_v45 = vmul.f32 %v1802_v42, %v2386_v30  ;;  %v1900_v25 = vmul.f32 %v1802_v42, %v2423_v60  ;;  %v634_v31 = vld [vmem:[%s3133_s7] sm:$0xff]  ;;  %v1207_v55 = vld [vmem:[%s3134_s13 + $0x8] sm:$0x3f] }
 0x9e4   :  { %1858 = vst [vmem:[#allocation3 + $0x20] sm:$0xff] %v3032_v27  ;;  %1865 = vrot.lane.b32.xlu1 %v1861_v13, %s2220_s30  ;;  %1812 = vrot.lane.b32.xlu0 %v1807_v22, %s2224_s4  ;;  %v1846_v4 = vmul.f32 %v1802_v42, %v2399_v40  ;;  %v1206_v30 = vld [vmem:[%s3134_s13] sm:$0xff]  ;;  %v1928_v60 = vld [vmem:[%s3135_s21 + $0x8] sm:$0x3f] }
 0x9e5   :  { %v1927_v40 = vld [vmem:[%s3135_s21] sm:$0xff] }
 0x9e8   :  { %1878 = vrot.lane.b32.xlu1 %v1874_v6, %s3167_s19  ;;  %1825 = vrot.lane.b32.xlu0 %v1820_v7, %s2223_s0 }
 0x9ec   :  { %1891 = vrot.lane.b32.xlu1 %v1887_v11, %s2219_s8  ;;  %1838 = vrot.lane.b32.xlu0 %v1833_v45, %s2222_s25 }
 0x9f0   :  { %1904 = vrot.lane.b32.xlu1 %v1900_v25, %s3165_s10  ;;  %1851 = vrot.lane.b32.xlu0 %v1846_v4, %s3166_s26 }
 0x9f4   :  { %638 = vperm.xlu1 %2198, %v634_v31   ;;  %1880 = vrot.lane.b32.xlu0 %v2972_v43, %s3167_s19  ;;  %v1811_v43 = vpop.permute.xlu1 %1810 }
 0x9f8   :  { %1210 = vperm.xlu1 %2198, %v1206_v30   ;;  %1893 = vrot.lane.b32.xlu0 %v2986_v46, %s2219_s8  ;;  %v1824_v46 = vpop.permute.xlu1 %1823 }
 0x9fc   :  { %1931 = vperm.xlu1 %2198, %v1927_v40   ;;  %1906 = vrot.lane.b32.xlu0 %v2816_v19, %s3165_s10  ;;  %v1837_v52 = vpop.permute.xlu1 %1836 }
 0xa00   :  { %643 = vperm.xlu0 %2197, %v635_v50   ;;  %v1850_v19 = vpop.permute.xlu1 %1849 }
 0xa04   :  { %1215 = vperm.xlu0 %2197, %v1207_v55  }
 0xa08   :  { %1936 = vperm.xlu0 %2197, %v1928_v60  }
 0xa56   :  { %v1866_v53 = vpop.permute.xlu1 %1865  ;;  %v1813_v62 = vpop.permute.xlu0 %1812 }
 0xa57   :  { %v1869_v8 = vsel %vm196_vm5, %v1866_v53, %v1868_v39  ;;  %v1814_v15 = vsel %vm101_vm1, %v1811_v43, %v1813_v62 }
 0xa58   :  { %1816 = vst [vmem:[#allocation3] sm:$0xff] %v1814_v15  ;;  %v1924_v28 = vpack.c.bf16 %v1869_v8, %v3032_v27 }
 0xa5a   :  { %v1826_v54 = vpop.permute.xlu0 %1825  ;;  %v1879_v26 = vpop.permute.xlu1 %1878 }
 0xa5b   :  { %v1827_v1 = vsel %vm123_vm2, %v1824_v46, %v1826_v54 }
 0xa5c   :  { %1829 = vst [vmem:[#allocation3 + $0x8] sm:$0xff] %v1827_v1  ;;  %v1922_v49 = vpack.c.bf16 %v1827_v1, %v1814_v15 }
 0xa5e   :  { %v1839_v59 = vpop.permute.xlu0 %1838  ;;  %2167 = vmatpush3.bf16.msra.mxu0 %v1922_v49  ;;  %v1892_v14 = vpop.permute.xlu1 %1891 }
 0xa5f   :  { %v1840_v0 = vsel %vm145_vm3, %v1837_v52, %v1839_v59  ;;  %2168 = vmatprep.subr.bf16.mxu0 %v2812_v17 }
 0xa60   :  { %1842 = vst [vmem:[#allocation3 + $0x10] sm:$0xff] %v1840_v0 }
 0xa62   :  { %v1852_v2 = vpop.permute.xlu0 %1851  ;;  %v1905_v63 = vpop.permute.xlu1 %1904 }
 0xa63   :  { %v1853_v32 = vsel %vm167_vm4, %v1850_v19, %v1852_v2 }
 0xa64   :  { %1855 = vst [vmem:[#allocation3 + $0x18] sm:$0xff] %v1853_v32  ;;  %v1923_v24 = vpack.c.bf16 %v1853_v32, %v1840_v0 }
 0xa66   :  { %v1881_v10 = vpop.permute.xlu0 %1880  ;;  %2169 = vmatpush3.bf16.msra.mxu0 %v1923_v24 }
 0xa67   :  { %v1882_v20 = vsel %vm218_vm6, %v1879_v26, %v1881_v10  ;;  %2170 = vmatprep.subr.bf16.mxu0 %v2812_v17 }
 0xa6a   :  { %v1894_v44 = vpop.permute.xlu0 %1893  ;;  %2171 = vmatpush3.bf16.msra.mxu0 %v1924_v28 }
 0xa6b   :  { %v1895_v5 = vsel %vm240_vm7, %v1892_v14, %v1894_v44  ;;  %2172 = vmatprep.subr.bf16.mxu0 %v2812_v17 }
 0xa6c   :  { %v1925_v58 = vpack.c.bf16 %v1895_v5, %v1882_v20 }
 0xa6e   :  { %v1907_v9 = vpop.permute.xlu0 %1906  ;;  %2173 = vmatpush3.bf16.msra.mxu0 %v1925_v58 }
 0xa6f   :  { %v1908_v3 = vsel %vm262_vm8, %v1905_v63, %v1907_v9  ;;  %2174 = vmatprep.subr.bf16.mxu0 %v2812_v17 }
 0xa70   :  { %v1926_v57 = vpack.c.bf16 %v1908_v3, %v1908_v3 }
 0xa72   :  { %v1948_v48 = vsel %vm464_vm11, %v1926_v57, 0 }
 0xa73   :  { %v639_v29 = vpop.permute.xlu1 %638  ;;  %2175 = vmatpush3.bf16.msra.mxu0 %v1948_v48 }
 0xa74   :  { %v692_v33 = vadd.f32 %v2727_v16, %v639_v29 }
 0xa76   :  { %698 = vst [vmem:[%s3137_s22] sm:$0xff] %v692_v33  ;;  %2177 = vmatmul.mubr.msk.bf16.vlgmr.msra.gmra.mrb[16].mxu0 %vm460_vm12, %v2206_v12 }
 0xa77   :  { %v1211_v47 = vpop.permute.xlu1 %1210 }
 0xa78   :  { %v1266_v17 = vadd.f32 %v2977_v51, %v1211_v47 }
 0xa7a   :  { %1272 = vst [vmem:[%s3138_s23] sm:$0xff] %v1266_v17 }
 0xa7b   :  { %v1932_v38 = vpop.permute.xlu1 %1931 }
 0xa7f   :  { %v644_v37 = vpop.permute.xlu0 %643 }
 0xa80   :  { %v695_v56 = vadd.f32 %v2729_v18, %v644_v37 }
 0xa82   :  { %699 = vst [vmem:[%s3137_s22 + $0x8] sm:$0x3f] %v695_v56 }
 0xa83   :  { %v1216_v16 = vpop.permute.xlu0 %1215 }
 0xa84   :  { %v1269_v35 = vadd.f32 %v2979_v34, %v1216_v16 }
 0xa86   :  { %1273 = vst [vmem:[%s3138_s23 + $0x8] sm:$0x3f] %v1269_v35 }
 0xa87   :  { %v1937_v21 = vpop.permute.xlu0 %1936 }
 0xb49   :  { %v1984_v51 = vpop.f32.mrb[16].mxu0 }
 0xb4a   :  { %v1985_v23 = vadd.f32 %v1984_v51, %v1932_v38  ;;  %v2178_v61 = vpop.f32.mrb[17].mxu0 }
 0xb4b   :  { %v1987_v41 = vpop.f32.mrb[18].mxu0 }
 0xb4c   :  { %1991 = vst [vmem:[%s3139_s24] sm:$0xff] %v1985_v23  ;;  %v1988_v18 = vadd.f32 %v1987_v41, %v1937_v21  ;;  %v2179_v36 = vpop.f32.mrb[19].mxu0 }
 0xb4e   :  { %1992 = vst [vmem:[%s3139_s24 + $0x8] sm:$0x3f] %v1988_v18 }

</bundles_post_ra>
